<compile_context>
chip_gen: v6e
topology: v6e:2x2x1
jax: 0.10.0
libtpu: 0.0.40
codegen_flags: <defaults>
</compile_context>

<pallas_src>
import functools

import jax
import jax.numpy as jnp
from jax.experimental import pallas as pl
from jax.experimental.pallas import tpu as pltpu


def _round_up(x, m):
    return ((x + m - 1) // m) * m


# ----------------------- Recurrent (LSTM) kernel --------------------------- #
def _lstm_recurrent_kernel(x_ref,        # (Tc, Bb, Ep)      bf16  embedded chunk
                           w0_ref,       # (Ep+Hp, 4Hp)      bf16  [Wih0 ; Whh0]
                           b0_ref,       # (1, 4Hp)          f32   b_ih0 + b_hh0
                           w1_ref,       # (2Hp, 4Hp)        bf16  [Wih1 ; Whh1]
                           b1_ref,       # (1, 4Hp)          f32   b_ih1 + b_hh1
                           hid_ref,      # out (Tc, Bb, Hp)  bf16  layer-1 h
                           h0_sc, c0_sc, h1_sc, c1_sc,   # (Bb, Hp) f32 state
                           xh0_sc,       # (Bb, Ep+Hp) bf16  fused cell-0 input
                           xh1_sc,       # (Bb, 2Hp)   bf16  fused cell-1 input
                           hid_sc,       # (Tc, Bb, Hp) f32  per-chunk h buffer
                           *, hidden_pad, embed_pad, t_chunk):
    t_blk = pl.program_id(1)

    @pl.when(t_blk == 0)
    def _():
        h0_sc[...] = jnp.zeros_like(h0_sc)
        c0_sc[...] = jnp.zeros_like(c0_sc)
        h1_sc[...] = jnp.zeros_like(h1_sc)
        c1_sc[...] = jnp.zeros_like(c1_sc)

    Hp = hidden_pad
    Ep = embed_pad
    Bb = h0_sc.shape[0]

    # Hoist bias broadcasts out of the unrolled time loop (broadcast_in_dim is
    # not CSE'd by JAX).
    b0 = jnp.broadcast_to(b0_ref[...], (Bb, 4 * Hp))
    b1 = jnp.broadcast_to(b1_ref[...], (Bb, 4 * Hp))

    def cell(xh_ref, c, w_ref, bias):
        # Single fused [x | h] @ [Wih ; Whh] matmul: bf16 operands, f32 accum.
        gates = jnp.dot(xh_ref[...], w_ref[...],
                        preferred_element_type=jnp.float32) + bias
        # PyTorch gate order i, f, g, o; each slab is a whole 128-lane block.
        i_g = jax.nn.sigmoid(gates[:, 0 * Hp:1 * Hp])
        f_g = jax.nn.sigmoid(gates[:, 1 * Hp:2 * Hp])
        g_g = jnp.tanh(gates[:, 2 * Hp:3 * Hp])
        o_g = jax.nn.sigmoid(gates[:, 3 * Hp:4 * Hp])
        c_new = f_g * c + i_g * g_g
        h_new = o_g * jnp.tanh(c_new)
        return h_new, c_new

    h0 = h0_sc[...]
    c0 = c0_sc[...]
    h1 = h1_sc[...]
    c1 = c1_sc[...]

    # Static unroll over the time chunk (Tc is small).
    for t in range(t_chunk):
        # Layer 0: fused input [x_t | h0]  (lane-aligned slab writes).
        xh0_sc[:, :Ep] = x_ref[t]
        xh0_sc[:, Ep:] = h0.astype(jnp.bfloat16)
        h0, c0 = cell(xh0_sc, c0, w0_ref, b0)

        # Layer 1: fused input [h0 | h1].
        xh1_sc[:, :Hp] = h0.astype(jnp.bfloat16)
        xh1_sc[:, Hp:] = h1.astype(jnp.bfloat16)
        h1, c1 = cell(xh1_sc, c1, w1_ref, b1)

        hid_sc[t] = h1                        # dense f32 (Bb, Hp) store

    # One full-block bf16 store per chunk: halves HBM traffic of the
    # intermediate without any per-step packed/masked sublane stores.
    hid_ref[...] = hid_sc[...].astype(jnp.bfloat16)

    h0_sc[...] = h0
    c0_sc[...] = c0
    h1_sc[...] = h1
    c1_sc[...] = c1


# ---------------------- Hoisted output projection -------------------------- #
def _fc_kernel(hid_ref,     # (1, t_fc, Hp) bf16  one batch row's hidden chunk
               wfc_ref,     # (Hp, Vp)      bf16
               bfc_ref,     # (1, Vp)       f32
               out_ref):    # (1, t_fc, Vp) f32   batch-first logits
    h = hid_ref[0]                                          # (t_fc, Hp) bf16
    logits = jnp.dot(h, wfc_ref[...], preferred_element_type=jnp.float32)
    out_ref[0] = logits + bfc_ref[...]                      # lane-dense store


# ------------------------- Parameter preparation ---------------------------- #
def _prepare_padded(params):
    """Pad E/H/V to multiples of 128, stack [Wih;Whh], cast matmul weights to
    bf16.  Padding is zero so padded units stay exactly zero."""
    emb = params["embedding"]
    V, E = emb.shape
    H = params["whh0"].shape[0]
    Ep, Hp, Vp = _round_up(E, 128), _round_up(H, 128), _round_up(V, 128)

    def pad_gate_cols(w):  # (K, 4H) -> (K, 4Hp), each gate in its own 128 block
        parts = [jnp.pad(w[:, g * H:(g + 1) * H], ((0, 0), (0, Hp - H)))
                 for g in range(4)]
        return jnp.concatenate(parts, axis=-1)

    wih0 = jnp.pad(pad_gate_cols(params["wih0"]), ((0, Ep - E), (0, 0)))
    whh0 = jnp.pad(pad_gate_cols(params["whh0"]), ((0, Hp - H), (0, 0)))
    wih1 = jnp.pad(pad_gate_cols(params["wih1"]), ((0, Hp - H), (0, 0)))
    whh1 = jnp.pad(pad_gate_cols(params["whh1"]), ((0, Hp - H), (0, 0)))

    return dict(
        emb=jnp.pad(emb, ((0, 0), (0, Ep - E))).astype(jnp.bfloat16),
        w0=jnp.concatenate([wih0, whh0], axis=0).astype(jnp.bfloat16),
        b0=pad_gate_cols(params["b0"]),
        w1=jnp.concatenate([wih1, whh1], axis=0).astype(jnp.bfloat16),
        b1=pad_gate_cols(params["b1"]),
        wfc=jnp.pad(params["wfc"], ((0, Hp - H), (0, Vp - V))).astype(jnp.bfloat16),
        bfc=jnp.pad(params["bfc"], ((0, 0), (0, Vp - V))),
        E=E, H=H, V=V, Ep=Ep, Hp=Hp, Vp=Vp,
    )


# ------------------------------ Forward ------------------------------------- #
def lstm_ghazal_forward(token_ids, params, *, t_chunk=8, b_block=8):
    """token_ids: (B, T) int32.  Returns logits (B, T, vocab) float32."""
    pp = _prepare_padded(params)
    B, T = token_ids.shape
    Tp = _round_up(T, t_chunk)
    Bp = _round_up(B, b_block)
    Ep, Hp, Vp = pp["Ep"], pp["Hp"], pp["Vp"]

    # Pad batch/time with padding token 0 (its embedding row is zero).
    tok = jnp.pad(token_ids, ((0, Bp - B), (0, Tp - T)))
    # Gather directly into TIME-MAJOR layout -> no transpose pass of the
    # embedded activations.
    # TODO(synk): the embedding gather stays in XLA; it could be fused into the
    # recurrent kernel via scalar-prefetched token ids (pl.Element row gather).
    x_tm = jnp.take(pp["emb"], tok.T, axis=0)          # (Tp, Bp, Ep) bf16

    rec_kernel = functools.partial(_lstm_recurrent_kernel,
                                   hidden_pad=Hp, embed_pad=Ep,
                                   t_chunk=t_chunk)

    # Constant-index weight specs (block never changes across the grid).
    const2 = lambda shape: pl.BlockSpec(shape, lambda b, t: (0,) * len(shape))

    hid_tm = pl.pallas_call(
        rec_kernel,
        out_shape=jax.ShapeDtypeStruct((Tp, Bp, Hp), jnp.bfloat16),
        grid_spec=pltpu.PrefetchScalarGridSpec(
            num_scalar_prefetch=0,
            grid=(Bp // b_block, Tp // t_chunk),
            in_specs=[
                pl.BlockSpec((t_chunk, b_block, Ep), lambda b, t: (t, b, 0)),
                const2((Ep + Hp, 4 * Hp)),       # [Wih0 ; Whh0]
                const2((1, 4 * Hp)),             # b0
                const2((2 * Hp, 4 * Hp)),        # [Wih1 ; Whh1]
                const2((1, 4 * Hp)),             # b1
            ],
            out_specs=pl.BlockSpec((t_chunk, b_block, Hp),
                                   lambda b, t: (t, b, 0)),
            scratch_shapes=[pltpu.VMEM((b_block, Hp), jnp.float32)] * 4
                           + [pltpu.VMEM((b_block, Ep + Hp), jnp.bfloat16),
                              pltpu.VMEM((b_block, 2 * Hp), jnp.bfloat16),
                              pltpu.VMEM((t_chunk, b_block, Hp), jnp.float32)],
        ),
        compiler_params=pltpu.CompilerParams(
            dimension_semantics=("parallel", "arbitrary"),
            vmem_limit_bytes=32 * 1024 * 1024),
    )(x_tm, pp["w0"], pp["b0"], pp["w1"], pp["b1"])

    # Tiny (B*T*H) bf16 transpose of the hidden states; the big (B,T,V) logits
    # are written batch-first directly by the FC kernel (never transposed).
    hid_bt = jnp.transpose(hid_tm, (1, 0, 2))          # (Bp, Tp, Hp) bf16

    # Largest time tile (multiple of t_chunk, <= 256) dividing Tp: keeps the
    # f32 logits block VMEM-friendly for long sequences / big vocabularies
    # while giving the MXU a healthy M dimension.
    t_fc = t_chunk
    for cand in range(256, t_chunk - 1, -t_chunk):
        if Tp % cand == 0:
            t_fc = cand
            break

    const1 = lambda shape: pl.BlockSpec(shape, lambda b, tb: (0,) * len(shape))

    logits_p = pl.pallas_call(
        _fc_kernel,
        out_shape=jax.ShapeDtypeStruct((B, Tp, Vp), jnp.float32),
        grid_spec=pltpu.PrefetchScalarGridSpec(
            num_scalar_prefetch=0,
            grid=(B, Tp // t_fc),
            in_specs=[
                pl.BlockSpec((1, t_fc, Hp), lambda b, tb: (b, tb, 0)),
                const1((Hp, Vp)),
                const1((1, Vp)),
            ],
            out_specs=pl.BlockSpec((1, t_fc, Vp), lambda b, tb: (b, tb, 0)),
        ),
        compiler_params=pltpu.CompilerParams(
            dimension_semantics=("parallel", "parallel"),
            vmem_limit_bytes=32 * 1024 * 1024),
    )(hid_bt, pp["wfc"], pp["bfc"])

    return logits_p[:, :T, :pp["V"]]                   # (B, T, V) f32


# ------------------------- Pure-JAX reference ------------------------------- #
def lstm_ghazal_reference(token_ids, params):
    emb = jnp.take(params["embedding"], token_ids, axis=0)   # (B, T, E)
    B, T, _ = emb.shape
    H = params["whh0"].shape[0]

    def cell(x, h, c, wih, whh, b):
        gates = x @ wih + h @ whh + b
        i = jax.nn.sigmoid(gates[:, 0 * H:1 * H])
        f = jax.nn.sigmoid(gates[:, 1 * H:2 * H])
        g = jnp.tanh(gates[:, 2 * H:3 * H])
        o = jax.nn.sigmoid(gates[:, 3 * H:4 * H])
        c_new = f * c + i * g
        h_new = o * jnp.tanh(c_new)
        return h_new, c_new

    h0 = c0 = h1 = c1 = jnp.zeros((B, H), jnp.float32)
    outs = []
    for t in range(T):
        h0, c0 = cell(emb[:, t, :], h0, c0,
                      params["wih0"], params["whh0"], params["b0"][0])
        h1, c1 = cell(h0, h1, c1,
                      params["wih1"], params["whh1"], params["b1"][0])
        outs.append(h1 @ params["wfc"] + params["bfc"][0])
    return jnp.stack(outs, axis=1)                        # (B, T, V)


# ------------------------------- Setup -------------------------------------- #
def init_params(key, vocab_size, embed_dim, hidden_dim):
    ks = jax.random.split(key, 10)
    scale = 0.1
    emb = scale * jax.random.normal(ks[0], (vocab_size, embed_dim), jnp.float32)
    emb = emb.at[0].set(0.0)                              # padding_idx=0
    H = hidden_dim
    return {
        "embedding": emb,
        # pre-transposed: (in, 4H) so the kernel does x @ W; gate order i,f,g,o
        "wih0": scale * jax.random.normal(ks[1], (embed_dim, 4 * H), jnp.float32),
        "whh0": scale * jax.random.normal(ks[2], (H, 4 * H), jnp.float32),
        "b0":   scale * jax.random.normal(ks[3], (1, 4 * H), jnp.float32),
        "wih1": scale * jax.random.normal(ks[4], (H, 4 * H), jnp.float32),
        "whh1": scale * jax.random.normal(ks[5], (H, 4 * H), jnp.float32),
        "b1":   scale * jax.random.normal(ks[6], (1, 4 * H), jnp.float32),
        "wfc":  scale * jax.random.normal(ks[7], (H, vocab_size), jnp.float32),
        "bfc":  scale * jax.random.normal(ks[8], (1, vocab_size), jnp.float32),
    }


if __name__ == "__main__":
    VOCAB, EMBED, HIDDEN = 64, 32, 32
    B, T = 2, 8

    key = jax.random.PRNGKey(0)
    k_param, k_tok = jax.random.split(key)
    params = init_params(k_param, VOCAB, EMBED, HIDDEN)
    token_ids = jax.random.randint(k_tok, (B, T), 0, VOCAB, dtype=jnp.int32)

    logits = jax.block_until_ready(lstm_ghazal_forward(token_ids, params))
    ref = lstm_ghazal_reference(token_ids, params)

    assert logits.shape == (B, T, VOCAB)
    # bf16 matmuls (f32 accumulation) -> loosened tolerance vs f32 reference.
    assert jnp.allclose(logits, ref, atol=2e-2, rtol=2e-2), "mismatch vs reference"
    print("KERNEL_OK")
</pallas_src>

<mosaic_0001>
module attributes {stable_mosaic.version = 11 : i64} {
  func.func @_lstm_recurrent_kernel(%arg0: i32, %arg1: i32, %arg2: memref<8x8x128xbf16, #tpu.memory_space<vmem>>, %arg3: memref<256x512xbf16, #tpu.memory_space<vmem>>, %arg4: memref<1x512xf32, #tpu.memory_space<vmem>>, %arg5: memref<256x512xbf16, #tpu.memory_space<vmem>>, %arg6: memref<1x512xf32, #tpu.memory_space<vmem>>, %arg7: memref<8x8x128xbf16, #tpu.memory_space<vmem>>, %arg8: memref<8x128xf32, #tpu.memory_space<vmem>>, %arg9: memref<8x128xf32, #tpu.memory_space<vmem>>, %arg10: memref<8x128xf32, #tpu.memory_space<vmem>>, %arg11: memref<8x128xf32, #tpu.memory_space<vmem>>, %arg12: memref<8x256xbf16, #tpu.memory_space<vmem>>, %arg13: memref<8x256xbf16, #tpu.memory_space<vmem>>, %arg14: memref<8x8x128xf32, #tpu.memory_space<vmem>>) attributes {dimension_semantics = [#tpu.dimension_semantics<parallel>, #tpu.dimension_semantics<arbitrary>], iteration_bounds = array<i64: 1, 1>, scalar_prefetch = 0 : i64, scratch_operands = 7 : i64, tpu.core_type = #tpu.core_type<tc>, window_params = [{transform_indices = @transform_0, window_bounds = array<i64: 8, 8, 128>}, {pipeline_mode = #tpu.pipeline_mode<synchronous>, transform_indices = @transform_1, window_bounds = array<i64: 256, 512>}, {pipeline_mode = #tpu.pipeline_mode<synchronous>, transform_indices = @transform_2, window_bounds = array<i64: 1, 512>}, {pipeline_mode = #tpu.pipeline_mode<synchronous>, transform_indices = @transform_3, window_bounds = array<i64: 256, 512>}, {pipeline_mode = #tpu.pipeline_mode<synchronous>, transform_indices = @transform_4, window_bounds = array<i64: 1, 512>}, {transform_indices = @transform_5, window_bounds = array<i64: 8, 8, 128>}]} {
    %c0_i32 = arith.constant 0 : i32
    %0 = arith.cmpi eq, %arg1, %c0_i32 : i32
    %1 = arith.extui %0 : i1 to i32
    %c0_i32_0 = arith.constant 0 : i32
    %2 = arith.cmpi ne, %1, %c0_i32_0 : i32
    scf.if %2 {
      %cst_257 = arith.constant 0.000000e+00 : f32
      %580 = vector.broadcast %cst_257 : f32 to vector<8x128xf32>
      %c0_258 = arith.constant 0 : index
      %c0_259 = arith.constant 0 : index
      %581 = vector.load %arg8[%c0_258, %c0_259] : memref<8x128xf32, #tpu.memory_space<vmem>>, vector<8x128xf32>
      tpu.vector_store %arg8[%c0_258, %c0_259], %580 {strides = array<i32>} : memref<8x128xf32, #tpu.memory_space<vmem>>, vector<8x128xf32>,
      %cst_260 = arith.constant 0.000000e+00 : f32
      %582 = vector.broadcast %cst_260 : f32 to vector<8x128xf32>
      %c0_261 = arith.constant 0 : index
      %c0_262 = arith.constant 0 : index
      %583 = vector.load %arg9[%c0_261, %c0_262] : memref<8x128xf32, #tpu.memory_space<vmem>>, vector<8x128xf32>
      tpu.vector_store %arg9[%c0_261, %c0_262], %582 {strides = array<i32>} : memref<8x128xf32, #tpu.memory_space<vmem>>, vector<8x128xf32>,
      %cst_263 = arith.constant 0.000000e+00 : f32
      %584 = vector.broadcast %cst_263 : f32 to vector<8x128xf32>
      %c0_264 = arith.constant 0 : index
      %c0_265 = arith.constant 0 : index
      %585 = vector.load %arg10[%c0_264, %c0_265] : memref<8x128xf32, #tpu.memory_space<vmem>>, vector<8x128xf32>
      tpu.vector_store %arg10[%c0_264, %c0_265], %584 {strides = array<i32>} : memref<8x128xf32, #tpu.memory_space<vmem>>, vector<8x128xf32>,
      %cst_266 = arith.constant 0.000000e+00 : f32
      %586 = vector.broadcast %cst_266 : f32 to vector<8x128xf32>
      %c0_267 = arith.constant 0 : index
      %c0_268 = arith.constant 0 : index
      %587 = vector.load %arg11[%c0_267, %c0_268] : memref<8x128xf32, #tpu.memory_space<vmem>>, vector<8x128xf32>
      tpu.vector_store %arg11[%c0_267, %c0_268], %586 {strides = array<i32>} : memref<8x128xf32, #tpu.memory_space<vmem>>, vector<8x128xf32>,
    } else {
    }
    %c0 = arith.constant 0 : index
    %c0_1 = arith.constant 0 : index
    %3 = vector.load %arg4[%c0, %c0_1] : memref<1x512xf32, #tpu.memory_space<vmem>>, vector<1x512xf32>
    %4 = vector.shape_cast %3 : vector<1x512xf32> to vector<1x512xf32>
    %5 = vector.broadcast %4 : vector<1x512xf32> to vector<8x512xf32>
    %c0_2 = arith.constant 0 : index
    %c0_3 = arith.constant 0 : index
    %6 = vector.load %arg6[%c0_2, %c0_3] : memref<1x512xf32, #tpu.memory_space<vmem>>, vector<1x512xf32>
    %7 = vector.shape_cast %6 : vector<1x512xf32> to vector<1x512xf32>
    %8 = vector.broadcast %7 : vector<1x512xf32> to vector<8x512xf32>
    %c0_4 = arith.constant 0 : index
    %c0_5 = arith.constant 0 : index
    %9 = vector.load %arg8[%c0_4, %c0_5] : memref<8x128xf32, #tpu.memory_space<vmem>>, vector<8x128xf32>
    %c0_6 = arith.constant 0 : index
    %c0_7 = arith.constant 0 : index
    %10 = vector.load %arg9[%c0_6, %c0_7] : memref<8x128xf32, #tpu.memory_space<vmem>>, vector<8x128xf32>
    %c0_8 = arith.constant 0 : index
    %c0_9 = arith.constant 0 : index
    %11 = vector.load %arg10[%c0_8, %c0_9] : memref<8x128xf32, #tpu.memory_space<vmem>>, vector<8x128xf32>
    %c0_10 = arith.constant 0 : index
    %c0_11 = arith.constant 0 : index
    %12 = vector.load %arg11[%c0_10, %c0_11] : memref<8x128xf32, #tpu.memory_space<vmem>>, vector<8x128xf32>
    %c0_12 = arith.constant 0 : index
    %c0_13 = arith.constant 0 : index
    %c0_14 = arith.constant 0 : index
    %13 = vector.load %arg2[%c0_12, %c0_13, %c0_14] : memref<8x8x128xbf16, #tpu.memory_space<vmem>>, vector<1x8x128xbf16>
    %14 = vector.shape_cast %13 : vector<1x8x128xbf16> to vector<8x128xbf16>
    %c0_15 = arith.constant 0 : index
    %c0_16 = arith.constant 0 : index
    %15 = vector.load %arg12[%c0_15, %c0_16] : memref<8x256xbf16, #tpu.memory_space<vmem>>, vector<8x128xbf16>
    tpu.vector_store %arg12[%c0_15, %c0_16], %14 {strides = array<i32>} : memref<8x256xbf16, #tpu.memory_space<vmem>>, vector<8x128xbf16>,
    %16 = arith.truncf %9 : vector<8x128xf32> to vector<8x128xbf16>
    %c0_17 = arith.constant 0 : index
    %c128 = arith.constant 128 : index
    %17 = vector.load %arg12[%c0_17, %c128] : memref<8x256xbf16, #tpu.memory_space<vmem>>, vector<8x128xbf16>
    tpu.vector_store %arg12[%c0_17, %c128], %16 {strides = array<i32>} : memref<8x256xbf16, #tpu.memory_space<vmem>>, vector<8x128xbf16>,
    %c0_18 = arith.constant 0 : index
    %c0_19 = arith.constant 0 : index
    %18 = vector.load %arg12[%c0_18, %c0_19] : memref<8x256xbf16, #tpu.memory_space<vmem>>, vector<8x256xbf16>
    %c0_20 = arith.constant 0 : index
    %c0_21 = arith.constant 0 : index
    %19 = vector.load %arg3[%c0_20, %c0_21] : memref<256x512xbf16, #tpu.memory_space<vmem>>, vector<256x512xbf16>
    %cst = arith.constant dense<0.000000e+00> : vector<8x512xf32>
    %20 = tpu.matmul %18, %19, %cst {dimension_numbers = #tpu.dot_dimension_numbers<[1], [0], [0], [1], [0, 0, 1, 1], [], []>} : vector<8x256xbf16>, vector<256x512xbf16>, vector<8x512xf32> -> vector<8x512xf32>
    %21 = arith.addf %20, %5 : vector<8x512xf32>
    %22 = vector.extract_strided_slice %21 {offsets = [0, 0], sizes = [8, 128], strides = [1, 1]} : vector<8x512xf32> to vector<8x128xf32>
    %23 = arith.negf %22 : vector<8x128xf32>
    %24 = math.exp %23 : vector<8x128xf32>
    %cst_22 = arith.constant 1.000000e+00 : f32
    %25 = vector.broadcast %cst_22 : f32 to vector<8x128xf32>
    %26 = arith.addf %25, %24 : vector<8x128xf32>
    %27 = arith.divf %25, %26 : vector<8x128xf32>
    %28 = vector.extract_strided_slice %21 {offsets = [0, 128], sizes = [8, 128], strides = [1, 1]} : vector<8x512xf32> to vector<8x128xf32>
    %29 = arith.negf %28 : vector<8x128xf32>
    %30 = math.exp %29 : vector<8x128xf32>
    %cst_23 = arith.constant 1.000000e+00 : f32
    %31 = vector.broadcast %cst_23 : f32 to vector<8x128xf32>
    %32 = arith.addf %31, %30 : vector<8x128xf32>
    %33 = arith.divf %31, %32 : vector<8x128xf32>
    %34 = vector.extract_strided_slice %21 {offsets = [0, 256], sizes = [8, 128], strides = [1, 1]} : vector<8x512xf32> to vector<8x128xf32>
    %35 = math.tanh %34 : vector<8x128xf32>
    %36 = vector.extract_strided_slice %21 {offsets = [0, 384], sizes = [8, 128], strides = [1, 1]} : vector<8x512xf32> to vector<8x128xf32>
    %37 = arith.negf %36 : vector<8x128xf32>
    %38 = math.exp %37 : vector<8x128xf32>
    %cst_24 = arith.constant 1.000000e+00 : f32
    %39 = vector.broadcast %cst_24 : f32 to vector<8x128xf32>
    %40 = arith.addf %39, %38 : vector<8x128xf32>
    %41 = arith.divf %39, %40 : vector<8x128xf32>
    %42 = arith.mulf %33, %10 : vector<8x128xf32>
    %43 = arith.mulf %27, %35 : vector<8x128xf32>
    %44 = arith.addf %42, %43 : vector<8x128xf32>
    %45 = math.tanh %44 : vector<8x128xf32>
    %46 = arith.mulf %41, %45 : vector<8x128xf32>
    %47 = arith.truncf %46 : vector<8x128xf32> to vector<8x128xbf16>
    %c0_25 = arith.constant 0 : index
    %c0_26 = arith.constant 0 : index
    %48 = vector.load %arg13[%c0_25, %c0_26] : memref<8x256xbf16, #tpu.memory_space<vmem>>, vector<8x128xbf16>
    tpu.vector_store %arg13[%c0_25, %c0_26], %47 {strides = array<i32>} : memref<8x256xbf16, #tpu.memory_space<vmem>>, vector<8x128xbf16>,
    %49 = arith.truncf %11 : vector<8x128xf32> to vector<8x128xbf16>
    %c0_27 = arith.constant 0 : index
    %c128_28 = arith.constant 128 : index
    %50 = vector.load %arg13[%c0_27, %c128_28] : memref<8x256xbf16, #tpu.memory_space<vmem>>, vector<8x128xbf16>
    tpu.vector_store %arg13[%c0_27, %c128_28], %49 {strides = array<i32>} : memref<8x256xbf16, #tpu.memory_space<vmem>>, vector<8x128xbf16>,
    %c0_29 = arith.constant 0 : index
    %c0_30 = arith.constant 0 : index
    %51 = vector.load %arg13[%c0_29, %c0_30] : memref<8x256xbf16, #tpu.memory_space<vmem>>, vector<8x256xbf16>
    %c0_31 = arith.constant 0 : index
    %c0_32 = arith.constant 0 : index
    %52 = vector.load %arg5[%c0_31, %c0_32] : memref<256x512xbf16, #tpu.memory_space<vmem>>, vector<256x512xbf16>
    %cst_33 = arith.constant dense<0.000000e+00> : vector<8x512xf32>
    %53 = tpu.matmul %51, %52, %cst_33 {dimension_numbers = #tpu.dot_dimension_numbers<[1], [0], [0], [1], [0, 0, 1, 1], [], []>} : vector<8x256xbf16>, vector<256x512xbf16>, vector<8x512xf32> -> vector<8x512xf32>
    %54 = arith.addf %53, %8 : vector<8x512xf32>
    %55 = vector.extract_strided_slice %54 {offsets = [0, 0], sizes = [8, 128], strides = [1, 1]} : vector<8x512xf32> to vector<8x128xf32>
    %56 = arith.negf %55 : vector<8x128xf32>
    %57 = math.exp %56 : vector<8x128xf32>
    %cst_34 = arith.constant 1.000000e+00 : f32
    %58 = vector.broadcast %cst_34 : f32 to vector<8x128xf32>
    %59 = arith.addf %58, %57 : vector<8x128xf32>
    %60 = arith.divf %58, %59 : vector<8x128xf32>
    %61 = vector.extract_strided_slice %54 {offsets = [0, 128], sizes = [8, 128], strides = [1, 1]} : vector<8x512xf32> to vector<8x128xf32>
    %62 = arith.negf %61 : vector<8x128xf32>
    %63 = math.exp %62 : vector<8x128xf32>
    %cst_35 = arith.constant 1.000000e+00 : f32
    %64 = vector.broadcast %cst_35 : f32 to vector<8x128xf32>
    %65 = arith.addf %64, %63 : vector<8x128xf32>
    %66 = arith.divf %64, %65 : vector<8x128xf32>
    %67 = vector.extract_strided_slice %54 {offsets = [0, 256], sizes = [8, 128], strides = [1, 1]} : vector<8x512xf32> to vector<8x128xf32>
    %68 = math.tanh %67 : vector<8x128xf32>
    %69 = vector.extract_strided_slice %54 {offsets = [0, 384], sizes = [8, 128], strides = [1, 1]} : vector<8x512xf32> to vector<8x128xf32>
    %70 = arith.negf %69 : vector<8x128xf32>
    %71 = math.exp %70 : vector<8x128xf32>
    %cst_36 = arith.constant 1.000000e+00 : f32
    %72 = vector.broadcast %cst_36 : f32 to vector<8x128xf32>
    %73 = arith.addf %72, %71 : vector<8x128xf32>
    %74 = arith.divf %72, %73 : vector<8x128xf32>
    %75 = arith.mulf %66, %12 : vector<8x128xf32>
    %76 = arith.mulf %60, %68 : vector<8x128xf32>
    %77 = arith.addf %75, %76 : vector<8x128xf32>
    %78 = math.tanh %77 : vector<8x128xf32>
    %79 = arith.mulf %74, %78 : vector<8x128xf32>
    %c0_37 = arith.constant 0 : index
    %c0_38 = arith.constant 0 : index
    %c0_39 = arith.constant 0 : index
    %80 = vector.load %arg14[%c0_37, %c0_38, %c0_39] : memref<8x8x128xf32, #tpu.memory_space<vmem>>, vector<1x8x128xf32>
    %81 = vector.shape_cast %80 : vector<1x8x128xf32> to vector<8x128xf32>
    %82 = vector.shape_cast %79 : vector<8x128xf32> to vector<1x8x128xf32>
    tpu.vector_store %arg14[%c0_37, %c0_38, %c0_39], %82 {strides = array<i32>} : memref<8x8x128xf32, #tpu.memory_space<vmem>>, vector<1x8x128xf32>,
    %c1 = arith.constant 1 : index
    %c0_40 = arith.constant 0 : index
    %c0_41 = arith.constant 0 : index
    %83 = vector.load %arg2[%c1, %c0_40, %c0_41] : memref<8x8x128xbf16, #tpu.memory_space<vmem>>, vector<1x8x128xbf16>
    %84 = vector.shape_cast %83 : vector<1x8x128xbf16> to vector<8x128xbf16>
    %c0_42 = arith.constant 0 : index
    %c0_43 = arith.constant 0 : index
    %85 = vector.load %arg12[%c0_42, %c0_43] : memref<8x256xbf16, #tpu.memory_space<vmem>>, vector<8x128xbf16>
    tpu.vector_store %arg12[%c0_42, %c0_43], %84 {strides = array<i32>} : memref<8x256xbf16, #tpu.memory_space<vmem>>, vector<8x128xbf16>,
    %86 = arith.truncf %46 : vector<8x128xf32> to vector<8x128xbf16>
    %c0_44 = arith.constant 0 : index
    %c128_45 = arith.constant 128 : index
    %87 = vector.load %arg12[%c0_44, %c128_45] : memref<8x256xbf16, #tpu.memory_space<vmem>>, vector<8x128xbf16>
    tpu.vector_store %arg12[%c0_44, %c128_45], %86 {strides = array<i32>} : memref<8x256xbf16, #tpu.memory_space<vmem>>, vector<8x128xbf16>,
    %c0_46 = arith.constant 0 : index
    %c0_47 = arith.constant 0 : index
    %88 = vector.load %arg12[%c0_46, %c0_47] : memref<8x256xbf16, #tpu.memory_space<vmem>>, vector<8x256xbf16>
    %c0_48 = arith.constant 0 : index
    %c0_49 = arith.constant 0 : index
    %89 = vector.load %arg3[%c0_48, %c0_49] : memref<256x512xbf16, #tpu.memory_space<vmem>>, vector<256x512xbf16>
    %cst_50 = arith.constant dense<0.000000e+00> : vector<8x512xf32>
    %90 = tpu.matmul %88, %89, %cst_50 {dimension_numbers = #tpu.dot_dimension_numbers<[1], [0], [0], [1], [0, 0, 1, 1], [], []>} : vector<8x256xbf16>, vector<256x512xbf16>, vector<8x512xf32> -> vector<8x512xf32>
    %91 = arith.addf %90, %5 : vector<8x512xf32>
    %92 = vector.extract_strided_slice %91 {offsets = [0, 0], sizes = [8, 128], strides = [1, 1]} : vector<8x512xf32> to vector<8x128xf32>
    %93 = arith.negf %92 : vector<8x128xf32>
    %94 = math.exp %93 : vector<8x128xf32>
    %cst_51 = arith.constant 1.000000e+00 : f32
    %95 = vector.broadcast %cst_51 : f32 to vector<8x128xf32>
    %96 = arith.addf %95, %94 : vector<8x128xf32>
    %97 = arith.divf %95, %96 : vector<8x128xf32>
    %98 = vector.extract_strided_slice %91 {offsets = [0, 128], sizes = [8, 128], strides = [1, 1]} : vector<8x512xf32> to vector<8x128xf32>
    %99 = arith.negf %98 : vector<8x128xf32>
    %100 = math.exp %99 : vector<8x128xf32>
    %cst_52 = arith.constant 1.000000e+00 : f32
    %101 = vector.broadcast %cst_52 : f32 to vector<8x128xf32>
    %102 = arith.addf %101, %100 : vector<8x128xf32>
    %103 = arith.divf %101, %102 : vector<8x128xf32>
    %104 = vector.extract_strided_slice %91 {offsets = [0, 256], sizes = [8, 128], strides = [1, 1]} : vector<8x512xf32> to vector<8x128xf32>
    %105 = math.tanh %104 : vector<8x128xf32>
    %106 = vector.extract_strided_slice %91 {offsets = [0, 384], sizes = [8, 128], strides = [1, 1]} : vector<8x512xf32> to vector<8x128xf32>
    %107 = arith.negf %106 : vector<8x128xf32>
    %108 = math.exp %107 : vector<8x128xf32>
    %cst_53 = arith.constant 1.000000e+00 : f32
    %109 = vector.broadcast %cst_53 : f32 to vector<8x128xf32>
    %110 = arith.addf %109, %108 : vector<8x128xf32>
    %111 = arith.divf %109, %110 : vector<8x128xf32>
    %112 = arith.mulf %103, %44 : vector<8x128xf32>
    %113 = arith.mulf %97, %105 : vector<8x128xf32>
    %114 = arith.addf %112, %113 : vector<8x128xf32>
    %115 = math.tanh %114 : vector<8x128xf32>
    %116 = arith.mulf %111, %115 : vector<8x128xf32>
    %117 = arith.truncf %116 : vector<8x128xf32> to vector<8x128xbf16>
    %c0_54 = arith.constant 0 : index
    %c0_55 = arith.constant 0 : index
    %118 = vector.load %arg13[%c0_54, %c0_55] : memref<8x256xbf16, #tpu.memory_space<vmem>>, vector<8x128xbf16>
    tpu.vector_store %arg13[%c0_54, %c0_55], %117 {strides = array<i32>} : memref<8x256xbf16, #tpu.memory_space<vmem>>, vector<8x128xbf16>,
    %119 = arith.truncf %79 : vector<8x128xf32> to vector<8x128xbf16>
    %c0_56 = arith.constant 0 : index
    %c128_57 = arith.constant 128 : index
    %120 = vector.load %arg13[%c0_56, %c128_57] : memref<8x256xbf16, #tpu.memory_space<vmem>>, vector<8x128xbf16>
    tpu.vector_store %arg13[%c0_56, %c128_57], %119 {strides = array<i32>} : memref<8x256xbf16, #tpu.memory_space<vmem>>, vector<8x128xbf16>,
    %c0_58 = arith.constant 0 : index
    %c0_59 = arith.constant 0 : index
    %121 = vector.load %arg13[%c0_58, %c0_59] : memref<8x256xbf16, #tpu.memory_space<vmem>>, vector<8x256xbf16>
    %c0_60 = arith.constant 0 : index
    %c0_61 = arith.constant 0 : index
    %122 = vector.load %arg5[%c0_60, %c0_61] : memref<256x512xbf16, #tpu.memory_space<vmem>>, vector<256x512xbf16>
    %cst_62 = arith.constant dense<0.000000e+00> : vector<8x512xf32>
    %123 = tpu.matmul %121, %122, %cst_62 {dimension_numbers = #tpu.dot_dimension_numbers<[1], [0], [0], [1], [0, 0, 1, 1], [], []>} : vector<8x256xbf16>, vector<256x512xbf16>, vector<8x512xf32> -> vector<8x512xf32>
    %124 = arith.addf %123, %8 : vector<8x512xf32>
    %125 = vector.extract_strided_slice %124 {offsets = [0, 0], sizes = [8, 128], strides = [1, 1]} : vector<8x512xf32> to vector<8x128xf32>
    %126 = arith.negf %125 : vector<8x128xf32>
    %127 = math.exp %126 : vector<8x128xf32>
    %cst_63 = arith.constant 1.000000e+00 : f32
    %128 = vector.broadcast %cst_63 : f32 to vector<8x128xf32>
    %129 = arith.addf %128, %127 : vector<8x128xf32>
    %130 = arith.divf %128, %129 : vector<8x128xf32>
    %131 = vector.extract_strided_slice %124 {offsets = [0, 128], sizes = [8, 128], strides = [1, 1]} : vector<8x512xf32> to vector<8x128xf32>
    %132 = arith.negf %131 : vector<8x128xf32>
    %133 = math.exp %132 : vector<8x128xf32>
    %cst_64 = arith.constant 1.000000e+00 : f32
    %134 = vector.broadcast %cst_64 : f32 to vector<8x128xf32>
    %135 = arith.addf %134, %133 : vector<8x128xf32>
    %136 = arith.divf %134, %135 : vector<8x128xf32>
    %137 = vector.extract_strided_slice %124 {offsets = [0, 256], sizes = [8, 128], strides = [1, 1]} : vector<8x512xf32> to vector<8x128xf32>
    %138 = math.tanh %137 : vector<8x128xf32>
    %139 = vector.extract_strided_slice %124 {offsets = [0, 384], sizes = [8, 128], strides = [1, 1]} : vector<8x512xf32> to vector<8x128xf32>
    %140 = arith.negf %139 : vector<8x128xf32>
    %141 = math.exp %140 : vector<8x128xf32>
    %cst_65 = arith.constant 1.000000e+00 : f32
    %142 = vector.broadcast %cst_65 : f32 to vector<8x128xf32>
    %143 = arith.addf %142, %141 : vector<8x128xf32>
    %144 = arith.divf %142, %143 : vector<8x128xf32>
    %145 = arith.mulf %136, %77 : vector<8x128xf32>
    %146 = arith.mulf %130, %138 : vector<8x128xf32>
    %147 = arith.addf %145, %146 : vector<8x128xf32>
    %148 = math.tanh %147 : vector<8x128xf32>
    %149 = arith.mulf %144, %148 : vector<8x128xf32>
    %c1_66 = arith.constant 1 : index
    %c0_67 = arith.constant 0 : index
    %c0_68 = arith.constant 0 : index
    %150 = vector.load %arg14[%c1_66, %c0_67, %c0_68] : memref<8x8x128xf32, #tpu.memory_space<vmem>>, vector<1x8x128xf32>
    %151 = vector.shape_cast %150 : vector<1x8x128xf32> to vector<8x128xf32>
    %152 = vector.shape_cast %149 : vector<8x128xf32> to vector<1x8x128xf32>
    tpu.vector_store %arg14[%c1_66, %c0_67, %c0_68], %152 {strides = array<i32>} : memref<8x8x128xf32, #tpu.memory_space<vmem>>, vector<1x8x128xf32>,
    %c2 = arith.constant 2 : index
    %c0_69 = arith.constant 0 : index
    %c0_70 = arith.constant 0 : index
    %153 = vector.load %arg2[%c2, %c0_69, %c0_70] : memref<8x8x128xbf16, #tpu.memory_space<vmem>>, vector<1x8x128xbf16>
    %154 = vector.shape_cast %153 : vector<1x8x128xbf16> to vector<8x128xbf16>
    %c0_71 = arith.constant 0 : index
    %c0_72 = arith.constant 0 : index
    %155 = vector.load %arg12[%c0_71, %c0_72] : memref<8x256xbf16, #tpu.memory_space<vmem>>, vector<8x128xbf16>
    tpu.vector_store %arg12[%c0_71, %c0_72], %154 {strides = array<i32>} : memref<8x256xbf16, #tpu.memory_space<vmem>>, vector<8x128xbf16>,
    %156 = arith.truncf %116 : vector<8x128xf32> to vector<8x128xbf16>
    %c0_73 = arith.constant 0 : index
    %c128_74 = arith.constant 128 : index
    %157 = vector.load %arg12[%c0_73, %c128_74] : memref<8x256xbf16, #tpu.memory_space<vmem>>, vector<8x128xbf16>
    tpu.vector_store %arg12[%c0_73, %c128_74], %156 {strides = array<i32>} : memref<8x256xbf16, #tpu.memory_space<vmem>>, vector<8x128xbf16>,
    %c0_75 = arith.constant 0 : index
    %c0_76 = arith.constant 0 : index
    %158 = vector.load %arg12[%c0_75, %c0_76] : memref<8x256xbf16, #tpu.memory_space<vmem>>, vector<8x256xbf16>
    %c0_77 = arith.constant 0 : index
    %c0_78 = arith.constant 0 : index
    %159 = vector.load %arg3[%c0_77, %c0_78] : memref<256x512xbf16, #tpu.memory_space<vmem>>, vector<256x512xbf16>
    %cst_79 = arith.constant dense<0.000000e+00> : vector<8x512xf32>
    %160 = tpu.matmul %158, %159, %cst_79 {dimension_numbers = #tpu.dot_dimension_numbers<[1], [0], [0], [1], [0, 0, 1, 1], [], []>} : vector<8x256xbf16>, vector<256x512xbf16>, vector<8x512xf32> -> vector<8x512xf32>
    %161 = arith.addf %160, %5 : vector<8x512xf32>
    %162 = vector.extract_strided_slice %161 {offsets = [0, 0], sizes = [8, 128], strides = [1, 1]} : vector<8x512xf32> to vector<8x128xf32>
    %163 = arith.negf %162 : vector<8x128xf32>
    %164 = math.exp %163 : vector<8x128xf32>
    %cst_80 = arith.constant 1.000000e+00 : f32
    %165 = vector.broadcast %cst_80 : f32 to vector<8x128xf32>
    %166 = arith.addf %165, %164 : vector<8x128xf32>
    %167 = arith.divf %165, %166 : vector<8x128xf32>
    %168 = vector.extract_strided_slice %161 {offsets = [0, 128], sizes = [8, 128], strides = [1, 1]} : vector<8x512xf32> to vector<8x128xf32>
    %169 = arith.negf %168 : vector<8x128xf32>
    %170 = math.exp %169 : vector<8x128xf32>
    %cst_81 = arith.constant 1.000000e+00 : f32
    %171 = vector.broadcast %cst_81 : f32 to vector<8x128xf32>
    %172 = arith.addf %171, %170 : vector<8x128xf32>
    %173 = arith.divf %171, %172 : vector<8x128xf32>
    %174 = vector.extract_strided_slice %161 {offsets = [0, 256], sizes = [8, 128], strides = [1, 1]} : vector<8x512xf32> to vector<8x128xf32>
    %175 = math.tanh %174 : vector<8x128xf32>
    %176 = vector.extract_strided_slice %161 {offsets = [0, 384], sizes = [8, 128], strides = [1, 1]} : vector<8x512xf32> to vector<8x128xf32>
    %177 = arith.negf %176 : vector<8x128xf32>
    %178 = math.exp %177 : vector<8x128xf32>
    %cst_82 = arith.constant 1.000000e+00 : f32
    %179 = vector.broadcast %cst_82 : f32 to vector<8x128xf32>
    %180 = arith.addf %179, %178 : vector<8x128xf32>
    %181 = arith.divf %179, %180 : vector<8x128xf32>
    %182 = arith.mulf %173, %114 : vector<8x128xf32>
    %183 = arith.mulf %167, %175 : vector<8x128xf32>
    %184 = arith.addf %182, %183 : vector<8x128xf32>
    %185 = math.tanh %184 : vector<8x128xf32>
    %186 = arith.mulf %181, %185 : vector<8x128xf32>
    %187 = arith.truncf %186 : vector<8x128xf32> to vector<8x128xbf16>
    %c0_83 = arith.constant 0 : index
    %c0_84 = arith.constant 0 : index
    %188 = vector.load %arg13[%c0_83, %c0_84] : memref<8x256xbf16, #tpu.memory_space<vmem>>, vector<8x128xbf16>
    tpu.vector_store %arg13[%c0_83, %c0_84], %187 {strides = array<i32>} : memref<8x256xbf16, #tpu.memory_space<vmem>>, vector<8x128xbf16>,
    %189 = arith.truncf %149 : vector<8x128xf32> to vector<8x128xbf16>
    %c0_85 = arith.constant 0 : index
    %c128_86 = arith.constant 128 : index
    %190 = vector.load %arg13[%c0_85, %c128_86] : memref<8x256xbf16, #tpu.memory_space<vmem>>, vector<8x128xbf16>
    tpu.vector_store %arg13[%c0_85, %c128_86], %189 {strides = array<i32>} : memref<8x256xbf16, #tpu.memory_space<vmem>>, vector<8x128xbf16>,
    %c0_87 = arith.constant 0 : index
    %c0_88 = arith.constant 0 : index
    %191 = vector.load %arg13[%c0_87, %c0_88] : memref<8x256xbf16, #tpu.memory_space<vmem>>, vector<8x256xbf16>
    %c0_89 = arith.constant 0 : index
    %c0_90 = arith.constant 0 : index
    %192 = vector.load %arg5[%c0_89, %c0_90] : memref<256x512xbf16, #tpu.memory_space<vmem>>, vector<256x512xbf16>
    %cst_91 = arith.constant dense<0.000000e+00> : vector<8x512xf32>
    %193 = tpu.matmul %191, %192, %cst_91 {dimension_numbers = #tpu.dot_dimension_numbers<[1], [0], [0], [1], [0, 0, 1, 1], [], []>} : vector<8x256xbf16>, vector<256x512xbf16>, vector<8x512xf32> -> vector<8x512xf32>
    %194 = arith.addf %193, %8 : vector<8x512xf32>
    %195 = vector.extract_strided_slice %194 {offsets = [0, 0], sizes = [8, 128], strides = [1, 1]} : vector<8x512xf32> to vector<8x128xf32>
    %196 = arith.negf %195 : vector<8x128xf32>
    %197 = math.exp %196 : vector<8x128xf32>
    %cst_92 = arith.constant 1.000000e+00 : f32
    %198 = vector.broadcast %cst_92 : f32 to vector<8x128xf32>
    %199 = arith.addf %198, %197 : vector<8x128xf32>
    %200 = arith.divf %198, %199 : vector<8x128xf32>
    %201 = vector.extract_strided_slice %194 {offsets = [0, 128], sizes = [8, 128], strides = [1, 1]} : vector<8x512xf32> to vector<8x128xf32>
    %202 = arith.negf %201 : vector<8x128xf32>
    %203 = math.exp %202 : vector<8x128xf32>
    %cst_93 = arith.constant 1.000000e+00 : f32
    %204 = vector.broadcast %cst_93 : f32 to vector<8x128xf32>
    %205 = arith.addf %204, %203 : vector<8x128xf32>
    %206 = arith.divf %204, %205 : vector<8x128xf32>
    %207 = vector.extract_strided_slice %194 {offsets = [0, 256], sizes = [8, 128], strides = [1, 1]} : vector<8x512xf32> to vector<8x128xf32>
    %208 = math.tanh %207 : vector<8x128xf32>
    %209 = vector.extract_strided_slice %194 {offsets = [0, 384], sizes = [8, 128], strides = [1, 1]} : vector<8x512xf32> to vector<8x128xf32>
    %210 = arith.negf %209 : vector<8x128xf32>
    %211 = math.exp %210 : vector<8x128xf32>
    %cst_94 = arith.constant 1.000000e+00 : f32
    %212 = vector.broadcast %cst_94 : f32 to vector<8x128xf32>
    %213 = arith.addf %212, %211 : vector<8x128xf32>
    %214 = arith.divf %212, %213 : vector<8x128xf32>
    %215 = arith.mulf %206, %147 : vector<8x128xf32>
    %216 = arith.mulf %200, %208 : vector<8x128xf32>
    %217 = arith.addf %215, %216 : vector<8x128xf32>
    %218 = math.tanh %217 : vector<8x128xf32>
    %219 = arith.mulf %214, %218 : vector<8x128xf32>
    %c2_95 = arith.constant 2 : index
    %c0_96 = arith.constant 0 : index
    %c0_97 = arith.constant 0 : index
    %220 = vector.load %arg14[%c2_95, %c0_96, %c0_97] : memref<8x8x128xf32, #tpu.memory_space<vmem>>, vector<1x8x128xf32>
    %221 = vector.shape_cast %220 : vector<1x8x128xf32> to vector<8x128xf32>
    %222 = vector.shape_cast %219 : vector<8x128xf32> to vector<1x8x128xf32>
    tpu.vector_store %arg14[%c2_95, %c0_96, %c0_97], %222 {strides = array<i32>} : memref<8x8x128xf32, #tpu.memory_space<vmem>>, vector<1x8x128xf32>,
    %c3 = arith.constant 3 : index
    %c0_98 = arith.constant 0 : index
    %c0_99 = arith.constant 0 : index
    %223 = vector.load %arg2[%c3, %c0_98, %c0_99] : memref<8x8x128xbf16, #tpu.memory_space<vmem>>, vector<1x8x128xbf16>
    %224 = vector.shape_cast %223 : vector<1x8x128xbf16> to vector<8x128xbf16>
    %c0_100 = arith.constant 0 : index
    %c0_101 = arith.constant 0 : index
    %225 = vector.load %arg12[%c0_100, %c0_101] : memref<8x256xbf16, #tpu.memory_space<vmem>>, vector<8x128xbf16>
    tpu.vector_store %arg12[%c0_100, %c0_101], %224 {strides = array<i32>} : memref<8x256xbf16, #tpu.memory_space<vmem>>, vector<8x128xbf16>,
    %226 = arith.truncf %186 : vector<8x128xf32> to vector<8x128xbf16>
    %c0_102 = arith.constant 0 : index
    %c128_103 = arith.constant 128 : index
    %227 = vector.load %arg12[%c0_102, %c128_103] : memref<8x256xbf16, #tpu.memory_space<vmem>>, vector<8x128xbf16>
    tpu.vector_store %arg12[%c0_102, %c128_103], %226 {strides = array<i32>} : memref<8x256xbf16, #tpu.memory_space<vmem>>, vector<8x128xbf16>,
    %c0_104 = arith.constant 0 : index
    %c0_105 = arith.constant 0 : index
    %228 = vector.load %arg12[%c0_104, %c0_105] : memref<8x256xbf16, #tpu.memory_space<vmem>>, vector<8x256xbf16>
    %c0_106 = arith.constant 0 : index
    %c0_107 = arith.constant 0 : index
    %229 = vector.load %arg3[%c0_106, %c0_107] : memref<256x512xbf16, #tpu.memory_space<vmem>>, vector<256x512xbf16>
    %cst_108 = arith.constant dense<0.000000e+00> : vector<8x512xf32>
    %230 = tpu.matmul %228, %229, %cst_108 {dimension_numbers = #tpu.dot_dimension_numbers<[1], [0], [0], [1], [0, 0, 1, 1], [], []>} : vector<8x256xbf16>, vector<256x512xbf16>, vector<8x512xf32> -> vector<8x512xf32>
    %231 = arith.addf %230, %5 : vector<8x512xf32>
    %232 = vector.extract_strided_slice %231 {offsets = [0, 0], sizes = [8, 128], strides = [1, 1]} : vector<8x512xf32> to vector<8x128xf32>
    %233 = arith.negf %232 : vector<8x128xf32>
    %234 = math.exp %233 : vector<8x128xf32>
    %cst_109 = arith.constant 1.000000e+00 : f32
    %235 = vector.broadcast %cst_109 : f32 to vector<8x128xf32>
    %236 = arith.addf %235, %234 : vector<8x128xf32>
    %237 = arith.divf %235, %236 : vector<8x128xf32>
    %238 = vector.extract_strided_slice %231 {offsets = [0, 128], sizes = [8, 128], strides = [1, 1]} : vector<8x512xf32> to vector<8x128xf32>
    %239 = arith.negf %238 : vector<8x128xf32>
    %240 = math.exp %239 : vector<8x128xf32>
    %cst_110 = arith.constant 1.000000e+00 : f32
    %241 = vector.broadcast %cst_110 : f32 to vector<8x128xf32>
    %242 = arith.addf %241, %240 : vector<8x128xf32>
    %243 = arith.divf %241, %242 : vector<8x128xf32>
    %244 = vector.extract_strided_slice %231 {offsets = [0, 256], sizes = [8, 128], strides = [1, 1]} : vector<8x512xf32> to vector<8x128xf32>
    %245 = math.tanh %244 : vector<8x128xf32>
    %246 = vector.extract_strided_slice %231 {offsets = [0, 384], sizes = [8, 128], strides = [1, 1]} : vector<8x512xf32> to vector<8x128xf32>
    %247 = arith.negf %246 : vector<8x128xf32>
    %248 = math.exp %247 : vector<8x128xf32>
    %cst_111 = arith.constant 1.000000e+00 : f32
    %249 = vector.broadcast %cst_111 : f32 to vector<8x128xf32>
    %250 = arith.addf %249, %248 : vector<8x128xf32>
    %251 = arith.divf %249, %250 : vector<8x128xf32>
    %252 = arith.mulf %243, %184 : vector<8x128xf32>
    %253 = arith.mulf %237, %245 : vector<8x128xf32>
    %254 = arith.addf %252, %253 : vector<8x128xf32>
    %255 = math.tanh %254 : vector<8x128xf32>
    %256 = arith.mulf %251, %255 : vector<8x128xf32>
    %257 = arith.truncf %256 : vector<8x128xf32> to vector<8x128xbf16>
    %c0_112 = arith.constant 0 : index
    %c0_113 = arith.constant 0 : index
    %258 = vector.load %arg13[%c0_112, %c0_113] : memref<8x256xbf16, #tpu.memory_space<vmem>>, vector<8x128xbf16>
    tpu.vector_store %arg13[%c0_112, %c0_113], %257 {strides = array<i32>} : memref<8x256xbf16, #tpu.memory_space<vmem>>, vector<8x128xbf16>,
    %259 = arith.truncf %219 : vector<8x128xf32> to vector<8x128xbf16>
    %c0_114 = arith.constant 0 : index
    %c128_115 = arith.constant 128 : index
    %260 = vector.load %arg13[%c0_114, %c128_115] : memref<8x256xbf16, #tpu.memory_space<vmem>>, vector<8x128xbf16>
    tpu.vector_store %arg13[%c0_114, %c128_115], %259 {strides = array<i32>} : memref<8x256xbf16, #tpu.memory_space<vmem>>, vector<8x128xbf16>,
    %c0_116 = arith.constant 0 : index
    %c0_117 = arith.constant 0 : index
    %261 = vector.load %arg13[%c0_116, %c0_117] : memref<8x256xbf16, #tpu.memory_space<vmem>>, vector<8x256xbf16>
    %c0_118 = arith.constant 0 : index
    %c0_119 = arith.constant 0 : index
    %262 = vector.load %arg5[%c0_118, %c0_119] : memref<256x512xbf16, #tpu.memory_space<vmem>>, vector<256x512xbf16>
    %cst_120 = arith.constant dense<0.000000e+00> : vector<8x512xf32>
    %263 = tpu.matmul %261, %262, %cst_120 {dimension_numbers = #tpu.dot_dimension_numbers<[1], [0], [0], [1], [0, 0, 1, 1], [], []>} : vector<8x256xbf16>, vector<256x512xbf16>, vector<8x512xf32> -> vector<8x512xf32>
    %264 = arith.addf %263, %8 : vector<8x512xf32>
    %265 = vector.extract_strided_slice %264 {offsets = [0, 0], sizes = [8, 128], strides = [1, 1]} : vector<8x512xf32> to vector<8x128xf32>
    %266 = arith.negf %265 : vector<8x128xf32>
    %267 = math.exp %266 : vector<8x128xf32>
    %cst_121 = arith.constant 1.000000e+00 : f32
    %268 = vector.broadcast %cst_121 : f32 to vector<8x128xf32>
    %269 = arith.addf %268, %267 : vector<8x128xf32>
    %270 = arith.divf %268, %269 : vector<8x128xf32>
    %271 = vector.extract_strided_slice %264 {offsets = [0, 128], sizes = [8, 128], strides = [1, 1]} : vector<8x512xf32> to vector<8x128xf32>
    %272 = arith.negf %271 : vector<8x128xf32>
    %273 = math.exp %272 : vector<8x128xf32>
    %cst_122 = arith.constant 1.000000e+00 : f32
    %274 = vector.broadcast %cst_122 : f32 to vector<8x128xf32>
    %275 = arith.addf %274, %273 : vector<8x128xf32>
    %276 = arith.divf %274, %275 : vector<8x128xf32>
    %277 = vector.extract_strided_slice %264 {offsets = [0, 256], sizes = [8, 128], strides = [1, 1]} : vector<8x512xf32> to vector<8x128xf32>
    %278 = math.tanh %277 : vector<8x128xf32>
    %279 = vector.extract_strided_slice %264 {offsets = [0, 384], sizes = [8, 128], strides = [1, 1]} : vector<8x512xf32> to vector<8x128xf32>
    %280 = arith.negf %279 : vector<8x128xf32>
    %281 = math.exp %280 : vector<8x128xf32>
    %cst_123 = arith.constant 1.000000e+00 : f32
    %282 = vector.broadcast %cst_123 : f32 to vector<8x128xf32>
    %283 = arith.addf %282, %281 : vector<8x128xf32>
    %284 = arith.divf %282, %283 : vector<8x128xf32>
    %285 = arith.mulf %276, %217 : vector<8x128xf32>
    %286 = arith.mulf %270, %278 : vector<8x128xf32>
    %287 = arith.addf %285, %286 : vector<8x128xf32>
    %288 = math.tanh %287 : vector<8x128xf32>
    %289 = arith.mulf %284, %288 : vector<8x128xf32>
    %c3_124 = arith.constant 3 : index
    %c0_125 = arith.constant 0 : index
    %c0_126 = arith.constant 0 : index
    %290 = vector.load %arg14[%c3_124, %c0_125, %c0_126] : memref<8x8x128xf32, #tpu.memory_space<vmem>>, vector<1x8x128xf32>
    %291 = vector.shape_cast %290 : vector<1x8x128xf32> to vector<8x128xf32>
    %292 = vector.shape_cast %289 : vector<8x128xf32> to vector<1x8x128xf32>
    tpu.vector_store %arg14[%c3_124, %c0_125, %c0_126], %292 {strides = array<i32>} : memref<8x8x128xf32, #tpu.memory_space<vmem>>, vector<1x8x128xf32>,
    %c4 = arith.constant 4 : index
    %c0_127 = arith.constant 0 : index
    %c0_128 = arith.constant 0 : index
    %293 = vector.load %arg2[%c4, %c0_127, %c0_128] : memref<8x8x128xbf16, #tpu.memory_space<vmem>>, vector<1x8x128xbf16>
    %294 = vector.shape_cast %293 : vector<1x8x128xbf16> to vector<8x128xbf16>
    %c0_129 = arith.constant 0 : index
    %c0_130 = arith.constant 0 : index
    %295 = vector.load %arg12[%c0_129, %c0_130] : memref<8x256xbf16, #tpu.memory_space<vmem>>, vector<8x128xbf16>
    tpu.vector_store %arg12[%c0_129, %c0_130], %294 {strides = array<i32>} : memref<8x256xbf16, #tpu.memory_space<vmem>>, vector<8x128xbf16>,
    %296 = arith.truncf %256 : vector<8x128xf32> to vector<8x128xbf16>
    %c0_131 = arith.constant 0 : index
    %c128_132 = arith.constant 128 : index
    %297 = vector.load %arg12[%c0_131, %c128_132] : memref<8x256xbf16, #tpu.memory_space<vmem>>, vector<8x128xbf16>
    tpu.vector_store %arg12[%c0_131, %c128_132], %296 {strides = array<i32>} : memref<8x256xbf16, #tpu.memory_space<vmem>>, vector<8x128xbf16>,
    %c0_133 = arith.constant 0 : index
    %c0_134 = arith.constant 0 : index
    %298 = vector.load %arg12[%c0_133, %c0_134] : memref<8x256xbf16, #tpu.memory_space<vmem>>, vector<8x256xbf16>
    %c0_135 = arith.constant 0 : index
    %c0_136 = arith.constant 0 : index
    %299 = vector.load %arg3[%c0_135, %c0_136] : memref<256x512xbf16, #tpu.memory_space<vmem>>, vector<256x512xbf16>
    %cst_137 = arith.constant dense<0.000000e+00> : vector<8x512xf32>
    %300 = tpu.matmul %298, %299, %cst_137 {dimension_numbers = #tpu.dot_dimension_numbers<[1], [0], [0], [1], [0, 0, 1, 1], [], []>} : vector<8x256xbf16>, vector<256x512xbf16>, vector<8x512xf32> -> vector<8x512xf32>
    %301 = arith.addf %300, %5 : vector<8x512xf32>
    %302 = vector.extract_strided_slice %301 {offsets = [0, 0], sizes = [8, 128], strides = [1, 1]} : vector<8x512xf32> to vector<8x128xf32>
    %303 = arith.negf %302 : vector<8x128xf32>
    %304 = math.exp %303 : vector<8x128xf32>
    %cst_138 = arith.constant 1.000000e+00 : f32
    %305 = vector.broadcast %cst_138 : f32 to vector<8x128xf32>
    %306 = arith.addf %305, %304 : vector<8x128xf32>
    %307 = arith.divf %305, %306 : vector<8x128xf32>
    %308 = vector.extract_strided_slice %301 {offsets = [0, 128], sizes = [8, 128], strides = [1, 1]} : vector<8x512xf32> to vector<8x128xf32>
    %309 = arith.negf %308 : vector<8x128xf32>
    %310 = math.exp %309 : vector<8x128xf32>
    %cst_139 = arith.constant 1.000000e+00 : f32
    %311 = vector.broadcast %cst_139 : f32 to vector<8x128xf32>
    %312 = arith.addf %311, %310 : vector<8x128xf32>
    %313 = arith.divf %311, %312 : vector<8x128xf32>
    %314 = vector.extract_strided_slice %301 {offsets = [0, 256], sizes = [8, 128], strides = [1, 1]} : vector<8x512xf32> to vector<8x128xf32>
    %315 = math.tanh %314 : vector<8x128xf32>
    %316 = vector.extract_strided_slice %301 {offsets = [0, 384], sizes = [8, 128], strides = [1, 1]} : vector<8x512xf32> to vector<8x128xf32>
    %317 = arith.negf %316 : vector<8x128xf32>
    %318 = math.exp %317 : vector<8x128xf32>
    %cst_140 = arith.constant 1.000000e+00 : f32
    %319 = vector.broadcast %cst_140 : f32 to vector<8x128xf32>
    %320 = arith.addf %319, %318 : vector<8x128xf32>
    %321 = arith.divf %319, %320 : vector<8x128xf32>
    %322 = arith.mulf %313, %254 : vector<8x128xf32>
    %323 = arith.mulf %307, %315 : vector<8x128xf32>
    %324 = arith.addf %322, %323 : vector<8x128xf32>
    %325 = math.tanh %324 : vector<8x128xf32>
    %326 = arith.mulf %321, %325 : vector<8x128xf32>
    %327 = arith.truncf %326 : vector<8x128xf32> to vector<8x128xbf16>
    %c0_141 = arith.constant 0 : index
    %c0_142 = arith.constant 0 : index
    %328 = vector.load %arg13[%c0_141, %c0_142] : memref<8x256xbf16, #tpu.memory_space<vmem>>, vector<8x128xbf16>
    tpu.vector_store %arg13[%c0_141, %c0_142], %327 {strides = array<i32>} : memref<8x256xbf16, #tpu.memory_space<vmem>>, vector<8x128xbf16>,
    %329 = arith.truncf %289 : vector<8x128xf32> to vector<8x128xbf16>
    %c0_143 = arith.constant 0 : index
    %c128_144 = arith.constant 128 : index
    %330 = vector.load %arg13[%c0_143, %c128_144] : memref<8x256xbf16, #tpu.memory_space<vmem>>, vector<8x128xbf16>
    tpu.vector_store %arg13[%c0_143, %c128_144], %329 {strides = array<i32>} : memref<8x256xbf16, #tpu.memory_space<vmem>>, vector<8x128xbf16>,
    %c0_145 = arith.constant 0 : index
    %c0_146 = arith.constant 0 : index
    %331 = vector.load %arg13[%c0_145, %c0_146] : memref<8x256xbf16, #tpu.memory_space<vmem>>, vector<8x256xbf16>
    %c0_147 = arith.constant 0 : index
    %c0_148 = arith.constant 0 : index
    %332 = vector.load %arg5[%c0_147, %c0_148] : memref<256x512xbf16, #tpu.memory_space<vmem>>, vector<256x512xbf16>
    %cst_149 = arith.constant dense<0.000000e+00> : vector<8x512xf32>
    %333 = tpu.matmul %331, %332, %cst_149 {dimension_numbers = #tpu.dot_dimension_numbers<[1], [0], [0], [1], [0, 0, 1, 1], [], []>} : vector<8x256xbf16>, vector<256x512xbf16>, vector<8x512xf32> -> vector<8x512xf32>
    %334 = arith.addf %333, %8 : vector<8x512xf32>
    %335 = vector.extract_strided_slice %334 {offsets = [0, 0], sizes = [8, 128], strides = [1, 1]} : vector<8x512xf32> to vector<8x128xf32>
    %336 = arith.negf %335 : vector<8x128xf32>
    %337 = math.exp %336 : vector<8x128xf32>
    %cst_150 = arith.constant 1.000000e+00 : f32
    %338 = vector.broadcast %cst_150 : f32 to vector<8x128xf32>
    %339 = arith.addf %338, %337 : vector<8x128xf32>
    %340 = arith.divf %338, %339 : vector<8x128xf32>
    %341 = vector.extract_strided_slice %334 {offsets = [0, 128], sizes = [8, 128], strides = [1, 1]} : vector<8x512xf32> to vector<8x128xf32>
    %342 = arith.negf %341 : vector<8x128xf32>
    %343 = math.exp %342 : vector<8x128xf32>
    %cst_151 = arith.constant 1.000000e+00 : f32
    %344 = vector.broadcast %cst_151 : f32 to vector<8x128xf32>
    %345 = arith.addf %344, %343 : vector<8x128xf32>
    %346 = arith.divf %344, %345 : vector<8x128xf32>
    %347 = vector.extract_strided_slice %334 {offsets = [0, 256], sizes = [8, 128], strides = [1, 1]} : vector<8x512xf32> to vector<8x128xf32>
    %348 = math.tanh %347 : vector<8x128xf32>
    %349 = vector.extract_strided_slice %334 {offsets = [0, 384], sizes = [8, 128], strides = [1, 1]} : vector<8x512xf32> to vector<8x128xf32>
    %350 = arith.negf %349 : vector<8x128xf32>
    %351 = math.exp %350 : vector<8x128xf32>
    %cst_152 = arith.constant 1.000000e+00 : f32
    %352 = vector.broadcast %cst_152 : f32 to vector<8x128xf32>
    %353 = arith.addf %352, %351 : vector<8x128xf32>
    %354 = arith.divf %352, %353 : vector<8x128xf32>
    %355 = arith.mulf %346, %287 : vector<8x128xf32>
    %356 = arith.mulf %340, %348 : vector<8x128xf32>
    %357 = arith.addf %355, %356 : vector<8x128xf32>
    %358 = math.tanh %357 : vector<8x128xf32>
    %359 = arith.mulf %354, %358 : vector<8x128xf32>
    %c4_153 = arith.constant 4 : index
    %c0_154 = arith.constant 0 : index
    %c0_155 = arith.constant 0 : index
    %360 = vector.load %arg14[%c4_153, %c0_154, %c0_155] : memref<8x8x128xf32, #tpu.memory_space<vmem>>, vector<1x8x128xf32>
    %361 = vector.shape_cast %360 : vector<1x8x128xf32> to vector<8x128xf32>
    %362 = vector.shape_cast %359 : vector<8x128xf32> to vector<1x8x128xf32>
    tpu.vector_store %arg14[%c4_153, %c0_154, %c0_155], %362 {strides = array<i32>} : memref<8x8x128xf32, #tpu.memory_space<vmem>>, vector<1x8x128xf32>,
    %c5 = arith.constant 5 : index
    %c0_156 = arith.constant 0 : index
    %c0_157 = arith.constant 0 : index
    %363 = vector.load %arg2[%c5, %c0_156, %c0_157] : memref<8x8x128xbf16, #tpu.memory_space<vmem>>, vector<1x8x128xbf16>
    %364 = vector.shape_cast %363 : vector<1x8x128xbf16> to vector<8x128xbf16>
    %c0_158 = arith.constant 0 : index
    %c0_159 = arith.constant 0 : index
    %365 = vector.load %arg12[%c0_158, %c0_159] : memref<8x256xbf16, #tpu.memory_space<vmem>>, vector<8x128xbf16>
    tpu.vector_store %arg12[%c0_158, %c0_159], %364 {strides = array<i32>} : memref<8x256xbf16, #tpu.memory_space<vmem>>, vector<8x128xbf16>,
    %366 = arith.truncf %326 : vector<8x128xf32> to vector<8x128xbf16>
    %c0_160 = arith.constant 0 : index
    %c128_161 = arith.constant 128 : index
    %367 = vector.load %arg12[%c0_160, %c128_161] : memref<8x256xbf16, #tpu.memory_space<vmem>>, vector<8x128xbf16>
    tpu.vector_store %arg12[%c0_160, %c128_161], %366 {strides = array<i32>} : memref<8x256xbf16, #tpu.memory_space<vmem>>, vector<8x128xbf16>,
    %c0_162 = arith.constant 0 : index
    %c0_163 = arith.constant 0 : index
    %368 = vector.load %arg12[%c0_162, %c0_163] : memref<8x256xbf16, #tpu.memory_space<vmem>>, vector<8x256xbf16>
    %c0_164 = arith.constant 0 : index
    %c0_165 = arith.constant 0 : index
    %369 = vector.load %arg3[%c0_164, %c0_165] : memref<256x512xbf16, #tpu.memory_space<vmem>>, vector<256x512xbf16>
    %cst_166 = arith.constant dense<0.000000e+00> : vector<8x512xf32>
    %370 = tpu.matmul %368, %369, %cst_166 {dimension_numbers = #tpu.dot_dimension_numbers<[1], [0], [0], [1], [0, 0, 1, 1], [], []>} : vector<8x256xbf16>, vector<256x512xbf16>, vector<8x512xf32> -> vector<8x512xf32>
    %371 = arith.addf %370, %5 : vector<8x512xf32>
    %372 = vector.extract_strided_slice %371 {offsets = [0, 0], sizes = [8, 128], strides = [1, 1]} : vector<8x512xf32> to vector<8x128xf32>
    %373 = arith.negf %372 : vector<8x128xf32>
    %374 = math.exp %373 : vector<8x128xf32>
    %cst_167 = arith.constant 1.000000e+00 : f32
    %375 = vector.broadcast %cst_167 : f32 to vector<8x128xf32>
    %376 = arith.addf %375, %374 : vector<8x128xf32>
    %377 = arith.divf %375, %376 : vector<8x128xf32>
    %378 = vector.extract_strided_slice %371 {offsets = [0, 128], sizes = [8, 128], strides = [1, 1]} : vector<8x512xf32> to vector<8x128xf32>
    %379 = arith.negf %378 : vector<8x128xf32>
    %380 = math.exp %379 : vector<8x128xf32>
    %cst_168 = arith.constant 1.000000e+00 : f32
    %381 = vector.broadcast %cst_168 : f32 to vector<8x128xf32>
    %382 = arith.addf %381, %380 : vector<8x128xf32>
    %383 = arith.divf %381, %382 : vector<8x128xf32>
    %384 = vector.extract_strided_slice %371 {offsets = [0, 256], sizes = [8, 128], strides = [1, 1]} : vector<8x512xf32> to vector<8x128xf32>
    %385 = math.tanh %384 : vector<8x128xf32>
    %386 = vector.extract_strided_slice %371 {offsets = [0, 384], sizes = [8, 128], strides = [1, 1]} : vector<8x512xf32> to vector<8x128xf32>
    %387 = arith.negf %386 : vector<8x128xf32>
    %388 = math.exp %387 : vector<8x128xf32>
    %cst_169 = arith.constant 1.000000e+00 : f32
    %389 = vector.broadcast %cst_169 : f32 to vector<8x128xf32>
    %390 = arith.addf %389, %388 : vector<8x128xf32>
    %391 = arith.divf %389, %390 : vector<8x128xf32>
    %392 = arith.mulf %383, %324 : vector<8x128xf32>
    %393 = arith.mulf %377, %385 : vector<8x128xf32>
    %394 = arith.addf %392, %393 : vector<8x128xf32>
    %395 = math.tanh %394 : vector<8x128xf32>
    %396 = arith.mulf %391, %395 : vector<8x128xf32>
    %397 = arith.truncf %396 : vector<8x128xf32> to vector<8x128xbf16>
    %c0_170 = arith.constant 0 : index
    %c0_171 = arith.constant 0 : index
    %398 = vector.load %arg13[%c0_170, %c0_171] : memref<8x256xbf16, #tpu.memory_space<vmem>>, vector<8x128xbf16>
    tpu.vector_store %arg13[%c0_170, %c0_171], %397 {strides = array<i32>} : memref<8x256xbf16, #tpu.memory_space<vmem>>, vector<8x128xbf16>,
    %399 = arith.truncf %359 : vector<8x128xf32> to vector<8x128xbf16>
    %c0_172 = arith.constant 0 : index
    %c128_173 = arith.constant 128 : index
    %400 = vector.load %arg13[%c0_172, %c128_173] : memref<8x256xbf16, #tpu.memory_space<vmem>>, vector<8x128xbf16>
    tpu.vector_store %arg13[%c0_172, %c128_173], %399 {strides = array<i32>} : memref<8x256xbf16, #tpu.memory_space<vmem>>, vector<8x128xbf16>,
    %c0_174 = arith.constant 0 : index
    %c0_175 = arith.constant 0 : index
    %401 = vector.load %arg13[%c0_174, %c0_175] : memref<8x256xbf16, #tpu.memory_space<vmem>>, vector<8x256xbf16>
    %c0_176 = arith.constant 0 : index
    %c0_177 = arith.constant 0 : index
    %402 = vector.load %arg5[%c0_176, %c0_177] : memref<256x512xbf16, #tpu.memory_space<vmem>>, vector<256x512xbf16>
    %cst_178 = arith.constant dense<0.000000e+00> : vector<8x512xf32>
    %403 = tpu.matmul %401, %402, %cst_178 {dimension_numbers = #tpu.dot_dimension_numbers<[1], [0], [0], [1], [0, 0, 1, 1], [], []>} : vector<8x256xbf16>, vector<256x512xbf16>, vector<8x512xf32> -> vector<8x512xf32>
    %404 = arith.addf %403, %8 : vector<8x512xf32>
    %405 = vector.extract_strided_slice %404 {offsets = [0, 0], sizes = [8, 128], strides = [1, 1]} : vector<8x512xf32> to vector<8x128xf32>
    %406 = arith.negf %405 : vector<8x128xf32>
    %407 = math.exp %406 : vector<8x128xf32>
    %cst_179 = arith.constant 1.000000e+00 : f32
    %408 = vector.broadcast %cst_179 : f32 to vector<8x128xf32>
    %409 = arith.addf %408, %407 : vector<8x128xf32>
    %410 = arith.divf %408, %409 : vector<8x128xf32>
    %411 = vector.extract_strided_slice %404 {offsets = [0, 128], sizes = [8, 128], strides = [1, 1]} : vector<8x512xf32> to vector<8x128xf32>
    %412 = arith.negf %411 : vector<8x128xf32>
    %413 = math.exp %412 : vector<8x128xf32>
    %cst_180 = arith.constant 1.000000e+00 : f32
    %414 = vector.broadcast %cst_180 : f32 to vector<8x128xf32>
    %415 = arith.addf %414, %413 : vector<8x128xf32>
    %416 = arith.divf %414, %415 : vector<8x128xf32>
    %417 = vector.extract_strided_slice %404 {offsets = [0, 256], sizes = [8, 128], strides = [1, 1]} : vector<8x512xf32> to vector<8x128xf32>
    %418 = math.tanh %417 : vector<8x128xf32>
    %419 = vector.extract_strided_slice %404 {offsets = [0, 384], sizes = [8, 128], strides = [1, 1]} : vector<8x512xf32> to vector<8x128xf32>
    %420 = arith.negf %419 : vector<8x128xf32>
    %421 = math.exp %420 : vector<8x128xf32>
    %cst_181 = arith.constant 1.000000e+00 : f32
    %422 = vector.broadcast %cst_181 : f32 to vector<8x128xf32>
    %423 = arith.addf %422, %421 : vector<8x128xf32>
    %424 = arith.divf %422, %423 : vector<8x128xf32>
    %425 = arith.mulf %416, %357 : vector<8x128xf32>
    %426 = arith.mulf %410, %418 : vector<8x128xf32>
    %427 = arith.addf %425, %426 : vector<8x128xf32>
    %428 = math.tanh %427 : vector<8x128xf32>
    %429 = arith.mulf %424, %428 : vector<8x128xf32>
    %c5_182 = arith.constant 5 : index
    %c0_183 = arith.constant 0 : index
    %c0_184 = arith.constant 0 : index
    %430 = vector.load %arg14[%c5_182, %c0_183, %c0_184] : memref<8x8x128xf32, #tpu.memory_space<vmem>>, vector<1x8x128xf32>
    %431 = vector.shape_cast %430 : vector<1x8x128xf32> to vector<8x128xf32>
    %432 = vector.shape_cast %429 : vector<8x128xf32> to vector<1x8x128xf32>
    tpu.vector_store %arg14[%c5_182, %c0_183, %c0_184], %432 {strides = array<i32>} : memref<8x8x128xf32, #tpu.memory_space<vmem>>, vector<1x8x128xf32>,
    %c6 = arith.constant 6 : index
    %c0_185 = arith.constant 0 : index
    %c0_186 = arith.constant 0 : index
    %433 = vector.load %arg2[%c6, %c0_185, %c0_186] : memref<8x8x128xbf16, #tpu.memory_space<vmem>>, vector<1x8x128xbf16>
    %434 = vector.shape_cast %433 : vector<1x8x128xbf16> to vector<8x128xbf16>
    %c0_187 = arith.constant 0 : index
    %c0_188 = arith.constant 0 : index
    %435 = vector.load %arg12[%c0_187, %c0_188] : memref<8x256xbf16, #tpu.memory_space<vmem>>, vector<8x128xbf16>
    tpu.vector_store %arg12[%c0_187, %c0_188], %434 {strides = array<i32>} : memref<8x256xbf16, #tpu.memory_space<vmem>>, vector<8x128xbf16>,
    %436 = arith.truncf %396 : vector<8x128xf32> to vector<8x128xbf16>
    %c0_189 = arith.constant 0 : index
    %c128_190 = arith.constant 128 : index
    %437 = vector.load %arg12[%c0_189, %c128_190] : memref<8x256xbf16, #tpu.memory_space<vmem>>, vector<8x128xbf16>
    tpu.vector_store %arg12[%c0_189, %c128_190], %436 {strides = array<i32>} : memref<8x256xbf16, #tpu.memory_space<vmem>>, vector<8x128xbf16>,
    %c0_191 = arith.constant 0 : index
    %c0_192 = arith.constant 0 : index
    %438 = vector.load %arg12[%c0_191, %c0_192] : memref<8x256xbf16, #tpu.memory_space<vmem>>, vector<8x256xbf16>
    %c0_193 = arith.constant 0 : index
    %c0_194 = arith.constant 0 : index
    %439 = vector.load %arg3[%c0_193, %c0_194] : memref<256x512xbf16, #tpu.memory_space<vmem>>, vector<256x512xbf16>
    %cst_195 = arith.constant dense<0.000000e+00> : vector<8x512xf32>
    %440 = tpu.matmul %438, %439, %cst_195 {dimension_numbers = #tpu.dot_dimension_numbers<[1], [0], [0], [1], [0, 0, 1, 1], [], []>} : vector<8x256xbf16>, vector<256x512xbf16>, vector<8x512xf32> -> vector<8x512xf32>
    %441 = arith.addf %440, %5 : vector<8x512xf32>
    %442 = vector.extract_strided_slice %441 {offsets = [0, 0], sizes = [8, 128], strides = [1, 1]} : vector<8x512xf32> to vector<8x128xf32>
    %443 = arith.negf %442 : vector<8x128xf32>
    %444 = math.exp %443 : vector<8x128xf32>
    %cst_196 = arith.constant 1.000000e+00 : f32
    %445 = vector.broadcast %cst_196 : f32 to vector<8x128xf32>
    %446 = arith.addf %445, %444 : vector<8x128xf32>
    %447 = arith.divf %445, %446 : vector<8x128xf32>
    %448 = vector.extract_strided_slice %441 {offsets = [0, 128], sizes = [8, 128], strides = [1, 1]} : vector<8x512xf32> to vector<8x128xf32>
    %449 = arith.negf %448 : vector<8x128xf32>
    %450 = math.exp %449 : vector<8x128xf32>
    %cst_197 = arith.constant 1.000000e+00 : f32
    %451 = vector.broadcast %cst_197 : f32 to vector<8x128xf32>
    %452 = arith.addf %451, %450 : vector<8x128xf32>
    %453 = arith.divf %451, %452 : vector<8x128xf32>
    %454 = vector.extract_strided_slice %441 {offsets = [0, 256], sizes = [8, 128], strides = [1, 1]} : vector<8x512xf32> to vector<8x128xf32>
    %455 = math.tanh %454 : vector<8x128xf32>
    %456 = vector.extract_strided_slice %441 {offsets = [0, 384], sizes = [8, 128], strides = [1, 1]} : vector<8x512xf32> to vector<8x128xf32>
    %457 = arith.negf %456 : vector<8x128xf32>
    %458 = math.exp %457 : vector<8x128xf32>
    %cst_198 = arith.constant 1.000000e+00 : f32
    %459 = vector.broadcast %cst_198 : f32 to vector<8x128xf32>
    %460 = arith.addf %459, %458 : vector<8x128xf32>
    %461 = arith.divf %459, %460 : vector<8x128xf32>
    %462 = arith.mulf %453, %394 : vector<8x128xf32>
    %463 = arith.mulf %447, %455 : vector<8x128xf32>
    %464 = arith.addf %462, %463 : vector<8x128xf32>
    %465 = math.tanh %464 : vector<8x128xf32>
    %466 = arith.mulf %461, %465 : vector<8x128xf32>
    %467 = arith.truncf %466 : vector<8x128xf32> to vector<8x128xbf16>
    %c0_199 = arith.constant 0 : index
    %c0_200 = arith.constant 0 : index
    %468 = vector.load %arg13[%c0_199, %c0_200] : memref<8x256xbf16, #tpu.memory_space<vmem>>, vector<8x128xbf16>
    tpu.vector_store %arg13[%c0_199, %c0_200], %467 {strides = array<i32>} : memref<8x256xbf16, #tpu.memory_space<vmem>>, vector<8x128xbf16>,
    %469 = arith.truncf %429 : vector<8x128xf32> to vector<8x128xbf16>
    %c0_201 = arith.constant 0 : index
    %c128_202 = arith.constant 128 : index
    %470 = vector.load %arg13[%c0_201, %c128_202] : memref<8x256xbf16, #tpu.memory_space<vmem>>, vector<8x128xbf16>
    tpu.vector_store %arg13[%c0_201, %c128_202], %469 {strides = array<i32>} : memref<8x256xbf16, #tpu.memory_space<vmem>>, vector<8x128xbf16>,
    %c0_203 = arith.constant 0 : index
    %c0_204 = arith.constant 0 : index
    %471 = vector.load %arg13[%c0_203, %c0_204] : memref<8x256xbf16, #tpu.memory_space<vmem>>, vector<8x256xbf16>
    %c0_205 = arith.constant 0 : index
    %c0_206 = arith.constant 0 : index
    %472 = vector.load %arg5[%c0_205, %c0_206] : memref<256x512xbf16, #tpu.memory_space<vmem>>, vector<256x512xbf16>
    %cst_207 = arith.constant dense<0.000000e+00> : vector<8x512xf32>
    %473 = tpu.matmul %471, %472, %cst_207 {dimension_numbers = #tpu.dot_dimension_numbers<[1], [0], [0], [1], [0, 0, 1, 1], [], []>} : vector<8x256xbf16>, vector<256x512xbf16>, vector<8x512xf32> -> vector<8x512xf32>
    %474 = arith.addf %473, %8 : vector<8x512xf32>
    %475 = vector.extract_strided_slice %474 {offsets = [0, 0], sizes = [8, 128], strides = [1, 1]} : vector<8x512xf32> to vector<8x128xf32>
    %476 = arith.negf %475 : vector<8x128xf32>
    %477 = math.exp %476 : vector<8x128xf32>
    %cst_208 = arith.constant 1.000000e+00 : f32
    %478 = vector.broadcast %cst_208 : f32 to vector<8x128xf32>
    %479 = arith.addf %478, %477 : vector<8x128xf32>
    %480 = arith.divf %478, %479 : vector<8x128xf32>
    %481 = vector.extract_strided_slice %474 {offsets = [0, 128], sizes = [8, 128], strides = [1, 1]} : vector<8x512xf32> to vector<8x128xf32>
    %482 = arith.negf %481 : vector<8x128xf32>
    %483 = math.exp %482 : vector<8x128xf32>
    %cst_209 = arith.constant 1.000000e+00 : f32
    %484 = vector.broadcast %cst_209 : f32 to vector<8x128xf32>
    %485 = arith.addf %484, %483 : vector<8x128xf32>
    %486 = arith.divf %484, %485 : vector<8x128xf32>
    %487 = vector.extract_strided_slice %474 {offsets = [0, 256], sizes = [8, 128], strides = [1, 1]} : vector<8x512xf32> to vector<8x128xf32>
    %488 = math.tanh %487 : vector<8x128xf32>
    %489 = vector.extract_strided_slice %474 {offsets = [0, 384], sizes = [8, 128], strides = [1, 1]} : vector<8x512xf32> to vector<8x128xf32>
    %490 = arith.negf %489 : vector<8x128xf32>
    %491 = math.exp %490 : vector<8x128xf32>
    %cst_210 = arith.constant 1.000000e+00 : f32
    %492 = vector.broadcast %cst_210 : f32 to vector<8x128xf32>
    %493 = arith.addf %492, %491 : vector<8x128xf32>
    %494 = arith.divf %492, %493 : vector<8x128xf32>
    %495 = arith.mulf %486, %427 : vector<8x128xf32>
    %496 = arith.mulf %480, %488 : vector<8x128xf32>
    %497 = arith.addf %495, %496 : vector<8x128xf32>
    %498 = math.tanh %497 : vector<8x128xf32>
    %499 = arith.mulf %494, %498 : vector<8x128xf32>
    %c6_211 = arith.constant 6 : index
    %c0_212 = arith.constant 0 : index
    %c0_213 = arith.constant 0 : index
    %500 = vector.load %arg14[%c6_211, %c0_212, %c0_213] : memref<8x8x128xf32, #tpu.memory_space<vmem>>, vector<1x8x128xf32>
    %501 = vector.shape_cast %500 : vector<1x8x128xf32> to vector<8x128xf32>
    %502 = vector.shape_cast %499 : vector<8x128xf32> to vector<1x8x128xf32>
    tpu.vector_store %arg14[%c6_211, %c0_212, %c0_213], %502 {strides = array<i32>} : memref<8x8x128xf32, #tpu.memory_space<vmem>>, vector<1x8x128xf32>,
    %c7 = arith.constant 7 : index
    %c0_214 = arith.constant 0 : index
    %c0_215 = arith.constant 0 : index
    %503 = vector.load %arg2[%c7, %c0_214, %c0_215] : memref<8x8x128xbf16, #tpu.memory_space<vmem>>, vector<1x8x128xbf16>
    %504 = vector.shape_cast %503 : vector<1x8x128xbf16> to vector<8x128xbf16>
    %c0_216 = arith.constant 0 : index
    %c0_217 = arith.constant 0 : index
    %505 = vector.load %arg12[%c0_216, %c0_217] : memref<8x256xbf16, #tpu.memory_space<vmem>>, vector<8x128xbf16>
    tpu.vector_store %arg12[%c0_216, %c0_217], %504 {strides = array<i32>} : memref<8x256xbf16, #tpu.memory_space<vmem>>, vector<8x128xbf16>,
    %506 = arith.truncf %466 : vector<8x128xf32> to vector<8x128xbf16>
    %c0_218 = arith.constant 0 : index
    %c128_219 = arith.constant 128 : index
    %507 = vector.load %arg12[%c0_218, %c128_219] : memref<8x256xbf16, #tpu.memory_space<vmem>>, vector<8x128xbf16>
    tpu.vector_store %arg12[%c0_218, %c128_219], %506 {strides = array<i32>} : memref<8x256xbf16, #tpu.memory_space<vmem>>, vector<8x128xbf16>,
    %c0_220 = arith.constant 0 : index
    %c0_221 = arith.constant 0 : index
    %508 = vector.load %arg12[%c0_220, %c0_221] : memref<8x256xbf16, #tpu.memory_space<vmem>>, vector<8x256xbf16>
    %c0_222 = arith.constant 0 : index
    %c0_223 = arith.constant 0 : index
    %509 = vector.load %arg3[%c0_222, %c0_223] : memref<256x512xbf16, #tpu.memory_space<vmem>>, vector<256x512xbf16>
    %cst_224 = arith.constant dense<0.000000e+00> : vector<8x512xf32>
    %510 = tpu.matmul %508, %509, %cst_224 {dimension_numbers = #tpu.dot_dimension_numbers<[1], [0], [0], [1], [0, 0, 1, 1], [], []>} : vector<8x256xbf16>, vector<256x512xbf16>, vector<8x512xf32> -> vector<8x512xf32>
    %511 = arith.addf %510, %5 : vector<8x512xf32>
    %512 = vector.extract_strided_slice %511 {offsets = [0, 0], sizes = [8, 128], strides = [1, 1]} : vector<8x512xf32> to vector<8x128xf32>
    %513 = arith.negf %512 : vector<8x128xf32>
    %514 = math.exp %513 : vector<8x128xf32>
    %cst_225 = arith.constant 1.000000e+00 : f32
    %515 = vector.broadcast %cst_225 : f32 to vector<8x128xf32>
    %516 = arith.addf %515, %514 : vector<8x128xf32>
    %517 = arith.divf %515, %516 : vector<8x128xf32>
    %518 = vector.extract_strided_slice %511 {offsets = [0, 128], sizes = [8, 128], strides = [1, 1]} : vector<8x512xf32> to vector<8x128xf32>
    %519 = arith.negf %518 : vector<8x128xf32>
    %520 = math.exp %519 : vector<8x128xf32>
    %cst_226 = arith.constant 1.000000e+00 : f32
    %521 = vector.broadcast %cst_226 : f32 to vector<8x128xf32>
    %522 = arith.addf %521, %520 : vector<8x128xf32>
    %523 = arith.divf %521, %522 : vector<8x128xf32>
    %524 = vector.extract_strided_slice %511 {offsets = [0, 256], sizes = [8, 128], strides = [1, 1]} : vector<8x512xf32> to vector<8x128xf32>
    %525 = math.tanh %524 : vector<8x128xf32>
    %526 = vector.extract_strided_slice %511 {offsets = [0, 384], sizes = [8, 128], strides = [1, 1]} : vector<8x512xf32> to vector<8x128xf32>
    %527 = arith.negf %526 : vector<8x128xf32>
    %528 = math.exp %527 : vector<8x128xf32>
    %cst_227 = arith.constant 1.000000e+00 : f32
    %529 = vector.broadcast %cst_227 : f32 to vector<8x128xf32>
    %530 = arith.addf %529, %528 : vector<8x128xf32>
    %531 = arith.divf %529, %530 : vector<8x128xf32>
    %532 = arith.mulf %523, %464 : vector<8x128xf32>
    %533 = arith.mulf %517, %525 : vector<8x128xf32>
    %534 = arith.addf %532, %533 : vector<8x128xf32>
    %535 = math.tanh %534 : vector<8x128xf32>
    %536 = arith.mulf %531, %535 : vector<8x128xf32>
    %537 = arith.truncf %536 : vector<8x128xf32> to vector<8x128xbf16>
    %c0_228 = arith.constant 0 : index
    %c0_229 = arith.constant 0 : index
    %538 = vector.load %arg13[%c0_228, %c0_229] : memref<8x256xbf16, #tpu.memory_space<vmem>>, vector<8x128xbf16>
    tpu.vector_store %arg13[%c0_228, %c0_229], %537 {strides = array<i32>} : memref<8x256xbf16, #tpu.memory_space<vmem>>, vector<8x128xbf16>,
    %539 = arith.truncf %499 : vector<8x128xf32> to vector<8x128xbf16>
    %c0_230 = arith.constant 0 : index
    %c128_231 = arith.constant 128 : index
    %540 = vector.load %arg13[%c0_230, %c128_231] : memref<8x256xbf16, #tpu.memory_space<vmem>>, vector<8x128xbf16>
    tpu.vector_store %arg13[%c0_230, %c128_231], %539 {strides = array<i32>} : memref<8x256xbf16, #tpu.memory_space<vmem>>, vector<8x128xbf16>,
    %c0_232 = arith.constant 0 : index
    %c0_233 = arith.constant 0 : index
    %541 = vector.load %arg13[%c0_232, %c0_233] : memref<8x256xbf16, #tpu.memory_space<vmem>>, vector<8x256xbf16>
    %c0_234 = arith.constant 0 : index
    %c0_235 = arith.constant 0 : index
    %542 = vector.load %arg5[%c0_234, %c0_235] : memref<256x512xbf16, #tpu.memory_space<vmem>>, vector<256x512xbf16>
    %cst_236 = arith.constant dense<0.000000e+00> : vector<8x512xf32>
    %543 = tpu.matmul %541, %542, %cst_236 {dimension_numbers = #tpu.dot_dimension_numbers<[1], [0], [0], [1], [0, 0, 1, 1], [], []>} : vector<8x256xbf16>, vector<256x512xbf16>, vector<8x512xf32> -> vector<8x512xf32>
    %544 = arith.addf %543, %8 : vector<8x512xf32>
    %545 = vector.extract_strided_slice %544 {offsets = [0, 0], sizes = [8, 128], strides = [1, 1]} : vector<8x512xf32> to vector<8x128xf32>
    %546 = arith.negf %545 : vector<8x128xf32>
    %547 = math.exp %546 : vector<8x128xf32>
    %cst_237 = arith.constant 1.000000e+00 : f32
    %548 = vector.broadcast %cst_237 : f32 to vector<8x128xf32>
    %549 = arith.addf %548, %547 : vector<8x128xf32>
    %550 = arith.divf %548, %549 : vector<8x128xf32>
    %551 = vector.extract_strided_slice %544 {offsets = [0, 128], sizes = [8, 128], strides = [1, 1]} : vector<8x512xf32> to vector<8x128xf32>
    %552 = arith.negf %551 : vector<8x128xf32>
    %553 = math.exp %552 : vector<8x128xf32>
    %cst_238 = arith.constant 1.000000e+00 : f32
    %554 = vector.broadcast %cst_238 : f32 to vector<8x128xf32>
    %555 = arith.addf %554, %553 : vector<8x128xf32>
    %556 = arith.divf %554, %555 : vector<8x128xf32>
    %557 = vector.extract_strided_slice %544 {offsets = [0, 256], sizes = [8, 128], strides = [1, 1]} : vector<8x512xf32> to vector<8x128xf32>
    %558 = math.tanh %557 : vector<8x128xf32>
    %559 = vector.extract_strided_slice %544 {offsets = [0, 384], sizes = [8, 128], strides = [1, 1]} : vector<8x512xf32> to vector<8x128xf32>
    %560 = arith.negf %559 : vector<8x128xf32>
    %561 = math.exp %560 : vector<8x128xf32>
    %cst_239 = arith.constant 1.000000e+00 : f32
    %562 = vector.broadcast %cst_239 : f32 to vector<8x128xf32>
    %563 = arith.addf %562, %561 : vector<8x128xf32>
    %564 = arith.divf %562, %563 : vector<8x128xf32>
    %565 = arith.mulf %556, %497 : vector<8x128xf32>
    %566 = arith.mulf %550, %558 : vector<8x128xf32>
    %567 = arith.addf %565, %566 : vector<8x128xf32>
    %568 = math.tanh %567 : vector<8x128xf32>
    %569 = arith.mulf %564, %568 : vector<8x128xf32>
    %c7_240 = arith.constant 7 : index
    %c0_241 = arith.constant 0 : index
    %c0_242 = arith.constant 0 : index
    %570 = vector.load %arg14[%c7_240, %c0_241, %c0_242] : memref<8x8x128xf32, #tpu.memory_space<vmem>>, vector<1x8x128xf32>
    %571 = vector.shape_cast %570 : vector<1x8x128xf32> to vector<8x128xf32>
    %572 = vector.shape_cast %569 : vector<8x128xf32> to vector<1x8x128xf32>
    tpu.vector_store %arg14[%c7_240, %c0_241, %c0_242], %572 {strides = array<i32>} : memref<8x8x128xf32, #tpu.memory_space<vmem>>, vector<1x8x128xf32>,
    %c0_243 = arith.constant 0 : index
    %c0_244 = arith.constant 0 : index
    %c0_245 = arith.constant 0 : index
    %573 = vector.load %arg14[%c0_243, %c0_244, %c0_245] : memref<8x8x128xf32, #tpu.memory_space<vmem>>, vector<8x8x128xf32>
    %574 = arith.truncf %573 : vector<8x8x128xf32> to vector<8x8x128xbf16>
    %c0_246 = arith.constant 0 : index
    %c0_247 = arith.constant 0 : index
    %c0_248 = arith.constant 0 : index
    %575 = vector.load %arg7[%c0_246, %c0_247, %c0_248] : memref<8x8x128xbf16, #tpu.memory_space<vmem>>, vector<8x8x128xbf16>
    tpu.vector_store %arg7[%c0_246, %c0_247, %c0_248], %574 {strides = array<i32>} : memref<8x8x128xbf16, #tpu.memory_space<vmem>>, vector<8x8x128xbf16>,
    %c0_249 = arith.constant 0 : index
    %c0_250 = arith.constant 0 : index
    %576 = vector.load %arg8[%c0_249, %c0_250] : memref<8x128xf32, #tpu.memory_space<vmem>>, vector<8x128xf32>
    tpu.vector_store %arg8[%c0_249, %c0_250], %536 {strides = array<i32>} : memref<8x128xf32, #tpu.memory_space<vmem>>, vector<8x128xf32>,
    %c0_251 = arith.constant 0 : index
    %c0_252 = arith.constant 0 : index
    %577 = vector.load %arg9[%c0_251, %c0_252] : memref<8x128xf32, #tpu.memory_space<vmem>>, vector<8x128xf32>
    tpu.vector_store %arg9[%c0_251, %c0_252], %534 {strides = array<i32>} : memref<8x128xf32, #tpu.memory_space<vmem>>, vector<8x128xf32>,
    %c0_253 = arith.constant 0 : index
    %c0_254 = arith.constant 0 : index
    %578 = vector.load %arg10[%c0_253, %c0_254] : memref<8x128xf32, #tpu.memory_space<vmem>>, vector<8x128xf32>
    tpu.vector_store %arg10[%c0_253, %c0_254], %569 {strides = array<i32>} : memref<8x128xf32, #tpu.memory_space<vmem>>, vector<8x128xf32>,
    %c0_255 = arith.constant 0 : index
    %c0_256 = arith.constant 0 : index
    %579 = vector.load %arg11[%c0_255, %c0_256] : memref<8x128xf32, #tpu.memory_space<vmem>>, vector<8x128xf32>
    tpu.vector_store %arg11[%c0_255, %c0_256], %567 {strides = array<i32>} : memref<8x128xf32, #tpu.memory_space<vmem>>, vector<8x128xf32>,
    return
  }
  func.func @transform_0(%arg0: i32, %arg1: i32) -> (i32, i32, i32) {
    %c0_i32 = arith.constant 0 : i32
    %c0_i32_0 = arith.constant 0 : i32
    return %arg1, %arg0, %c0_i32 : i32, i32, i32
  }
  func.func @transform_1(%arg0: i32, %arg1: i32) -> (i32, i32) {
    %c0_i32 = arith.constant 0 : i32
    %c0_i32_0 = arith.constant 0 : i32
    %c0_i32_1 = arith.constant 0 : i32
    return %c0_i32, %c0_i32_0 : i32, i32
  }
  func.func @transform_2(%arg0: i32, %arg1: i32) -> (i32, i32) {
    %c0_i32 = arith.constant 0 : i32
    %c0_i32_0 = arith.constant 0 : i32
    %c0_i32_1 = arith.constant 0 : i32
    return %c0_i32, %c0_i32_0 : i32, i32
  }
  func.func @transform_3(%arg0: i32, %arg1: i32) -> (i32, i32) {
    %c0_i32 = arith.constant 0 : i32
    %c0_i32_0 = arith.constant 0 : i32
    %c0_i32_1 = arith.constant 0 : i32
    return %c0_i32, %c0_i32_0 : i32, i32
  }
  func.func @transform_4(%arg0: i32, %arg1: i32) -> (i32, i32) {
    %c0_i32 = arith.constant 0 : i32
    %c0_i32_0 = arith.constant 0 : i32
    %c0_i32_1 = arith.constant 0 : i32
    return %c0_i32, %c0_i32_0 : i32, i32
  }
  func.func @transform_5(%arg0: i32, %arg1: i32) -> (i32, i32, i32) {
    %c0_i32 = arith.constant 0 : i32
    %c0_i32_0 = arith.constant 0 : i32
    return %arg1, %arg0, %c0_i32 : i32, i32, i32
  }
}

</mosaic_0001>

<bundles_post_ra>
// kernel: tpu_custom_call.1
= control target key start
LH: loop header
LB: loop body
LE: loop exit
PB: predicated region body
PF: predicated region fallthrough
CT: control target
= control target key end

     0   :  { %10 = vsyncpa [#allocation10], 0  ;;  %s12669_s0 = inlined_call_operand.hbm [shape: bf16[8,8,128], index: 0, kind: input, shape index: {}]   ;;  %s12670_s1 = inlined_call_operand.hbm [shape: bf16[256,512], index: 1, kind: input, shape index: {}]   ;;  %s12671_s2 = inlined_call_operand.hbm [shape: f32[1,512], index: 2, kind: input, shape index: {}]   ;;  %s12672_s3 = inlined_call_operand.hbm [shape: bf16[256,512], index: 3, kind: input, shape index: {}]   ;;  %s12673_s4 = inlined_call_operand.vmem [shape: f32[1,512], index: 4, kind: input, shape index: {}]   ;;  %s12674_s5 = inlined_call_operand.hbm [shape: bf16[8,8,128], index: 5, kind: output, shape index: {}]  }
   0x1   :  { %11 = vsyncpa [#allocation13], 0 }
   0x2   :  { %12 = vsyncpa [#allocation16], 0 }
   0x3   :  { %13 = vsyncpa [#allocation11], 0  ;;  %s10634_s18 = smov [#allocation12]  }
   0x4   :  { %s31_s19 = sshll.u32 %s10634_s18, 4  ;;  %s32_s19 = int_to_ptr.vmem [resolvable:$true] %s31_s19 }
   0x5   :  { %s10534_s20 = scalar_lea.vmem %s32_s19, 8192  ;;  %p10539_p1 = scmp.lt.s32.totalorder %s32_s19, %s32_s19 }
   0x6   :  { %p10535_p0 = scmp.ne.s32.totalorder %s32_s19, %s10534_s20  ;;  %p10540_p2 = scmp.lt.s32.totalorder %s10534_s20, %s10534_s20 }
   0x8   :  { %p10541_p3 = por %p10540_p2, %p10539_p1 }
   0xa   :  { %p10542_p4 = pnand %p10541_p3, %p10535_p0 }
   0xc   :  { %10545 = shalt.err (!%p10542_p4)
}
   0xd   :  { %s10635_s21 = smov 256   ;;  %s10636_s22 = smov 16  }
   0xe   :  { %37 = dma.hbm_to_vmem [thread:$0]  %s12670_s1, 8192, %s32_s19, [#allocation13], %s10635_s21, %s10635_s21, %s10636_s22  }
   0xf   :  { %s10637_s25 = smov [#allocation9]  }
  0x10   :  { %s19_s26 = sshll.u32 %s10637_s25, 4  ;;  %s20_s26 = int_to_ptr.vmem [resolvable:$true] %s19_s26 }
  0x11   :  { %s10554_s27 = scalar_lea.vmem %s20_s26, 512  ;;  %p10559_p6 = scmp.lt.s32.totalorder %s20_s26, %s20_s26 }
  0x12   :  { %p10555_p5 = scmp.ne.s32.totalorder %s20_s26, %s10554_s27  ;;  %p10560_p7 = scmp.lt.s32.totalorder %s10554_s27, %s10554_s27 }
  0x14   :  { %p10561_p8 = por %p10560_p7, %p10559_p6 }
  0x16   :  { %p10562_p9 = pnand %p10561_p8, %p10555_p5 }
  0x18   :  { %10565 = shalt.err (!%p10562_p9)
}
  0x19   :  { %s10638_s28 = smov 64   ;;  %s10639_s29 = smov 4  }
  0x1a   :  { %25 = dma.hbm_to_vmem [thread:$0]  %s12669_s0, 512, %s20_s26, [#allocation10], %s10638_s28, %s10638_s28, %s10639_s29  }
  0x1b   :  { %s10640_s1 = smov [#allocation14]   ;;  %s10641_s8 = smov [#allocation15]  }
  0x1c   :  { %s44_s7 = sshll.u32 %s10640_s1, 4  ;;  %s53_s9 = sshll.u32 %s10641_s8, 4  ;;  %s45_s7 = int_to_ptr.vmem [resolvable:$true] %s44_s7  ;;  %s54_s9 = int_to_ptr.vmem [resolvable:$true] %s53_s9 }
  0x1d   :  { %s10574_s10 = scalar_lea.vmem %s45_s7, 64  ;;  %p10579_p11 = scmp.lt.s32.totalorder %s45_s7, %s45_s7 }
  0x1e   :  { %p10575_p10 = scmp.ne.s32.totalorder %s45_s7, %s10574_s10  ;;  %p10580_p12 = scmp.lt.s32.totalorder %s10574_s10, %s10574_s10 }
  0x20   :  { %p10581_p13 = por %p10580_p12, %p10579_p11 }
  0x22   :  { %p10582_p0 = pnand %p10581_p13, %p10575_p10 }
  0x24   :  { %10585 = shalt.err (!%p10582_p0)
}
  0x25   :  { %47 = dma.hbm_to_vmem [thread:$0]  %s12671_s2, 64, %s45_s7, [#allocation13]  }
  0x26   :  { %s10594_s13 = scalar_lea.vmem %s54_s9, 8192  ;;  %p10599_p2 = scmp.lt.s32.totalorder %s54_s9, %s54_s9 }
  0x27   :  { %p10595_p1 = scmp.ne.s32.totalorder %s54_s9, %s10594_s13  ;;  %p10600_p3 = scmp.lt.s32.totalorder %s10594_s13, %s10594_s13 }
  0x29   :  { %p10601_p4 = por %p10600_p3, %p10599_p2 }
  0x2b   :  { %p10602_p5 = pnand %p10601_p4, %p10595_p1 }
  0x2d   :  { %10605 = shalt.err (!%p10602_p5)
}
  0x2e   :  { %59 = dma.hbm_to_vmem [thread:$0]  %s12672_s3, 8192, %s54_s9, [#allocation16], %s10635_s21, %s10635_s21, %s10636_s22  }
  0x2f   :  { %10626 = dma.done.wait [#allocation10], 512  }
  0x30   :  { %10627 = vsyncadd [#allocation10], 4294966784 }
  0x31   :  { %10628 = dma.done.wait [#allocation13], 8256  }
  0x32   :  { %10629 = vsyncadd [#allocation13], 4294959040 }
  0x33   :  { %10630 = dma.done.wait [#allocation16], 8192  }
  0x34   :  { %10631 = vsyncadd [#allocation16], 4294959104  ;;  %v10642_v0 = vmov 0.0|0.0   ;;  %v9417_v1 = vld [vmem:[#allocation12 + $0xe4] ss:$16 sps:$4 sm:$0xff]  }
  0x35   :  { %133 = vst [vmem:[#allocation6 + $0x4] sm:$0xf] %v10642_v0  ;;  %v9419_v2 = vld [vmem:[#allocation12 + $0xe0] ss:$16 sps:$4 sm:$0xff]   ;;  %526 = vmatprep.subr.bf16.mxu0 %v9417_v1  ;;  %v9420_v3 = vld [vmem:[#allocation12 + $0xc4] ss:$16 sps:$4 sm:$0xff]  }
  0x36   :  { %527 = vmatpush1.bf16.msra.mxu0 %v9419_v2  ;;  %v9422_v4 = vld [vmem:[#allocation12 + $0xc0] ss:$16 sps:$4 sm:$0xff]   ;;  %v9423_v5 = vld [vmem:[#allocation12 + $0xa4] ss:$16 sps:$4 sm:$0xff]   ;;  %v9428_v6 = vld [vmem:[#allocation12 + $0xec] ss:$16 sps:$4 sm:$0xff]  }
  0x37   :  { %528 = vmatprep.subr.bf16.mxu0 %v9420_v3  ;;  %v9431_v7 = vld [vmem:[#allocation12 + $0xe8] ss:$16 sps:$4 sm:$0xff]   ;;  %v9425_v8 = vld [vmem:[#allocation12 + $0xa0] ss:$16 sps:$4 sm:$0xff]   ;;  %567 = vmatprep.subr.bf16.mxu1 %v9428_v6  ;;  %v9426_v9 = vld [vmem:[#allocation12 + $0x84] ss:$16 sps:$4 sm:$0xff]  }
  0x38   :  { %568 = vmatpush1.bf16.msra.mxu1 %v9431_v7  ;;  %v9434_v10 = vld [vmem:[#allocation12 + $0xcc] ss:$16 sps:$4 sm:$0xff]   ;;  %v9437_v11 = vld [vmem:[#allocation12 + $0xc8] ss:$16 sps:$4 sm:$0xff]   ;;  %v9430_v12 = vld [vmem:[#allocation12 + $0x80] ss:$16 sps:$4 sm:$0xff]  }
  0x39   :  { %569 = vmatprep.subr.bf16.mxu1 %v9434_v10  ;;  %v9432_v13 = vld [vmem:[#allocation12 + $0x64] ss:$16 sps:$4 sm:$0xff]   ;;  %v9440_v14 = vld [vmem:[#allocation12 + $0xac] ss:$16 sps:$4 sm:$0xff]   ;;  %v9443_v15 = vld [vmem:[#allocation12 + $0xa8] ss:$16 sps:$4 sm:$0xff]  }
  0x3a   :  { %529 = vmatpush1.bf16.msra.mxu0 %v9422_v4  ;;  %v9446_v16 = vld [vmem:[#allocation12 + $0x8c] ss:$16 sps:$4 sm:$0xff]   ;;  %v9436_v17 = vld [vmem:[#allocation12 + $0x60] ss:$16 sps:$4 sm:$0xff]   ;;  %v9438_v18 = vld [vmem:[#allocation12 + $0x44] ss:$16 sps:$4 sm:$0xff]  }
  0x3b   :  { %530 = vmatprep.subr.bf16.mxu0 %v9423_v5  ;;  %v9449_v19 = vld [vmem:[#allocation12 + $0x88] ss:$16 sps:$4 sm:$0xff]   ;;  %v9452_v20 = vld [vmem:[#allocation12 + $0x6c] ss:$16 sps:$4 sm:$0xff]   ;;  %v9442_v21 = vld [vmem:[#allocation12 + $0x40] ss:$16 sps:$4 sm:$0xff]  }
  0x3c   :  { %570 = vmatpush1.bf16.msra.mxu1 %v9437_v11  ;;  %v9444_v22 = vld [vmem:[#allocation12 + $0x24] ss:$16 sps:$4 sm:$0xff]   ;;  %v9455_v23 = vld [vmem:[#allocation12 + $0x68] ss:$16 sps:$4 sm:$0xff]   ;;  %v9458_v24 = vld [vmem:[#allocation12 + $0x4c] ss:$16 sps:$4 sm:$0xff]  }
  0x3d   :  { %571 = vmatprep.subr.bf16.mxu1 %v9440_v14  ;;  %v9448_v25 = vld [vmem:[#allocation12 + $0x20] ss:$16 sps:$4 sm:$0xff]   ;;  %v9450_v26 = vld [vmem:[#allocation12 + $0x4] ss:$16 sps:$4 sm:$0xff]   ;;  %v9461_v27 = vld [vmem:[#allocation12 + $0x48] ss:$16 sps:$4 sm:$0xff]  }
  0x3e   :  { %531 = vmatpush1.bf16.msra.mxu0 %v9425_v8  ;;  %v9464_v28 = vld [vmem:[#allocation12 + $0x2c] ss:$16 sps:$4 sm:$0xff]   ;;  %v9454_v29 = vld [vmem:[#allocation12] ss:$16 sps:$4 sm:$0xff]   ;;  %v9456_v30 = vld [vmem:[#allocation12 + $0x1e4] ss:$16 sps:$4 sm:$0xff]  }
  0x3f   :  { %532 = vmatprep.subr.bf16.mxu0 %v9426_v9  ;;  %v9467_v31 = vld [vmem:[#allocation12 + $0x28] ss:$16 sps:$4 sm:$0xff]   ;;  %v9470_v32 = vld [vmem:[#allocation12 + $0xc] ss:$16 sps:$4 sm:$0xff]   ;;  %v9460_v33 = vld [vmem:[#allocation12 + $0x1e0] ss:$16 sps:$4 sm:$0xff]  }
  0x40   :  { %572 = vmatpush1.bf16.msra.mxu1 %v9443_v15  ;;  %v9462_v34 = vld [vmem:[#allocation12 + $0x1c4] ss:$16 sps:$4 sm:$0xff]   ;;  %v9473_v35 = vld [vmem:[#allocation12 + $0x8] ss:$16 sps:$4 sm:$0xff]   ;;  %v9476_v36 = vld [vmem:[#allocation12 + $0x1ec] ss:$16 sps:$4 sm:$0xff]  }
  0x41   :  { %573 = vmatprep.subr.bf16.mxu1 %v9446_v16  ;;  %v9466_v37 = vld [vmem:[#allocation12 + $0x1c0] ss:$16 sps:$4 sm:$0xff]   ;;  %v9468_v38 = vld [vmem:[#allocation12 + $0x1a4] ss:$16 sps:$4 sm:$0xff]   ;;  %v9479_v39 = vld [vmem:[#allocation12 + $0x1e8] ss:$16 sps:$4 sm:$0xff]  }
  0x42   :  { %533 = vmatpush1.bf16.msra.mxu0 %v9430_v12  ;;  %v9482_v40 = vld [vmem:[#allocation12 + $0x1cc] ss:$16 sps:$4 sm:$0xff]   ;;  %v9472_v41 = vld [vmem:[#allocation12 + $0x1a0] ss:$16 sps:$4 sm:$0xff]   ;;  %v9474_v43 = vld [vmem:[#allocation12 + $0x184] ss:$16 sps:$4 sm:$0xff]  }
  0x43   :  { %534 = vmatprep.subr.bf16.mxu0 %v9432_v13  ;;  %v130_v42 = vld [vmem:[#allocation9] sm:$0xf]  ;;  %v9485_v44 = vld [vmem:[#allocation12 + $0x1c8] ss:$16 sps:$4 sm:$0xff]   ;;  %v9488_v45 = vld [vmem:[#allocation12 + $0x1ac] ss:$16 sps:$4 sm:$0xff]  }
  0x44   :  { %574 = vmatpush1.bf16.msra.mxu1 %v9449_v19  ;;  %131 = vst [vmem:[#allocation6] sm:$0xf] %v130_v42  ;;  %v9478_v46 = vld [vmem:[#allocation12 + $0x180] ss:$16 sps:$4 sm:$0xff]   ;;  %v9480_v47 = vld [vmem:[#allocation12 + $0x164] ss:$16 sps:$4 sm:$0xff]  }
  0x45   :  { %575 = vmatprep.subr.bf16.mxu1 %v9452_v20  ;;  %v9491_v48 = vld [vmem:[#allocation12 + $0x1a8] ss:$16 sps:$4 sm:$0xff]   ;;  %v9494_v49 = vld [vmem:[#allocation12 + $0x18c] ss:$16 sps:$4 sm:$0xff]   ;;  %v9484_v51 = vld [vmem:[#allocation12 + $0x160] ss:$16 sps:$4 sm:$0xff]  }
  0x46   :  { %535 = vmatpush1.bf16.msra.mxu0 %v9436_v17  ;;  %v9486_v53 = vld [vmem:[#allocation12 + $0x144] ss:$16 sps:$4 sm:$0xff]   ;;  %v9497_v54 = vld [vmem:[#allocation12 + $0x188] ss:$16 sps:$4 sm:$0xff]   ;;  %v9500_v55 = vld [vmem:[#allocation12 + $0x16c] ss:$16 sps:$4 sm:$0xff]  }
  0x47   :  { %536 = vmatprep.subr.bf16.mxu0 %v9438_v18  ;;  %v9490_v56 = vld [vmem:[#allocation12 + $0x140] ss:$16 sps:$4 sm:$0xff]   ;;  %v9492_v57 = vld [vmem:[#allocation12 + $0x124] ss:$16 sps:$4 sm:$0xff]   ;;  %v9503_v58 = vld [vmem:[#allocation12 + $0x168] ss:$16 sps:$4 sm:$0xff]  }
  0x48   :  { %576 = vmatpush1.bf16.msra.mxu1 %v9455_v23  ;;  %v9506_v59 = vld [vmem:[#allocation12 + $0x14c] ss:$16 sps:$4 sm:$0xff]   ;;  %v9496_v60 = vld [vmem:[#allocation12 + $0x120] ss:$16 sps:$4 sm:$0xff]   ;;  %v9498_v61 = vld [vmem:[#allocation12 + $0x104] ss:$16 sps:$4 sm:$0xff]  }
  0x49   :  { %577 = vmatprep.subr.bf16.mxu1 %v9458_v24  ;;  %v9508_v62 = vld [vmem:[#allocation12 + $0x148] ss:$16 sps:$4 sm:$0xff]   ;;  %v9509_v63 = vld [vmem:[#allocation12 + $0x12c] ss:$16 sps:$4 sm:$0xff]   ;;  %v9502_v1 = vld [vmem:[#allocation12 + $0x100] ss:$16 sps:$4 sm:$0xff]  }
  0x4a   :  { %537 = vmatpush1.bf16.msra.mxu0 %v9442_v21  ;;  %v9511_v2 = vld [vmem:[#allocation12 + $0x128] ss:$16 sps:$4 sm:$0xff]   ;;  %v9512_v4 = vld [vmem:[#allocation12 + $0x10c] ss:$16 sps:$4 sm:$0xff]   ;;  %v9515_v5 = vld [vmem:[#allocation15 + $0xe0] ss:$16 sps:$4 sm:$0xff]  }
  0x4b   :  { %538 = vmatprep.subr.bf16.mxu0 %v9444_v22  ;;  %v134_v50 = vld [vmem:[#allocation6] sm:$0xff]  ;;  %v9520_v9 = vld [vmem:[#allocation15 + $0xec] ss:$16 sps:$4 sm:$0xff]   ;;  %v9521_v10 = vld [vmem:[#allocation15 + $0xc0] ss:$16 sps:$4 sm:$0xff]  }
  0x4c   :  { %578 = vmatpush1.bf16.msra.mxu1 %v9461_v27  ;;  %v8225_v52 = vcombine.high %v134_v50, %v134_v50  ;;  %v9517_v3 = vld [vmem:[#allocation15 + $0xe4] ss:$16 sps:$4 sm:$0xff]   ;;  %v8224_v6 = vcombine.low %v134_v50, %v134_v50  ;;  %v9518_v11 = vld [vmem:[#allocation15 + $0xe8] ss:$16 sps:$4 sm:$0xff]   ;;  %v9526_v12 = vld [vmem:[#allocation15 + $0xcc] ss:$16 sps:$4 sm:$0xff]  }
  0x4d   :  { %579 = vmatprep.subr.bf16.mxu1 %v9464_v28  ;;  %v9514_v7 = vld [vmem:[#allocation12 + $0x108] ss:$16 sps:$4 sm:$0xff]   ;;  %v9524_v13 = vld [vmem:[#allocation15 + $0xc8] ss:$16 sps:$4 sm:$0xff]   ;;  %v10700_v15 = vld [vmem:[#allocation15 + $0xac] ss:$16 sps:$4 sm:$0xff]  }
  0x4e   :  { %539 = vmatpush1.bf16.msra.mxu0 %v9448_v25  ;;  %558 = vmatprep.mubr.bf16.mxu0 %v8225_v52  ;;  %v9523_v8 = vld [vmem:[#allocation15 + $0xc4] ss:$16 sps:$4 sm:$0xff]   ;;  %v10702_v16 = vld [vmem:[#allocation15 + $0xa0] ss:$16 sps:$4 sm:$0xff]   ;;  %v10704_v17 = vld [vmem:[#allocation15 + $0xa8] ss:$16 sps:$4 sm:$0xff]  }
  0x4f   :  { %540 = vmatprep.subr.bf16.mxu0 %v9450_v26  ;;  %599 = vmatprep.mubr.bf16.mxu1 %v8225_v52  ;;  %v10698_v14 = vld [vmem:[#allocation15 + $0xa4] ss:$16 sps:$4 sm:$0xff]   ;;  %v10714_v19 = vld [vmem:[#allocation15 + $0x80] ss:$16 sps:$4 sm:$0xff]   ;;  %v10716_v20 = vld [vmem:[#allocation15 + $0x88] ss:$16 sps:$4 sm:$0xff]  }
  0x50   :  { %580 = vmatpush1.bf16.msra.mxu1 %v9467_v31  ;;  %v10710_v18 = vld [vmem:[#allocation15 + $0x84] ss:$16 sps:$4 sm:$0xff]   ;;  %v10724_v22 = vld [vmem:[#allocation15 + $0x6c] ss:$16 sps:$4 sm:$0xff]   ;;  %v10726_v23 = vld [vmem:[#allocation15 + $0x60] ss:$16 sps:$4 sm:$0xff]  }
  0x51   :  { %581 = vmatprep.subr.bf16.mxu1 %v9470_v32  ;;  %v10722_v21 = vld [vmem:[#allocation15 + $0x64] ss:$16 sps:$4 sm:$0xff]   ;;  %v10728_v24 = vld [vmem:[#allocation15 + $0x68] ss:$16 sps:$4 sm:$0xff]   ;;  %v10736_v26 = vld [vmem:[#allocation15 + $0x4c] ss:$16 sps:$4 sm:$0xff]  }
  0x52   :  { %541 = vmatpush1.bf16.msra.mxu0 %v9454_v29  ;;  %v10734_v25 = vld [vmem:[#allocation15 + $0x44] ss:$16 sps:$4 sm:$0xff]   ;;  %v10738_v27 = vld [vmem:[#allocation15 + $0x40] ss:$16 sps:$4 sm:$0xff]   ;;  %v10740_v28 = vld [vmem:[#allocation15 + $0x48] ss:$16 sps:$4 sm:$0xff]  }
  0x53   :  { %542 = vmatprep.subr.bf16.mxu0 %v9456_v30  ;;  %v10746_v29 = vld [vmem:[#allocation15 + $0x24] ss:$16 sps:$4 sm:$0xff]   ;;  %v10748_v30 = vld [vmem:[#allocation15 + $0x2c] ss:$16 sps:$4 sm:$0xff]   ;;  %v10750_v31 = vld [vmem:[#allocation15 + $0x20] ss:$16 sps:$4 sm:$0xff]  }
  0x54   :  { %582 = vmatpush1.bf16.msra.mxu1 %v9473_v35  ;;  %v10752_v32 = vld [vmem:[#allocation15 + $0x28] ss:$16 sps:$4 sm:$0xff]   ;;  %v10762_v35 = vld [vmem:[#allocation15] ss:$16 sps:$4 sm:$0xff]   ;;  %v10784_v42 = vld [vmem:[#allocation15 + $0x1cc] ss:$16 sps:$4 sm:$0xff]  }
  0x55   :  { %583 = vmatprep.subr.bf16.mxu1 %v9476_v36  ;;  %v10764_v36 = vld [vmem:[#allocation15 + $0x8] ss:$16 sps:$4 sm:$0xff]   ;;  %v10808_v50 = vld [vmem:[#allocation15 + $0x18c] ss:$16 sps:$4 sm:$0xff]  }
  0x56   :  { %543 = vmatpush2.bf16.msra.mxu0 %v9460_v33  ;;  %v10758_v33 = vld [vmem:[#allocation15 + $0x4] ss:$16 sps:$4 sm:$0xff]   ;;  %v10812_v52 = vld [vmem:[#allocation15 + $0x188] ss:$16 sps:$4 sm:$0xff]  }
  0x57   :  { %544 = vmatprep.subr.bf16.mxu0 %v9462_v34  ;;  %v10760_v34 = vld [vmem:[#allocation15 + $0xc] ss:$16 sps:$4 sm:$0xff]  }
  0x58   :  { %584 = vmatpush2.bf16.msra.mxu1 %v9479_v39  ;;  %v10774_v39 = vld [vmem:[#allocation15 + $0x1e0] ss:$16 sps:$4 sm:$0xff]  }
  0x59   :  { %585 = vmatprep.subr.bf16.mxu1 %v9482_v40  ;;  %v10776_v40 = vld [vmem:[#allocation15 + $0x1e8] ss:$16 sps:$4 sm:$0xff]  }
  0x5a   :  { %545 = vmatpush2.bf16.msra.mxu0 %v9466_v37  ;;  %v10770_v37 = vld [vmem:[#allocation15 + $0x1e4] ss:$16 sps:$4 sm:$0xff]  }
  0x5b   :  { %546 = vmatprep.subr.bf16.mxu0 %v9468_v38  ;;  %v10772_v38 = vld [vmem:[#allocation15 + $0x1ec] ss:$16 sps:$4 sm:$0xff]  }
  0x5c   :  { %586 = vmatpush2.bf16.msra.mxu1 %v9485_v44  ;;  %v10788_v44 = vld [vmem:[#allocation15 + $0x1c8] ss:$16 sps:$4 sm:$0xff]  }
  0x5d   :  { %587 = vmatprep.subr.bf16.mxu1 %v9488_v45  ;;  %v10794_v45 = vld [vmem:[#allocation15 + $0x1a4] ss:$16 sps:$4 sm:$0xff]  }
  0x5e   :  { %547 = vmatpush2.bf16.msra.mxu0 %v9472_v41  ;;  %v10782_v41 = vld [vmem:[#allocation15 + $0x1c4] ss:$16 sps:$4 sm:$0xff]  }
  0x5f   :  { %548 = vmatprep.subr.bf16.mxu0 %v9474_v43  ;;  %v10786_v43 = vld [vmem:[#allocation15 + $0x1c0] ss:$16 sps:$4 sm:$0xff]  }
  0x60   :  { %588 = vmatpush2.bf16.msra.mxu1 %v9491_v48  ;;  %v10800_v48 = vld [vmem:[#allocation15 + $0x1a8] ss:$16 sps:$4 sm:$0xff]  }
  0x61   :  { %589 = vmatprep.subr.bf16.mxu1 %v9494_v49  ;;  %v10806_v49 = vld [vmem:[#allocation15 + $0x184] ss:$16 sps:$4 sm:$0xff]  }
  0x62   :  { %549 = vmatpush2.bf16.msra.mxu0 %v9478_v46  ;;  %v10796_v46 = vld [vmem:[#allocation15 + $0x1ac] ss:$16 sps:$4 sm:$0xff]  }
  0x63   :  { %550 = vmatprep.subr.bf16.mxu0 %v9480_v47  ;;  %v10798_v47 = vld [vmem:[#allocation15 + $0x1a0] ss:$16 sps:$4 sm:$0xff]  }
  0x64   :  { %590 = vmatpush2.bf16.msra.mxu1 %v9497_v54  ;;  %v10820_v54 = vld [vmem:[#allocation15 + $0x16c] ss:$16 sps:$4 sm:$0xff]  }
  0x65   :  { %591 = vmatprep.subr.bf16.mxu1 %v9500_v55  ;;  %v10822_v55 = vld [vmem:[#allocation15 + $0x160] ss:$16 sps:$4 sm:$0xff]  }
  0x66   :  { %551 = vmatpush2.bf16.msra.mxu0 %v9484_v51  ;;  %v10810_v51 = vld [vmem:[#allocation15 + $0x180] ss:$16 sps:$4 sm:$0xff]  }
  0x67   :  { %552 = vmatprep.subr.bf16.mxu0 %v9486_v53  ;;  %v10818_v53 = vld [vmem:[#allocation15 + $0x164] ss:$16 sps:$4 sm:$0xff]  }
  0x68   :  { %592 = vmatpush2.bf16.msra.mxu1 %v9503_v58  ;;  %v10830_v58 = vld [vmem:[#allocation15 + $0x14c] ss:$16 sps:$4 sm:$0xff]  }
  0x69   :  { %593 = vmatprep.subr.bf16.mxu1 %v9506_v59  ;;  %12966 = vst [vmem:[#allocation22_spill] sm:$0xff] %v10830_v58  ;;  %v10834_v59 = vld [vmem:[#allocation15 + $0x140] ss:$16 sps:$4 sm:$0xff]  }
  0x6a   :  { %553 = vmatpush2.bf16.msra.mxu0 %v9490_v56  ;;  %v10824_v56 = vld [vmem:[#allocation15 + $0x168] ss:$16 sps:$4 sm:$0xff]   ;;  %12967 = vst [vmem:[#allocation23_spill] sm:$0xff] %v10834_v59 }
  0x6b   :  { %554 = vmatprep.subr.bf16.mxu0 %v9492_v57  ;;  %v10828_v57 = vld [vmem:[#allocation15 + $0x144] ss:$16 sps:$4 sm:$0xff]  }
  0x6c   :  { %594 = vmatpush2.bf16.msra.mxu1 %v9508_v62  ;;  %v10842_v62 = vld [vmem:[#allocation15 + $0x12c] ss:$16 sps:$4 sm:$0xff]  }
  0x6d   :  { %595 = vmatprep.subr.bf16.mxu1 %v9509_v63  ;;  %12970 = vst [vmem:[#allocation26_spill] sm:$0xff] %v10842_v62  ;;  %v10844_v63 = vld [vmem:[#allocation15 + $0x120] ss:$16 sps:$4 sm:$0xff]  }
  0x6e   :  { %555 = vmatpush2.bf16.msra.mxu0 %v9496_v60  ;;  %v10836_v60 = vld [vmem:[#allocation15 + $0x148] ss:$16 sps:$4 sm:$0xff]   ;;  %12971 = vst [vmem:[#allocation27_spill] sm:$0xff] %v10844_v63 }
  0x6f   :  { %556 = vmatprep.subr.bf16.mxu0 %v9498_v61  ;;  %12968 = vst [vmem:[#allocation24_spill] sm:$0xff] %v10836_v60  ;;  %v10840_v61 = vld [vmem:[#allocation15 + $0x124] ss:$16 sps:$4 sm:$0xff]  }
  0x70   :  { %596 = vmatpush2.bf16.msra.mxu1 %v9511_v2  ;;  %12969 = vst [vmem:[#allocation25_spill] sm:$0xff] %v10840_v61  ;;  %v10848_v2 = vld [vmem:[#allocation15 + $0x104] ss:$16 sps:$4 sm:$0xff]  }
  0x71   :  { %597 = vmatprep.subr.bf16.mxu1 %v9512_v4  ;;  %12973 = vst [vmem:[#allocation29_spill] sm:$0xff] %v10848_v2  ;;  %v10856_v4 = vld [vmem:[#allocation15 + $0x100] ss:$16 sps:$4 sm:$0xff]  }
  0x72   :  { %557 = vmatpush2.bf16.msra.mxu0 %v9502_v1  ;;  %v10846_v1 = vld [vmem:[#allocation15 + $0x128] ss:$16 sps:$4 sm:$0xff]   ;;  %12975 = vst [vmem:[#allocation31_spill] sm:$0xff] %v10856_v4 }
  0x73   :  { %1028 = vmatprep.subr.bf16.mxu0 %v9517_v3  ;;  %12972 = vst [vmem:[#allocation28_spill] sm:$0xff] %v10846_v1  ;;  %v10850_v3 = vld [vmem:[#allocation15 + $0x10c] ss:$16 sps:$4 sm:$0xff]  }
  0x74   :  { %598 = vmatpush2.bf16.msra.mxu1 %v9514_v7  ;;  %12974 = vst [vmem:[#allocation30_spill] sm:$0xff] %v10850_v3  ;;  %v10455_v7 = vld [vmem:[#allocation12 + $0xec] ss:$16 sps:$4 sm:$0xff]  }
  0x75   :  { %559 = vmatmul.mubr.bf16.vlgmr.msra.gmra.mxu0 %v8224_v6  ;;  %1069 = vmatprep.subr.bf16.mxu1 %v9520_v9  ;;  %v84_v9 = vlaneseq }
  0x76   :  { %1029 = vmatpush1.bf16.msra.mxu0 %v9515_v5  ;;  %1060 = vmatprep.mubr.bf16.mxu0 %v10642_v0  ;;  %v10858_v5 = vld [vmem:[#allocation15 + $0x108] ss:$16 sps:$4 sm:$0xff]  }
  0x77   :  { %1030 = vmatprep.subr.bf16.mxu0 %v9523_v8  ;;  %600 = vmatmul.mubr.bf16.vlgmr.msra.gmra.mxu1 %v8224_v6  ;;  %12976 = vst [vmem:[#allocation32_spill] sm:$0xff] %v10858_v5  ;;  %v10454_v6 = vld [vmem:[#allocation12 + $0xe4] ss:$16 sps:$4 sm:$0xff]  }
  0x78   :  { %1070 = vmatpush1.bf16.msra.mxu1 %v9518_v11  ;;  %1101 = vmatprep.mubr.bf16.mxu1 %v10642_v0  ;;  %v10712_v0 = vld [vmem:[#allocation15 + $0x8c] ss:$16 sps:$4 sm:$0xff]   ;;  %v1136_v8 = vld [vmem:[#allocation9 + $0x4] sm:$0xf] }
  0x79   :  { %1071 = vmatprep.subr.bf16.mxu1 %v9526_v12  ;;  %1137 = vst [vmem:[#allocation6] sm:$0xf] %v1136_v8  ;;  %v82_v12 = vld [vmem:[#allocation14] sm:$0xf] }
  0x7a   :  { %1031 = vmatpush1.bf16.msra.mxu0 %v9521_v10  ;;  %v10866_v10 = vshrl.u32 %v84_v9, 7 }
  0x7b   :  { %1032 = vmatprep.subr.bf16.mxu0 %v10698_v14 }
  0x7c   :  { %1072 = vmatpush1.bf16.msra.mxu1 %v9524_v13  ;;  %12977 = vst [vmem:[#allocation33_spill] sm:$0xff] %v10866_v10  ;;  %v12683_v11 = vsub.s32 0, %v10866_v10  ;;  %v12685_v13 = vsub.s32 1, %v10866_v10 }
  0x7d   :  { %1073 = vmatprep.subr.bf16.mxu1 %v10700_v15 }
  0x7e   :  { %1033 = vmatpush1.bf16.msra.mxu0 %v10702_v16 }
  0x7f   :  { %1034 = vmatprep.subr.bf16.mxu0 %v10710_v18 }
  0x80   :  { %1074 = vmatpush1.bf16.msra.mxu1 %v10704_v17 }
  0x81   :  { %1075 = vmatprep.subr.bf16.mxu1 %v10712_v0 }
  0x82   :  { %1035 = vmatpush1.bf16.msra.mxu0 %v10714_v19 }
  0x83   :  { %1036 = vmatprep.subr.bf16.mxu0 %v10722_v21 }
  0x84   :  { %1076 = vmatpush1.bf16.msra.mxu1 %v10716_v20 }
  0x85   :  { %1077 = vmatprep.subr.bf16.mxu1 %v10724_v22 }
  0x86   :  { %1037 = vmatpush1.bf16.msra.mxu0 %v10726_v23 }
  0x87   :  { %1038 = vmatprep.subr.bf16.mxu0 %v10734_v25 }
  0x88   :  { %1078 = vmatpush1.bf16.msra.mxu1 %v10728_v24 }
  0x89   :  { %1079 = vmatprep.subr.bf16.mxu1 %v10736_v26 }
  0x8a   :  { %1039 = vmatpush1.bf16.msra.mxu0 %v10738_v27 }
  0x8b   :  { %1040 = vmatprep.subr.bf16.mxu0 %v10746_v29 }
  0x8c   :  { %1080 = vmatpush1.bf16.msra.mxu1 %v10740_v28 }
  0x8d   :  { %1081 = vmatprep.subr.bf16.mxu1 %v10748_v30 }
  0x8e   :  { %1041 = vmatpush1.bf16.msra.mxu0 %v10750_v31 }
  0x8f   :  { %1042 = vmatprep.subr.bf16.mxu0 %v10758_v33 }
  0x90   :  { %1082 = vmatpush1.bf16.msra.mxu1 %v10752_v32 }
  0x91   :  { %1083 = vmatprep.subr.bf16.mxu1 %v10760_v34 }
  0x92   :  { %1043 = vmatpush1.bf16.msra.mxu0 %v10762_v35 }
  0x93   :  { %1044 = vmatprep.subr.bf16.mxu0 %v10770_v37 }
  0x94   :  { %1084 = vmatpush1.bf16.msra.mxu1 %v10764_v36 }
  0x95   :  { %1085 = vmatprep.subr.bf16.mxu1 %v10772_v38 }
  0x96   :  { %1045 = vmatpush2.bf16.msra.mxu0 %v10774_v39 }
  0x97   :  { %1046 = vmatprep.subr.bf16.mxu0 %v10782_v41 }
  0x98   :  { %1086 = vmatpush2.bf16.msra.mxu1 %v10776_v40 }
  0x99   :  { %1087 = vmatprep.subr.bf16.mxu1 %v10784_v42 }
  0x9a   :  { %1047 = vmatpush2.bf16.msra.mxu0 %v10786_v43 }
  0x9b   :  { %1048 = vmatprep.subr.bf16.mxu0 %v10794_v45 }
  0x9c   :  { %1088 = vmatpush2.bf16.msra.mxu1 %v10788_v44 }
  0x9d   :  { %1089 = vmatprep.subr.bf16.mxu1 %v10796_v46 }
  0x9e   :  { %1049 = vmatpush2.bf16.msra.mxu0 %v10798_v47 }
  0x9f   :  { %1050 = vmatprep.subr.bf16.mxu0 %v10806_v49 }
  0xa0   :  { %1090 = vmatpush2.bf16.msra.mxu1 %v10800_v48 }
  0xa1   :  { %1091 = vmatprep.subr.bf16.mxu1 %v10808_v50 }
  0xa2   :  { %1051 = vmatpush2.bf16.msra.mxu0 %v10810_v51 }
  0xa3   :  { %1052 = vmatprep.subr.bf16.mxu0 %v10818_v53 }
  0xa4   :  { %1092 = vmatpush2.bf16.msra.mxu1 %v10812_v52 }
  0xa5   :  { %1093 = vmatprep.subr.bf16.mxu1 %v10820_v54 }
  0xa6   :  { %1053 = vmatpush2.bf16.msra.mxu0 %v10822_v55 }
  0xa7   :  { %1054 = vmatprep.subr.bf16.mxu0 %v10828_v57 }
  0xa8   :  { %1094 = vmatpush2.bf16.msra.mxu1 %v10824_v56 }
  0xa9   :  { %1095 = vmatprep.subr.bf16.mxu1 %v10830_v58 }
  0xaa   :  { %1055 = vmatpush2.bf16.msra.mxu0 %v10834_v59 }
  0xab   :  { %1056 = vmatprep.subr.bf16.mxu0 %v10840_v61 }
  0xac   :  { %1096 = vmatpush2.bf16.msra.mxu1 %v10836_v60 }
  0xad   :  { %1097 = vmatprep.subr.bf16.mxu1 %v10842_v62 }
  0xae   :  { %1057 = vmatpush2.bf16.msra.mxu0 %v10844_v63 }
  0xaf   :  { %1058 = vmatprep.subr.bf16.mxu0 %v10848_v2 }
  0xb0   :  { %1098 = vmatpush2.bf16.msra.mxu1 %v10846_v1  ;;  %v12690_v1 = vsub.s32 3, %v10866_v10 }
  0xb1   :  { %1099 = vmatprep.subr.bf16.mxu1 %v10850_v3  ;;  %v10872_v3 = vrot.slane %v82_v12, %v12683_v11  ;;  %v12694_v11 = vsub.s32 2, %v10866_v10 }
  0xb2   :  { %1059 = vmatpush2.bf16.msra.mxu0 %v10856_v4 }
  0xb3   :  { %1531 = vmatprep.subr.bf16.mxu0 %v10454_v6  ;;  %12978 = vst [vmem:[#allocation34_spill] sm:$0xff] %v10872_v3 }
  0xb4   :  { %1100 = vmatpush2.bf16.msra.mxu1 %v10858_v5  ;;  %v10876_v5 = vrot.slane %v82_v12, %v12685_v13  ;;  %v10884_v13 = vrot.slane %v82_v12, %v12690_v1 }
  0xb5   :  { %1572 = vmatprep.subr.bf16.mxu1 %v10455_v7 }
  0xb6   :  { %12979 = vst [vmem:[#allocation35_spill] sm:$0xff] %v10876_v5 }
 0x135   :  { %v560_v6 = vpop.f32.mrf.mxu0 }
 0x136   :  { %v561_v7 = vadd.f32 %v560_v6, %v10872_v3 }
 0x137   :  { %v562_v8 = vpop.f32.mrf.mxu0  ;;  %v601_v62 = vpop.f32.mrf.mxu1 }
 0x138   :  { %v8290_v4 = vmul.f32 -1.442695, %v561_v7  ;;  %v563_v9 = vadd.f32 %v562_v8, %v10876_v5  ;;  %v10888_v7 = vrot.slane %v82_v12, %v12694_v11 }
 0x139   :  { %v564_v2 = vpop.f32.mrf.mxu0  ;;  %v603_v60 = vpop.f32.mrf.mxu1 }
 0x13a   :  { %10198 = vpow2.f32 %v8290_v4  ;;  %v8291_v63 = vmul.f32 -1.442695, %v563_v9  ;;  %v604_v8 = vadd.f32 %v603_v60, %v10884_v13  ;;  %v602_v4 = vadd.f32 %v601_v62, %v10888_v7 }
 0x13b   :  { %v565_v61 = vpop.f32.mrf.mxu0  ;;  %v605_v6 = vpop.f32.mrf.mxu1 }
 0x13c   :  { %10200 = vpow2.f32 %v8291_v63  ;;  %v8292_v9 = vmul.f32 -1.442695, %v604_v8 }
 0x13d   :  { %v606_v2 = vpop.f32.mrf.mxu1  ;;  %10202 = vtanh.f32 %v602_v4 }
 0x13e   :  { %10204 = vpow2.f32 %v8292_v9  ;;  %v10458_v9 = vld [vmem:[#allocation12 + $0xc4] ss:$16 sps:$4 sm:$0xff]  }
 0x147   :  { %v10199_v61 = vpop.eup %10198 }
 0x148   :  { %v611_v63 = vadd.f32 1.0, %v10199_v61  ;;  %v10463_v61 = vld [vmem:[#allocation12 + $0xac] ss:$16 sps:$4 sm:$0xff]  }
 0x149   :  { %v10201_v5 = vpop.eup %10200 }
 0x14a   :  { %10206 = vrcp.f32 %v611_v63  ;;  %v617_v3 = vadd.f32 1.0, %v10201_v5  ;;  %v10203_v1 = vpop.eup %10202  ;;  %v10457_v5 = vld [vmem:[#allocation12 + $0xe8] ss:$16 sps:$4 sm:$0xff]  }
 0x14b   :  { %v10205_v6 = vpop.eup %10204 }
 0x14c   :  { %10208 = vrcp.f32 %v617_v3  ;;  %v624_v12 = vadd.f32 1.0, %v10205_v6  ;;  %v10456_v3 = vld [vmem:[#allocation12 + $0xe0] ss:$16 sps:$4 sm:$0xff]  }
 0x14e   :  { %10210 = vrcp.f32 %v624_v12  ;;  %v10464_v12 = vld [vmem:[#allocation12 + $0xa0] ss:$16 sps:$4 sm:$0xff]  }
 0x157   :  { %v10207_v59 = vpop.eup %10206 }
 0x158   :  { %v628_v2 = vmul.f32 %v10207_v59, %v10203_v1  ;;  %v10460_v59 = vld [vmem:[#allocation12 + $0xc0] ss:$16 sps:$4 sm:$0xff]   ;;  %v10461_v1 = vld [vmem:[#allocation12 + $0xc8] ss:$16 sps:$4 sm:$0xff]  }
 0x159   :  { %v10209_v10 = vpop.eup %10208 }
 0x15a   :  { %v627_v11 = vmul.f32 0.0, %v10209_v10  ;;  %v10459_v10 = vld [vmem:[#allocation12 + $0xcc] ss:$16 sps:$4 sm:$0xff]  }
 0x15b   :  { %v10211_v60 = vpop.eup %10210 }
 0x15c   :  { %v10892_v58 = vadd.f32 %v628_v2, %v627_v11  ;;  %v10462_v11 = vld [vmem:[#allocation12 + $0xa4] ss:$16 sps:$4 sm:$0xff]   ;;  %v10465_v2 = vld [vmem:[#allocation12 + $0xa8] ss:$16 sps:$4 sm:$0xff]  }
 0x15e   :  { %10212 = vtanh.f32 %v10892_v58 }
 0x16b   :  { %v10213_v62 = vpop.eup %10212 }
 0x16c   :  { %v631_v8 = vmul.f32 %v10213_v62, %v10211_v60  ;;  %v10466_v60 = vld [vmem:[#allocation12 + $0x84] ss:$16 sps:$4 sm:$0xff]   ;;  %v10467_v62 = vld [vmem:[#allocation12 + $0x8c] ss:$16 sps:$4 sm:$0xff]  }
 0x16e   :  { %v632_v4 = vpack.c.bf16 %v631_v8, %v631_v8  ;;  %v10468_v8 = vld [vmem:[#allocation12 + $0x80] ss:$16 sps:$4 sm:$0xff]  }
 0x170   :  { %1061 = vmatmul.mubr.bf16.vlgmr.msra.gmra.mxu0 %v632_v4  ;;  %1138 = vst [vmem:[#allocation6 + $0x4] sm:$0xf] %v632_v4  ;;  %1102 = vmatmul.mubr.bf16.vlgmr.msra.gmra.mxu1 %v632_v4  ;;  %v10469_v4 = vld [vmem:[#allocation12 + $0x88] ss:$16 sps:$4 sm:$0xff]  }
 0x171   :  { %1532 = vmatpush1.bf16.msra.mxu0 %v10456_v3  ;;  %1573 = vmatpush1.bf16.msra.mxu1 %v10457_v5  ;;  %v10470_v3 = vld [vmem:[#allocation12 + $0x64] ss:$16 sps:$4 sm:$0xff]   ;;  %v10471_v5 = vld [vmem:[#allocation12 + $0x6c] ss:$16 sps:$4 sm:$0xff]  }
 0x172   :  { %1533 = vmatprep.subr.bf16.mxu0 %v10458_v9  ;;  %1574 = vmatprep.subr.bf16.mxu1 %v10459_v10  ;;  %v10472_v9 = vld [vmem:[#allocation12 + $0x60] ss:$16 sps:$4 sm:$0xff]   ;;  %v10473_v10 = vld [vmem:[#allocation12 + $0x68] ss:$16 sps:$4 sm:$0xff]  }
 0x175   :  { %1534 = vmatpush1.bf16.msra.mxu0 %v10460_v59  ;;  %1575 = vmatpush1.bf16.msra.mxu1 %v10461_v1  ;;  %v10474_v59 = vld [vmem:[#allocation12 + $0x44] ss:$16 sps:$4 sm:$0xff]   ;;  %v10475_v1 = vld [vmem:[#allocation12 + $0x4c] ss:$16 sps:$4 sm:$0xff]  }
 0x176   :  { %1535 = vmatprep.subr.bf16.mxu0 %v10462_v11  ;;  %1576 = vmatprep.subr.bf16.mxu1 %v10463_v61  ;;  %v10476_v11 = vld [vmem:[#allocation12 + $0x40] ss:$16 sps:$4 sm:$0xff]   ;;  %v10477_v61 = vld [vmem:[#allocation12 + $0x48] ss:$16 sps:$4 sm:$0xff]  }
 0x177   :  { %v10895_v63 = vld [vmem:[#allocation6] sm:$0xff] }
 0x178   :  { %v8363_v6 = vcombine.high %v10895_v63, %v10895_v63 }
 0x179   :  { %1536 = vmatpush1.bf16.msra.mxu0 %v10464_v12  ;;  %1577 = vmatpush1.bf16.msra.mxu1 %v10465_v2  ;;  %v10479_v12 = vld [vmem:[#allocation12 + $0x2c] ss:$16 sps:$4 sm:$0xff]   ;;  %v10480_v2 = vld [vmem:[#allocation12 + $0x20] ss:$16 sps:$4 sm:$0xff]  }
 0x17a   :  { %1563 = vmatprep.mubr.bf16.mxu0 %v8363_v6  ;;  %1604 = vmatprep.mubr.bf16.mxu1 %v8363_v6  ;;  %v10478_v6 = vld [vmem:[#allocation12 + $0x24] ss:$16 sps:$4 sm:$0xff]  }
 0x17b   :  { %1537 = vmatprep.subr.bf16.mxu0 %v10466_v60  ;;  %1578 = vmatprep.subr.bf16.mxu1 %v10467_v62  ;;  %v10481_v60 = vld [vmem:[#allocation12 + $0x28] ss:$16 sps:$4 sm:$0xff]   ;;  %v10482_v62 = vld [vmem:[#allocation12 + $0x4] ss:$16 sps:$4 sm:$0xff]  }
 0x17d   :  { %1538 = vmatpush1.bf16.msra.mxu0 %v10468_v8  ;;  %1579 = vmatpush1.bf16.msra.mxu1 %v10469_v4  ;;  %v10483_v8 = vld [vmem:[#allocation12 + $0xc] ss:$16 sps:$4 sm:$0xff]   ;;  %v10484_v4 = vld [vmem:[#allocation12] ss:$16 sps:$4 sm:$0xff]  }
 0x17e   :  { %1539 = vmatprep.subr.bf16.mxu0 %v10470_v3  ;;  %1580 = vmatprep.subr.bf16.mxu1 %v10471_v5  ;;  %v10485_v3 = vld [vmem:[#allocation12 + $0x8] ss:$16 sps:$4 sm:$0xff]   ;;  %v10486_v5 = vld [vmem:[#allocation12 + $0x1e4] ss:$16 sps:$4 sm:$0xff]  }
 0x181   :  { %1540 = vmatpush1.bf16.msra.mxu0 %v10472_v9  ;;  %1581 = vmatpush1.bf16.msra.mxu1 %v10473_v10  ;;  %v10487_v9 = vld [vmem:[#allocation12 + $0x1ec] ss:$16 sps:$4 sm:$0xff]   ;;  %v10488_v10 = vld [vmem:[#allocation12 + $0x1e0] ss:$16 sps:$4 sm:$0xff]  }
 0x182   :  { %1541 = vmatprep.subr.bf16.mxu0 %v10474_v59  ;;  %1582 = vmatprep.subr.bf16.mxu1 %v10475_v1  ;;  %v10489_v59 = vld [vmem:[#allocation12 + $0x1e8] ss:$16 sps:$4 sm:$0xff]   ;;  %v10490_v1 = vld [vmem:[#allocation12 + $0x1c4] ss:$16 sps:$4 sm:$0xff]  }
 0x185   :  { %1542 = vmatpush1.bf16.msra.mxu0 %v10476_v11  ;;  %1583 = vmatpush1.bf16.msra.mxu1 %v10477_v61  ;;  %v10491_v11 = vld [vmem:[#allocation12 + $0x1cc] ss:$16 sps:$4 sm:$0xff]   ;;  %v10492_v61 = vld [vmem:[#allocation12 + $0x1c0] ss:$16 sps:$4 sm:$0xff]  }
 0x186   :  { %1543 = vmatprep.subr.bf16.mxu0 %v10478_v6  ;;  %1584 = vmatprep.subr.bf16.mxu1 %v10479_v12  ;;  %v10493_v6 = vld [vmem:[#allocation12 + $0x1c8] ss:$16 sps:$4 sm:$0xff]   ;;  %v10494_v12 = vld [vmem:[#allocation12 + $0x1a4] ss:$16 sps:$4 sm:$0xff]  }
 0x189   :  { %1544 = vmatpush1.bf16.msra.mxu0 %v10480_v2  ;;  %1585 = vmatpush1.bf16.msra.mxu1 %v10481_v60  ;;  %v10495_v2 = vld [vmem:[#allocation12 + $0x1ac] ss:$16 sps:$4 sm:$0xff]   ;;  %v10496_v60 = vld [vmem:[#allocation12 + $0x1a0] ss:$16 sps:$4 sm:$0xff]  }
 0x18a   :  { %1545 = vmatprep.subr.bf16.mxu0 %v10482_v62  ;;  %1586 = vmatprep.subr.bf16.mxu1 %v10483_v8  ;;  %v10497_v62 = vld [vmem:[#allocation12 + $0x1a8] ss:$16 sps:$4 sm:$0xff]   ;;  %v10498_v8 = vld [vmem:[#allocation12 + $0x184] ss:$16 sps:$4 sm:$0xff]  }
 0x18d   :  { %1546 = vmatpush1.bf16.msra.mxu0 %v10484_v4  ;;  %1587 = vmatpush1.bf16.msra.mxu1 %v10485_v3  ;;  %v10499_v4 = vld [vmem:[#allocation12 + $0x18c] ss:$16 sps:$4 sm:$0xff]   ;;  %v10500_v3 = vld [vmem:[#allocation12 + $0x180] ss:$16 sps:$4 sm:$0xff]  }
 0x18e   :  { %1547 = vmatprep.subr.bf16.mxu0 %v10486_v5  ;;  %1588 = vmatprep.subr.bf16.mxu1 %v10487_v9  ;;  %v10501_v5 = vld [vmem:[#allocation12 + $0x188] ss:$16 sps:$4 sm:$0xff]   ;;  %v10502_v9 = vld [vmem:[#allocation12 + $0x164] ss:$16 sps:$4 sm:$0xff]  }
 0x191   :  { %1548 = vmatpush2.bf16.msra.mxu0 %v10488_v10  ;;  %1589 = vmatpush2.bf16.msra.mxu1 %v10489_v59  ;;  %v10503_v10 = vld [vmem:[#allocation12 + $0x16c] ss:$16 sps:$4 sm:$0xff]   ;;  %v10504_v59 = vld [vmem:[#allocation12 + $0x160] ss:$16 sps:$4 sm:$0xff]  }
 0x192   :  { %1549 = vmatprep.subr.bf16.mxu0 %v10490_v1  ;;  %1590 = vmatprep.subr.bf16.mxu1 %v10491_v11  ;;  %v10505_v1 = vld [vmem:[#allocation12 + $0x168] ss:$16 sps:$4 sm:$0xff]   ;;  %v10506_v11 = vld [vmem:[#allocation12 + $0x144] ss:$16 sps:$4 sm:$0xff]  }
 0x195   :  { %1550 = vmatpush2.bf16.msra.mxu0 %v10492_v61  ;;  %1591 = vmatpush2.bf16.msra.mxu1 %v10493_v6  ;;  %v10507_v61 = vld [vmem:[#allocation12 + $0x14c] ss:$16 sps:$4 sm:$0xff]   ;;  %v10508_v6 = vld [vmem:[#allocation12 + $0x140] ss:$16 sps:$4 sm:$0xff]  }
 0x196   :  { %1551 = vmatprep.subr.bf16.mxu0 %v10494_v12  ;;  %1592 = vmatprep.subr.bf16.mxu1 %v10495_v2  ;;  %v10509_v12 = vld [vmem:[#allocation12 + $0x148] ss:$16 sps:$4 sm:$0xff]   ;;  %v10510_v2 = vld [vmem:[#allocation12 + $0x124] ss:$16 sps:$4 sm:$0xff]  }
 0x199   :  { %1552 = vmatpush2.bf16.msra.mxu0 %v10496_v60  ;;  %1593 = vmatpush2.bf16.msra.mxu1 %v10497_v62  ;;  %v10511_v60 = vld [vmem:[#allocation12 + $0x12c] ss:$16 sps:$4 sm:$0xff]   ;;  %v10512_v62 = vld [vmem:[#allocation12 + $0x120] ss:$16 sps:$4 sm:$0xff]  }
 0x19a   :  { %1553 = vmatprep.subr.bf16.mxu0 %v10498_v8  ;;  %1594 = vmatprep.subr.bf16.mxu1 %v10499_v4  ;;  %v10513_v8 = vld [vmem:[#allocation12 + $0x128] ss:$16 sps:$4 sm:$0xff]   ;;  %v10514_v4 = vld [vmem:[#allocation12 + $0x104] ss:$16 sps:$4 sm:$0xff]  }
 0x19d   :  { %1554 = vmatpush2.bf16.msra.mxu0 %v10500_v3  ;;  %1595 = vmatpush2.bf16.msra.mxu1 %v10501_v5  ;;  %v10515_v3 = vld [vmem:[#allocation12 + $0x10c] ss:$16 sps:$4 sm:$0xff]   ;;  %v10516_v5 = vld [vmem:[#allocation12 + $0x100] ss:$16 sps:$4 sm:$0xff]  }
 0x19e   :  { %1555 = vmatprep.subr.bf16.mxu0 %v10502_v9  ;;  %1596 = vmatprep.subr.bf16.mxu1 %v10503_v10  ;;  %v10517_v9 = vld [vmem:[#allocation12 + $0x108] ss:$16 sps:$4 sm:$0xff]   ;;  %v8362_v10 = vcombine.low %v10895_v63, %v10895_v63 }
 0x1a1   :  { %1556 = vmatpush2.bf16.msra.mxu0 %v10504_v59  ;;  %1597 = vmatpush2.bf16.msra.mxu1 %v10505_v1  ;;  %v10518_v59 = vld [vmem:[#allocation15 + $0xe4] ss:$16 sps:$4 sm:$0xff]   ;;  %v10519_v1 = vld [vmem:[#allocation15 + $0xec] ss:$16 sps:$4 sm:$0xff]  }
 0x1a2   :  { %1557 = vmatprep.subr.bf16.mxu0 %v10506_v11  ;;  %1598 = vmatprep.subr.bf16.mxu1 %v10507_v61  ;;  %v10520_v11 = vld [vmem:[#allocation15 + $0xe0] ss:$16 sps:$4 sm:$0xff]   ;;  %v10521_v61 = vld [vmem:[#allocation15 + $0xe8] ss:$16 sps:$4 sm:$0xff]  }
 0x1a5   :  { %1558 = vmatpush2.bf16.msra.mxu0 %v10508_v6  ;;  %1599 = vmatpush2.bf16.msra.mxu1 %v10509_v12  ;;  %v10522_v6 = vld [vmem:[#allocation15 + $0xc4] ss:$16 sps:$4 sm:$0xff]   ;;  %v10523_v12 = vld [vmem:[#allocation15 + $0xcc] ss:$16 sps:$4 sm:$0xff]  }
 0x1a6   :  { %1559 = vmatprep.subr.bf16.mxu0 %v10510_v2  ;;  %1600 = vmatprep.subr.bf16.mxu1 %v10511_v60  ;;  %v10524_v2 = vld [vmem:[#allocation15 + $0xc0] ss:$16 sps:$4 sm:$0xff]   ;;  %v10525_v60 = vld [vmem:[#allocation15 + $0xc8] ss:$16 sps:$4 sm:$0xff]  }
 0x1a9   :  { %1560 = vmatpush2.bf16.msra.mxu0 %v10512_v62  ;;  %1601 = vmatpush2.bf16.msra.mxu1 %v10513_v8 }
 0x1aa   :  { %1561 = vmatprep.subr.bf16.mxu0 %v10514_v4  ;;  %1602 = vmatprep.subr.bf16.mxu1 %v10515_v3 }
 0x1ad   :  { %1562 = vmatpush2.bf16.msra.mxu0 %v10516_v5  ;;  %1603 = vmatpush2.bf16.msra.mxu1 %v10517_v9 }
 0x1ae   :  { %2033 = vmatprep.subr.bf16.mxu0 %v10518_v59  ;;  %2074 = vmatprep.subr.bf16.mxu1 %v10519_v1 }
 0x1b0   :  { %1564 = vmatmul.mubr.bf16.vlgmr.msra.gmra.mxu0 %v8362_v10  ;;  %1605 = vmatmul.mubr.bf16.vlgmr.msra.gmra.mxu1 %v8362_v10 }
 0x1b1   :  { %2034 = vmatpush1.bf16.msra.mxu0 %v10520_v11  ;;  %2075 = vmatpush1.bf16.msra.mxu1 %v10521_v61 }
 0x1b2   :  { %2035 = vmatprep.subr.bf16.mxu0 %v10522_v6  ;;  %2076 = vmatprep.subr.bf16.mxu1 %v10523_v12  ;;  %v12996_v6 = vld [vmem:[#allocation34_spill] sm:$0xff] }
 0x1b5   :  { %2036 = vmatpush1.bf16.msra.mxu0 %v10524_v2  ;;  %2077 = vmatpush1.bf16.msra.mxu1 %v10525_v60 }
 0x1b6   :  { %2037 = vmatprep.subr.bf16.mxu0 %v10698_v14  ;;  %2078 = vmatprep.subr.bf16.mxu1 %v10700_v15  ;;  %v12980_v14 = vld [vmem:[#allocation22_spill] sm:$0xff]  ;;  %v12981_v15 = vld [vmem:[#allocation23_spill] sm:$0xff] }
 0x1b9   :  { %2038 = vmatpush1.bf16.msra.mxu0 %v10702_v16  ;;  %2079 = vmatpush1.bf16.msra.mxu1 %v10704_v17  ;;  %v12982_v16 = vld [vmem:[#allocation24_spill] sm:$0xff]  ;;  %v12983_v17 = vld [vmem:[#allocation25_spill] sm:$0xff] }
 0x1ba   :  { %2039 = vmatprep.subr.bf16.mxu0 %v10710_v18  ;;  %2080 = vmatprep.subr.bf16.mxu1 %v10712_v0  ;;  %v12984_v18 = vld [vmem:[#allocation26_spill] sm:$0xff]  ;;  %v12985_v0 = vld [vmem:[#allocation27_spill] sm:$0xff] }
 0x1bd   :  { %2040 = vmatpush1.bf16.msra.mxu0 %v10714_v19  ;;  %2081 = vmatpush1.bf16.msra.mxu1 %v10716_v20  ;;  %v12986_v19 = vld [vmem:[#allocation28_spill] sm:$0xff]  ;;  %v12987_v20 = vld [vmem:[#allocation29_spill] sm:$0xff] }
 0x1be   :  { %2041 = vmatprep.subr.bf16.mxu0 %v10722_v21  ;;  %2082 = vmatprep.subr.bf16.mxu1 %v10724_v22  ;;  %v12988_v21 = vld [vmem:[#allocation30_spill] sm:$0xff]  ;;  %v12989_v22 = vld [vmem:[#allocation31_spill] sm:$0xff] }
 0x1c1   :  { %2042 = vmatpush1.bf16.msra.mxu0 %v10726_v23  ;;  %2083 = vmatpush1.bf16.msra.mxu1 %v10728_v24  ;;  %v12990_v23 = vld [vmem:[#allocation32_spill] sm:$0xff] }
 0x1c2   :  { %2043 = vmatprep.subr.bf16.mxu0 %v10734_v25  ;;  %2084 = vmatprep.subr.bf16.mxu1 %v10736_v26  ;;  %v10957_v24 = vld [vmem:[#allocation12 + $0xe4] ss:$16 sps:$4 sm:$0xff]   ;;  %v10959_v25 = vld [vmem:[#allocation12 + $0xec] ss:$16 sps:$4 sm:$0xff]   ;;  %v104_v26 = vld [vmem:[%s12673_s4] sm:$0xf] }
 0x1c3   :  { %s10643_s4 = smov [#allocation17]  }
 0x1c4   :  { %s8210_s15 = sshll.u32 %s10643_s4, 4  ;;  %s8211_s15 = int_to_ptr.vmem [resolvable:$true] %s8210_s15 }
 0x1c5   :  { %2044 = vmatpush1.bf16.msra.mxu0 %v10738_v27  ;;  %2085 = vmatpush1.bf16.msra.mxu1 %v10740_v28  ;;  %v2142_v27 = vld [vmem:[#allocation9 + $0x8] sm:$0xf]  ;;  %v12991_v28 = vld [vmem:[#allocation33_spill] sm:$0xff]  ;;  %s10606_s16 = scalar_lea.vmem %s8211_s15, 512  ;;  %p10611_p7 = scmp.lt.s32.totalorder %s8211_s15, %s8211_s15 }
 0x1c6   :  { %2045 = vmatprep.subr.bf16.mxu0 %v10746_v29  ;;  %2086 = vmatprep.subr.bf16.mxu1 %v10748_v30  ;;  %2143 = vst [vmem:[#allocation6] sm:$0xf] %v2142_v27  ;;  %v12992_v29 = vsub.s32 0, %v12991_v28  ;;  %p10607_p6 = scmp.ne.s32.totalorder %s8211_s15, %s10606_s16  ;;  %p10612_p8 = scmp.lt.s32.totalorder %s10606_s16, %s10606_s16 }
 0x1c8   :  { %v10968_v30 = vrot.slane %v104_v26, %v12992_v29  ;;  %p10613_p9 = por %p10612_p8, %p10611_p7 }
 0x1c9   :  { %2046 = vmatpush1.bf16.msra.mxu0 %v10750_v31  ;;  %2087 = vmatpush1.bf16.msra.mxu1 %v10752_v32  ;;  %v12993_v31 = vsub.s32 1, %v12991_v28 }
 0x1ca   :  { %2047 = vmatprep.subr.bf16.mxu0 %v10758_v33  ;;  %2088 = vmatprep.subr.bf16.mxu1 %v10760_v34  ;;  %p10614_p10 = pnand %p10613_p9, %p10607_p6 }
 0x1cb   :  { %v10972_v32 = vrot.slane %v104_v26, %v12993_v31 }
 0x1cd   :  { %2048 = vmatpush1.bf16.msra.mxu0 %v10762_v35  ;;  %2089 = vmatpush1.bf16.msra.mxu1 %v10764_v36 }
 0x1ce   :  { %2049 = vmatprep.subr.bf16.mxu0 %v10770_v37  ;;  %2090 = vmatprep.subr.bf16.mxu1 %v10772_v38 }
 0x1d1   :  { %2050 = vmatpush2.bf16.msra.mxu0 %v10774_v39  ;;  %2091 = vmatpush2.bf16.msra.mxu1 %v10776_v40 }
 0x1d2   :  { %2051 = vmatprep.subr.bf16.mxu0 %v10782_v41  ;;  %2092 = vmatprep.subr.bf16.mxu1 %v10784_v42 }
 0x1d5   :  { %2052 = vmatpush2.bf16.msra.mxu0 %v10786_v43  ;;  %2093 = vmatpush2.bf16.msra.mxu1 %v10788_v44 }
 0x1d6   :  { %2053 = vmatprep.subr.bf16.mxu0 %v10794_v45  ;;  %2094 = vmatprep.subr.bf16.mxu1 %v10796_v46  ;;  %v12994_v45 = vsub.s32 3, %v12991_v28 }
 0x1d8   :  { %v10978_v46 = vrot.slane %v104_v26, %v12994_v45 }
 0x1d9   :  { %2054 = vmatpush2.bf16.msra.mxu0 %v10798_v47  ;;  %2095 = vmatpush2.bf16.msra.mxu1 %v10800_v48  ;;  %v12995_v48 = vsub.s32 2, %v12991_v28 }
 0x1da   :  { %2055 = vmatprep.subr.bf16.mxu0 %v10806_v49  ;;  %2096 = vmatprep.subr.bf16.mxu1 %v10808_v50 }
 0x1db   :  { %v10983_v49 = vrot.slane %v104_v26, %v12995_v48  ;;  %v11007_v48 = vld [vmem:[#allocation12 + $0xcc] ss:$16 sps:$4 sm:$0xff]  }
 0x1dd   :  { %2056 = vmatpush2.bf16.msra.mxu0 %v10810_v51  ;;  %2097 = vmatpush2.bf16.msra.mxu1 %v10812_v52 }
 0x1de   :  { %2057 = vmatprep.subr.bf16.mxu0 %v10818_v53  ;;  %2098 = vmatprep.subr.bf16.mxu1 %v10820_v54 }
 0x1e1   :  { %2058 = vmatpush2.bf16.msra.mxu0 %v10822_v55  ;;  %2099 = vmatpush2.bf16.msra.mxu1 %v10824_v56 }
 0x1e2   :  { %2059 = vmatprep.subr.bf16.mxu0 %v10828_v57  ;;  %2100 = vmatprep.subr.bf16.mxu1 %v12980_v14 }
 0x1e5   :  { %2060 = vmatpush2.bf16.msra.mxu0 %v12981_v15  ;;  %2101 = vmatpush2.bf16.msra.mxu1 %v12982_v16  ;;  %v12997_v15 = vld [vmem:[#allocation35_spill] sm:$0xff] }
 0x1e6   :  { %2061 = vmatprep.subr.bf16.mxu0 %v12983_v17  ;;  %2102 = vmatprep.subr.bf16.mxu1 %v12984_v18 }
 0x1e9   :  { %2062 = vmatpush2.bf16.msra.mxu0 %v12985_v0  ;;  %2103 = vmatpush2.bf16.msra.mxu1 %v12986_v19 }
 0x1ea   :  { %2063 = vmatprep.subr.bf16.mxu0 %v12987_v20  ;;  %2104 = vmatprep.subr.bf16.mxu1 %v12988_v21 }
 0x1ed   :  { %2064 = vmatpush2.bf16.msra.mxu0 %v12989_v22  ;;  %2105 = vmatpush2.bf16.msra.mxu1 %v12990_v23 }
 0x1ee   :  { %2537 = vmatprep.subr.bf16.mxu0 %v10957_v24  ;;  %2578 = vmatprep.subr.bf16.mxu1 %v10959_v25 }
 0x230   :  { %v1062_v33 = vpop.f32.mrf.mxu0  ;;  %v1103_v34 = vpop.f32.mrf.mxu1 }
 0x231   :  { %v1063_v35 = vadd.f32 %v1062_v33, %v10968_v30  ;;  %v1104_v52 = vadd.f32 %v1103_v34, %v10983_v49 }
 0x232   :  { %v1064_v36 = vpop.f32.mrf.mxu0  ;;  %v1105_v37 = vpop.f32.mrf.mxu1 }
 0x233   :  { %v8359_v38 = vmul.f32 -1.442695, %v1063_v35  ;;  %v1065_v39 = vadd.f32 %v1064_v36, %v10972_v32  ;;  %v1106_v47 = vadd.f32 %v1105_v37, %v10978_v46 }
 0x234   :  { %v1066_v40 = vpop.f32.mrf.mxu0  ;;  %v1107_v41 = vpop.f32.mrf.mxu1 }
 0x235   :  { %10214 = vpow2.f32 %v8359_v38  ;;  %v8360_v42 = vmul.f32 -1.442695, %v1065_v39  ;;  %v8361_v50 = vmul.f32 -1.442695, %v1106_v47  ;;  %v11005_v47 = vld [vmem:[#allocation12 + $0xc4] ss:$16 sps:$4 sm:$0xff]  }
 0x236   :  { %v1067_v43 = vpop.f32.mrf.mxu0  ;;  %v1108_v44 = vpop.f32.mrf.mxu1 }
 0x237   :  { %10216 = vpow2.f32 %v8360_v42  ;;  %v11001_v43 = vld [vmem:[#allocation12 + $0xe0] ss:$16 sps:$4 sm:$0xff]   ;;  %v11003_v44 = vld [vmem:[#allocation12 + $0xe8] ss:$16 sps:$4 sm:$0xff]  }
 0x238   :  { %10218 = vpow2.f32 %v8361_v50  ;;  %v11013_v50 = vld [vmem:[#allocation12 + $0xc8] ss:$16 sps:$4 sm:$0xff]  }
 0x242   :  { %v10215_v51 = vpop.eup %10214 }
 0x243   :  { %v1113_v53 = vadd.f32 1.0, %v10215_v51  ;;  %v11017_v51 = vld [vmem:[#allocation12 + $0xa4] ss:$16 sps:$4 sm:$0xff]  }
 0x244   :  { %v10217_v54 = vpop.eup %10216 }
 0x245   :  { %10220 = vrcp.f32 %v1113_v53  ;;  %v1119_v55 = vadd.f32 1.0, %v10217_v54  ;;  %v10219_v56 = vpop.eup %10218  ;;  %v11023_v53 = vld [vmem:[#allocation12 + $0xa0] ss:$16 sps:$4 sm:$0xff]   ;;  %v11025_v54 = vld [vmem:[#allocation12 + $0xa8] ss:$16 sps:$4 sm:$0xff]  }
 0x246   :  { %10222 = vtanh.f32 %v1104_v52  ;;  %v1126_v8 = vadd.f32 1.0, %v10219_v56  ;;  %v11019_v52 = vld [vmem:[#allocation12 + $0xac] ss:$16 sps:$4 sm:$0xff]   ;;  %v11031_v56 = vld [vmem:[#allocation12 + $0x84] ss:$16 sps:$4 sm:$0xff]  }
 0x247   :  { %10224 = vrcp.f32 %v1119_v55 }
 0x248   :  { %10226 = vrcp.f32 %v1126_v8  ;;  %v11041_v8 = vld [vmem:[#allocation12 + $0x88] ss:$16 sps:$4 sm:$0xff]  }
 0x252   :  { %v10221_v57 = vpop.eup %10220 }
 0x253   :  { %v10223_v63 = vpop.eup %10222 }
 0x254   :  { %v10225_v62 = vpop.eup %10224  ;;  %v1130_v3 = vmul.f32 %v10223_v63, %v10221_v57  ;;  %v11033_v57 = vld [vmem:[#allocation12 + $0x8c] ss:$16 sps:$4 sm:$0xff]  }
 0x255   :  { %v1129_v4 = vmul.f32 0.0, %v10225_v62  ;;  %v10227_v9 = vpop.eup %10226  ;;  %v11039_v62 = vld [vmem:[#allocation12 + $0x80] ss:$16 sps:$4 sm:$0xff]  }
 0x257   :  { %v10986_v5 = vadd.f32 %v1130_v3, %v1129_v4  ;;  %v11043_v4 = vld [vmem:[#allocation12 + $0x64] ss:$16 sps:$4 sm:$0xff]   ;;  %v11045_v3 = vld [vmem:[#allocation12 + $0x6c] ss:$16 sps:$4 sm:$0xff]  }
 0x259   :  { %10228 = vtanh.f32 %v10986_v5 }
 0x266   :  { %v10229_v10 = vpop.eup %10228 }
 0x267   :  { %v10989_v59 = vmul.f32 %v10229_v10, %v10227_v9  ;;  %v11051_v9 = vld [vmem:[#allocation12 + $0x60] ss:$16 sps:$4 sm:$0xff]   ;;  %v11053_v10 = vld [vmem:[#allocation12 + $0x68] ss:$16 sps:$4 sm:$0xff]  }
 0x269   :  { %v9394_v1 = vpack.c.bf16 %v10989_v59, %v10989_v59 }
 0x26b   :  { %2065 = vmatprep.mubr.bf16.mxu0 %v9394_v1  ;;  %2106 = vmatprep.mubr.bf16.mxu1 %v9394_v1  ;;  %v11057_v1 = vld [vmem:[#allocation12 + $0x44] ss:$16 sps:$4 sm:$0xff]  }
 0x270   :  { %v1565_v11 = vpop.f32.mrf.mxu0  ;;  %v1606_v61 = vpop.f32.mrf.mxu1 }
 0x271   :  { %v1566_v12 = vadd.f32 %v1565_v11, %v12996_v6  ;;  %v1607_v26 = vadd.f32 %v1606_v61, %v10888_v7  ;;  %v11059_v11 = vld [vmem:[#allocation12 + $0x4c] ss:$16 sps:$4 sm:$0xff]   ;;  %v11063_v61 = vld [vmem:[#allocation12 + $0x40] ss:$16 sps:$4 sm:$0xff]  }
 0x272   :  { %v1567_v2 = vpop.f32.mrf.mxu0  ;;  %v1608_v60 = vpop.f32.mrf.mxu1 }
 0x273   :  { %v8428_v14 = vmul.f32 -1.442695, %v1566_v12  ;;  %v1568_v16 = vadd.f32 %v1567_v2, %v12997_v15  ;;  %v1609_v21 = vadd.f32 %v1608_v60, %v10884_v13  ;;  %v11065_v12 = vld [vmem:[#allocation12 + $0x48] ss:$16 sps:$4 sm:$0xff]   ;;  %v11069_v2 = vld [vmem:[#allocation12 + $0x24] ss:$16 sps:$4 sm:$0xff]  }
 0x274   :  { %v1569_v17 = vpop.f32.mrf.mxu0  ;;  %v1610_v18 = vpop.f32.mrf.mxu1  ;;  %v11071_v60 = vld [vmem:[#allocation12 + $0x2c] ss:$16 sps:$4 sm:$0xff]  }
 0x275   :  { %10230 = vpow2.f32 %v8428_v14  ;;  %v8429_v0 = vmul.f32 -1.442695, %v1568_v16  ;;  %v8430_v22 = vmul.f32 -1.442695, %v1609_v21  ;;  %v11075_v14 = vld [vmem:[#allocation12 + $0x20] ss:$16 sps:$4 sm:$0xff]  }
 0x276   :  { %v1570_v19 = vpop.f32.mrf.mxu0  ;;  %v1611_v20 = vpop.f32.mrf.mxu1  ;;  %v11077_v16 = vld [vmem:[#allocation12 + $0x28] ss:$16 sps:$4 sm:$0xff]   ;;  %v11081_v17 = vld [vmem:[#allocation12 + $0x4] ss:$16 sps:$4 sm:$0xff]   ;;  %v11083_v18 = vld [vmem:[#allocation12 + $0xc] ss:$16 sps:$4 sm:$0xff]  }
 0x277   :  { %10232 = vpow2.f32 %v8429_v0  ;;  %v11087_v0 = vld [vmem:[#allocation12] ss:$16 sps:$4 sm:$0xff]   ;;  %v11089_v19 = vld [vmem:[#allocation12 + $0x8] ss:$16 sps:$4 sm:$0xff]   ;;  %v11093_v20 = vld [vmem:[#allocation12 + $0x1e4] ss:$16 sps:$4 sm:$0xff]  }
 0x278   :  { %10234 = vpow2.f32 %v8430_v22  ;;  %v11095_v21 = vld [vmem:[#allocation12 + $0x1ec] ss:$16 sps:$4 sm:$0xff]   ;;  %v11099_v22 = vld [vmem:[#allocation12 + $0x1e0] ss:$16 sps:$4 sm:$0xff]  }
 0x282   :  { %v10231_v23 = vpop.eup %10230 }
 0x283   :  { %v1616_v27 = vadd.f32 1.0, %v10231_v23  ;;  %v11101_v23 = vld [vmem:[#allocation12 + $0x1e8] ss:$16 sps:$4 sm:$0xff]  }
 0x284   :  { %v10233_v28 = vpop.eup %10232 }
 0x285   :  { %10236 = vrcp.f32 %v1616_v27  ;;  %v1622_v29 = vadd.f32 1.0, %v10233_v28  ;;  %v10235_v31 = vpop.eup %10234  ;;  %v11107_v27 = vld [vmem:[#allocation12 + $0x1cc] ss:$16 sps:$4 sm:$0xff]   ;;  %v11111_v28 = vld [vmem:[#allocation12 + $0x1c0] ss:$16 sps:$4 sm:$0xff]  }
 0x286   :  { %10238 = vtanh.f32 %v1607_v26  ;;  %v1629_v36 = vadd.f32 1.0, %v10235_v31  ;;  %v11105_v26 = vld [vmem:[#allocation12 + $0x1c4] ss:$16 sps:$4 sm:$0xff]   ;;  %12998 = vst [vmem:[#allocation22_spill] sm:$0xff] %v11111_v28 }
 0x287   :  { %10240 = vrcp.f32 %v1622_v29  ;;  %v11113_v29 = vld [vmem:[#allocation12 + $0x1c8] ss:$16 sps:$4 sm:$0xff]   ;;  %v11117_v31 = vld [vmem:[#allocation12 + $0x1a4] ss:$16 sps:$4 sm:$0xff]  }
 0x288   :  { %10242 = vrcp.f32 %v1629_v36  ;;  %12999 = vst [vmem:[#allocation23_spill] sm:$0xff] %v11113_v29  ;;  %13000 = vst [vmem:[#allocation24_spill] sm:$0xff] %v11117_v31  ;;  %v11129_v36 = vld [vmem:[#allocation12 + $0x184] ss:$16 sps:$4 sm:$0xff]  }
 0x289   :  { %13004 = vst [vmem:[#allocation28_spill] sm:$0xff] %v11129_v36 }
 0x292   :  { %v10237_v33 = vpop.eup %10236 }
 0x293   :  { %v10239_v34 = vpop.eup %10238 }
 0x294   :  { %v10241_v35 = vpop.eup %10240  ;;  %v1633_v37 = vmul.f32 %v10239_v34, %v10237_v33  ;;  %v11119_v33 = vld [vmem:[#allocation12 + $0x1ac] ss:$16 sps:$4 sm:$0xff]   ;;  %v11123_v34 = vld [vmem:[#allocation12 + $0x1a0] ss:$16 sps:$4 sm:$0xff]  }
 0x295   :  { %v1632_v38 = vmul.f32 %v10241_v35, %v10892_v58  ;;  %v10243_v40 = vpop.eup %10242  ;;  %v11011_v58 = vld [vmem:[#allocation12 + $0xc0] ss:$16 sps:$4 sm:$0xff]   ;;  %13001 = vst [vmem:[#allocation25_spill] sm:$0xff] %v11119_v33  ;;  %13002 = vst [vmem:[#allocation26_spill] sm:$0xff] %v11123_v34  ;;  %v11125_v35 = vld [vmem:[#allocation12 + $0x1a8] ss:$16 sps:$4 sm:$0xff]  }
 0x296   :  { %13003 = vst [vmem:[#allocation27_spill] sm:$0xff] %v11125_v35 }
 0x297   :  { %v10998_v39 = vadd.f32 %v1633_v37, %v1632_v38  ;;  %v11131_v37 = vld [vmem:[#allocation12 + $0x18c] ss:$16 sps:$4 sm:$0xff]   ;;  %v11135_v38 = vld [vmem:[#allocation12 + $0x180] ss:$16 sps:$4 sm:$0xff]  }
 0x298   :  { %13005 = vst [vmem:[#allocation29_spill] sm:$0xff] %v11131_v37  ;;  %13006 = vst [vmem:[#allocation30_spill] sm:$0xff] %v11135_v38 }
 0x299   :  { %10244 = vtanh.f32 %v10998_v39 }
 0x2a6   :  { %v10245_v41 = vpop.eup %10244 }
 0x2a7   :  { %v1636_v42 = vmul.f32 %v10245_v41, %v10243_v40  ;;  %v11137_v40 = vld [vmem:[#allocation12 + $0x188] ss:$16 sps:$4 sm:$0xff]   ;;  %v11141_v41 = vld [vmem:[#allocation12 + $0x164] ss:$16 sps:$4 sm:$0xff]  }
 0x2a8   :  { %13007 = vst [vmem:[#allocation31_spill] sm:$0xff] %v11137_v40  ;;  %13008 = vst [vmem:[#allocation32_spill] sm:$0xff] %v11141_v41 }
 0x2a9   :  { %v1637_v45 = vpack.c.bf16 %v1636_v42, %v1636_v42  ;;  %v11143_v42 = vld [vmem:[#allocation12 + $0x16c] ss:$16 sps:$4 sm:$0xff]  }
 0x2aa   :  { %13009 = vst [vmem:[#allocation33_spill] sm:$0xff] %v11143_v42 }
 0x2ab   :  { %2066 = vmatmul.mubr.bf16.vlgmr.msra.gmra.mxu0 %v1637_v45  ;;  %2144 = vst [vmem:[#allocation6 + $0x4] sm:$0xf] %v1637_v45  ;;  %2107 = vmatmul.mubr.bf16.vlgmr.msra.gmra.mxu1 %v1637_v45  ;;  %v11147_v45 = vld [vmem:[#allocation12 + $0x160] ss:$16 sps:$4 sm:$0xff]  }
 0x2ac   :  { %2538 = vmatpush1.bf16.msra.mxu0 %v11001_v43  ;;  %2579 = vmatpush1.bf16.msra.mxu1 %v11003_v44  ;;  %13010 = vst [vmem:[#allocation34_spill] sm:$0xff] %v11147_v45 }
 0x2ad   :  { %2539 = vmatprep.subr.bf16.mxu0 %v11005_v47  ;;  %2580 = vmatprep.subr.bf16.mxu1 %v11007_v48 }
 0x2b0   :  { %2540 = vmatpush1.bf16.msra.mxu0 %v11011_v58  ;;  %2581 = vmatpush1.bf16.msra.mxu1 %v11013_v50 }
 0x2b1   :  { %2541 = vmatprep.subr.bf16.mxu0 %v11017_v51  ;;  %2582 = vmatprep.subr.bf16.mxu1 %v11019_v52 }
 0x2b2   :  { %v11029_v55 = vld [vmem:[#allocation6] sm:$0xff] }
 0x2b3   :  { %v8501_v63 = vcombine.high %v11029_v55, %v11029_v55 }
 0x2b4   :  { %2542 = vmatpush1.bf16.msra.mxu0 %v11023_v53  ;;  %2583 = vmatpush1.bf16.msra.mxu1 %v11025_v54 }
 0x2b5   :  { %2569 = vmatprep.mubr.bf16.mxu0 %v8501_v63  ;;  %2610 = vmatprep.mubr.bf16.mxu1 %v8501_v63  ;;  %v11149_v63 = vld [vmem:[#allocation12 + $0x168] ss:$16 sps:$4 sm:$0xff]  }
 0x2b6   :  { %2543 = vmatprep.subr.bf16.mxu0 %v11031_v56  ;;  %2584 = vmatprep.subr.bf16.mxu1 %v11033_v57  ;;  %13011 = vst [vmem:[#allocation35_spill] sm:$0xff] %v11149_v63 }
 0x2b8   :  { %2544 = vmatpush1.bf16.msra.mxu0 %v11039_v62  ;;  %2585 = vmatpush1.bf16.msra.mxu1 %v11041_v8 }
 0x2b9   :  { %2545 = vmatprep.subr.bf16.mxu0 %v11043_v4  ;;  %2586 = vmatprep.subr.bf16.mxu1 %v11045_v3 }
 0x2bc   :  { %2546 = vmatpush1.bf16.msra.mxu0 %v11051_v9  ;;  %2587 = vmatpush1.bf16.msra.mxu1 %v11053_v10 }
 0x2bd   :  { %2547 = vmatprep.subr.bf16.mxu0 %v11057_v1  ;;  %2588 = vmatprep.subr.bf16.mxu1 %v11059_v11 }
 0x2c0   :  { %2548 = vmatpush1.bf16.msra.mxu0 %v11063_v61  ;;  %2589 = vmatpush1.bf16.msra.mxu1 %v11065_v12 }
 0x2c1   :  { %2549 = vmatprep.subr.bf16.mxu0 %v11069_v2  ;;  %2590 = vmatprep.subr.bf16.mxu1 %v11071_v60 }
 0x2c4   :  { %2550 = vmatpush1.bf16.msra.mxu0 %v11075_v14  ;;  %2591 = vmatpush1.bf16.msra.mxu1 %v11077_v16 }
 0x2c5   :  { %2551 = vmatprep.subr.bf16.mxu0 %v11081_v17  ;;  %2592 = vmatprep.subr.bf16.mxu1 %v11083_v18 }
 0x2c8   :  { %2552 = vmatpush1.bf16.msra.mxu0 %v11087_v0  ;;  %2593 = vmatpush1.bf16.msra.mxu1 %v11089_v19 }
 0x2c9   :  { %2553 = vmatprep.subr.bf16.mxu0 %v11093_v20  ;;  %2594 = vmatprep.subr.bf16.mxu1 %v11095_v21 }
 0x2cc   :  { %2554 = vmatpush2.bf16.msra.mxu0 %v11099_v22  ;;  %2595 = vmatpush2.bf16.msra.mxu1 %v11101_v23 }
 0x2cd   :  { %2555 = vmatprep.subr.bf16.mxu0 %v11105_v26  ;;  %2596 = vmatprep.subr.bf16.mxu1 %v11107_v27 }
 0x2d0   :  { %2556 = vmatpush2.bf16.msra.mxu0 %v11111_v28  ;;  %2597 = vmatpush2.bf16.msra.mxu1 %v11113_v29 }
 0x2d1   :  { %2557 = vmatprep.subr.bf16.mxu0 %v11117_v31  ;;  %2598 = vmatprep.subr.bf16.mxu1 %v11119_v33 }
 0x2d4   :  { %2558 = vmatpush2.bf16.msra.mxu0 %v11123_v34  ;;  %2599 = vmatpush2.bf16.msra.mxu1 %v11125_v35  ;;  %v11153_v35 = vld [vmem:[#allocation12 + $0x144] ss:$16 sps:$4 sm:$0xff]  }
 0x2d5   :  { %2559 = vmatprep.subr.bf16.mxu0 %v11129_v36  ;;  %2600 = vmatprep.subr.bf16.mxu1 %v11131_v37  ;;  %13012 = vst [vmem:[#allocation36_spill] sm:$0xff] %v11153_v35  ;;  %v11155_v36 = vld [vmem:[#allocation12 + $0x14c] ss:$16 sps:$4 sm:$0xff]   ;;  %v11159_v37 = vld [vmem:[#allocation12 + $0x140] ss:$16 sps:$4 sm:$0xff]  }
 0x2d6   :  { %13013 = vst [vmem:[#allocation37_spill] sm:$0xff] %v11155_v36  ;;  %13014 = vst [vmem:[#allocation38_spill] sm:$0xff] %v11159_v37 }
 0x2d8   :  { %2560 = vmatpush2.bf16.msra.mxu0 %v11135_v38  ;;  %2601 = vmatpush2.bf16.msra.mxu1 %v11137_v40  ;;  %v11161_v38 = vld [vmem:[#allocation12 + $0x148] ss:$16 sps:$4 sm:$0xff]   ;;  %v11165_v40 = vld [vmem:[#allocation12 + $0x124] ss:$16 sps:$4 sm:$0xff]  }
 0x2d9   :  { %2561 = vmatprep.subr.bf16.mxu0 %v11141_v41  ;;  %2602 = vmatprep.subr.bf16.mxu1 %v11143_v42  ;;  %13015 = vst [vmem:[#allocation39_spill] sm:$0xff] %v11161_v38  ;;  %13016 = vst [vmem:[#allocation40_spill] sm:$0xff] %v11165_v40  ;;  %v11167_v41 = vld [vmem:[#allocation12 + $0x12c] ss:$16 sps:$4 sm:$0xff]   ;;  %v11171_v42 = vld [vmem:[#allocation12 + $0x120] ss:$16 sps:$4 sm:$0xff]  }
 0x2da   :  { %13017 = vst [vmem:[#allocation41_spill] sm:$0xff] %v11167_v41  ;;  %13018 = vst [vmem:[#allocation42_spill] sm:$0xff] %v11171_v42 }
 0x2dc   :  { %2562 = vmatpush2.bf16.msra.mxu0 %v11147_v45  ;;  %2603 = vmatpush2.bf16.msra.mxu1 %v11149_v63  ;;  %v11173_v45 = vld [vmem:[#allocation12 + $0x128] ss:$16 sps:$4 sm:$0xff]   ;;  %v11177_v63 = vld [vmem:[#allocation12 + $0x104] ss:$16 sps:$4 sm:$0xff]  }
 0x2dd   :  { %2563 = vmatprep.subr.bf16.mxu0 %v11153_v35  ;;  %2604 = vmatprep.subr.bf16.mxu1 %v11155_v36  ;;  %13019 = vst [vmem:[#allocation43_spill] sm:$0xff] %v11173_v45  ;;  %13020 = vst [vmem:[#allocation44_spill] sm:$0xff] %v11177_v63  ;;  %v11179_v35 = vld [vmem:[#allocation12 + $0x10c] ss:$16 sps:$4 sm:$0xff]   ;;  %v11183_v36 = vld [vmem:[#allocation12 + $0x100] ss:$16 sps:$4 sm:$0xff]  }
 0x2de   :  { %13021 = vst [vmem:[#allocation45_spill] sm:$0xff] %v11179_v35  ;;  %13022 = vst [vmem:[#allocation46_spill] sm:$0xff] %v11183_v36 }
 0x2e0   :  { %2564 = vmatpush2.bf16.msra.mxu0 %v11159_v37  ;;  %2605 = vmatpush2.bf16.msra.mxu1 %v11161_v38  ;;  %v11185_v37 = vld [vmem:[#allocation12 + $0x108] ss:$16 sps:$4 sm:$0xff]   ;;  %v11199_v38 = vld [vmem:[#allocation15 + $0xec] ss:$16 sps:$4 sm:$0xff]  }
 0x2e1   :  { %2565 = vmatprep.subr.bf16.mxu0 %v11165_v40  ;;  %2606 = vmatprep.subr.bf16.mxu1 %v11167_v41  ;;  %13023 = vst [vmem:[#allocation47_spill] sm:$0xff] %v11185_v37  ;;  %v8500_v41 = vcombine.low %v11029_v55, %v11029_v55  ;;  %v11197_v40 = vld [vmem:[#allocation15 + $0xe8] ss:$16 sps:$4 sm:$0xff]   ;;  %13027 = vst [vmem:[#allocation51_spill] sm:$0xff] %v11199_v38  ;;  %v11207_v55 = vld [vmem:[#allocation15 + $0xc4] ss:$16 sps:$4 sm:$0xff]  }
 0x2e2   :  { %13026 = vst [vmem:[#allocation50_spill] sm:$0xff] %v11197_v40  ;;  %13029 = vst [vmem:[#allocation53_spill] sm:$0xff] %v11207_v55 }
 0x2e4   :  { %2566 = vmatpush2.bf16.msra.mxu0 %v11171_v42  ;;  %2607 = vmatpush2.bf16.msra.mxu1 %v11173_v45  ;;  %v11193_v42 = vld [vmem:[#allocation15 + $0xe0] ss:$16 sps:$4 sm:$0xff]   ;;  %v11195_v45 = vld [vmem:[#allocation15 + $0xe4] ss:$16 sps:$4 sm:$0xff]  }
 0x2e5   :  { %2567 = vmatprep.subr.bf16.mxu0 %v11177_v63  ;;  %2608 = vmatprep.subr.bf16.mxu1 %v11179_v35  ;;  %13024 = vst [vmem:[#allocation48_spill] sm:$0xff] %v11193_v42  ;;  %13025 = vst [vmem:[#allocation49_spill] sm:$0xff] %v11195_v45  ;;  %v11335_v35 = vld [vmem:[#allocation15 + $0x164] ss:$16 sps:$4 sm:$0xff]   ;;  %v11348_v63 = vld [vmem:[#allocation15 + $0x14c] ss:$16 sps:$4 sm:$0xff]  }
 0x2e6   :  { %13072 = vst [vmem:[#allocation96_spill] sm:$0xff] %v11335_v35  ;;  %13077 = vst [vmem:[#allocation101_spill] sm:$0xff] %v11348_v63 }
 0x2e8   :  { %2568 = vmatpush2.bf16.msra.mxu0 %v11183_v36  ;;  %2609 = vmatpush2.bf16.msra.mxu1 %v11185_v37  ;;  %v11205_v37 = vld [vmem:[#allocation15 + $0xc0] ss:$16 sps:$4 sm:$0xff]   ;;  %v11211_v36 = vld [vmem:[#allocation15 + $0xcc] ss:$16 sps:$4 sm:$0xff]  }
 0x2e9   :  { %3039 = vmatprep.subr.bf16.mxu0 %v11195_v45  ;;  %3080 = vmatprep.subr.bf16.mxu1 %v11199_v38  ;;  %13028 = vst [vmem:[#allocation52_spill] sm:$0xff] %v11205_v37  ;;  %13031 = vst [vmem:[#allocation55_spill] sm:$0xff] %v11211_v36  ;;  %v11217_v38 = vld [vmem:[#allocation15 + $0xa4] ss:$16 sps:$4 sm:$0xff]   ;;  %v11223_v45 = vld [vmem:[#allocation15 + $0xa8] ss:$16 sps:$4 sm:$0xff]  }
 0x2ea   :  { %13032 = vst [vmem:[#allocation56_spill] sm:$0xff] %v11217_v38  ;;  %13035 = vst [vmem:[#allocation59_spill] sm:$0xff] %v11223_v45 }
 0x2eb   :  { %2570 = vmatmul.mubr.bf16.vlgmr.msra.gmra.mxu0 %v8500_v41  ;;  %2611 = vmatmul.mubr.bf16.vlgmr.msra.gmra.mxu1 %v8500_v41  ;;  %v11209_v41 = vld [vmem:[#allocation15 + $0xc8] ss:$16 sps:$4 sm:$0xff]  }
 0x2ec   :  { %3040 = vmatpush1.bf16.msra.mxu0 %v11193_v42  ;;  %3081 = vmatpush1.bf16.msra.mxu1 %v11197_v40  ;;  %13030 = vst [vmem:[#allocation54_spill] sm:$0xff] %v11209_v41  ;;  %v11219_v42 = vld [vmem:[#allocation15 + $0xac] ss:$16 sps:$4 sm:$0xff]   ;;  %v11221_v40 = vld [vmem:[#allocation15 + $0xa0] ss:$16 sps:$4 sm:$0xff]  }
 0x2ed   :  { %3041 = vmatprep.subr.bf16.mxu0 %v11207_v55  ;;  %3082 = vmatprep.subr.bf16.mxu1 %v11211_v36  ;;  %13033 = vst [vmem:[#allocation57_spill] sm:$0xff] %v11219_v42  ;;  %13034 = vst [vmem:[#allocation58_spill] sm:$0xff] %v11221_v40  ;;  %v11229_v36 = vld [vmem:[#allocation15 + $0x84] ss:$16 sps:$4 sm:$0xff]   ;;  %v11235_v55 = vld [vmem:[#allocation15 + $0x88] ss:$16 sps:$4 sm:$0xff]  }
 0x2ee   :  { %13036 = vst [vmem:[#allocation60_spill] sm:$0xff] %v11229_v36  ;;  %13039 = vst [vmem:[#allocation63_spill] sm:$0xff] %v11235_v55 }
 0x2f0   :  { %3042 = vmatpush1.bf16.msra.mxu0 %v11205_v37  ;;  %3083 = vmatpush1.bf16.msra.mxu1 %v11209_v41  ;;  %v11231_v37 = vld [vmem:[#allocation15 + $0x8c] ss:$16 sps:$4 sm:$0xff]   ;;  %v11233_v41 = vld [vmem:[#allocation15 + $0x80] ss:$16 sps:$4 sm:$0xff]  }
 0x2f1   :  { %3043 = vmatprep.subr.bf16.mxu0 %v11217_v38  ;;  %3084 = vmatprep.subr.bf16.mxu1 %v11219_v42  ;;  %13037 = vst [vmem:[#allocation61_spill] sm:$0xff] %v11231_v37  ;;  %13038 = vst [vmem:[#allocation62_spill] sm:$0xff] %v11233_v41  ;;  %v11241_v42 = vld [vmem:[#allocation15 + $0x64] ss:$16 sps:$4 sm:$0xff]   ;;  %v11247_v38 = vld [vmem:[#allocation15 + $0x68] ss:$16 sps:$4 sm:$0xff]  }
 0x2f2   :  { %13040 = vst [vmem:[#allocation64_spill] sm:$0xff] %v11241_v42  ;;  %13043 = vst [vmem:[#allocation67_spill] sm:$0xff] %v11247_v38 }
 0x2f4   :  { %3044 = vmatpush1.bf16.msra.mxu0 %v11221_v40  ;;  %3085 = vmatpush1.bf16.msra.mxu1 %v11223_v45  ;;  %v11243_v40 = vld [vmem:[#allocation15 + $0x6c] ss:$16 sps:$4 sm:$0xff]   ;;  %v11245_v45 = vld [vmem:[#allocation15 + $0x60] ss:$16 sps:$4 sm:$0xff]  }
 0x2f5   :  { %3045 = vmatprep.subr.bf16.mxu0 %v11229_v36  ;;  %3086 = vmatprep.subr.bf16.mxu1 %v11231_v37  ;;  %13041 = vst [vmem:[#allocation65_spill] sm:$0xff] %v11243_v40  ;;  %13042 = vst [vmem:[#allocation66_spill] sm:$0xff] %v11245_v45  ;;  %v11253_v37 = vld [vmem:[#allocation15 + $0x44] ss:$16 sps:$4 sm:$0xff]   ;;  %v11259_v36 = vld [vmem:[#allocation15 + $0x48] ss:$16 sps:$4 sm:$0xff]  }
 0x2f6   :  { %13044 = vst [vmem:[#allocation68_spill] sm:$0xff] %v11253_v37  ;;  %13047 = vst [vmem:[#allocation71_spill] sm:$0xff] %v11259_v36 }
 0x2f8   :  { %3046 = vmatpush1.bf16.msra.mxu0 %v11233_v41  ;;  %3087 = vmatpush1.bf16.msra.mxu1 %v11235_v55  ;;  %v11255_v41 = vld [vmem:[#allocation15 + $0x4c] ss:$16 sps:$4 sm:$0xff]   ;;  %v11257_v55 = vld [vmem:[#allocation15 + $0x40] ss:$16 sps:$4 sm:$0xff]  }
 0x2f9   :  { %3047 = vmatprep.subr.bf16.mxu0 %v11241_v42  ;;  %3088 = vmatprep.subr.bf16.mxu1 %v11243_v40  ;;  %13045 = vst [vmem:[#allocation69_spill] sm:$0xff] %v11255_v41  ;;  %13046 = vst [vmem:[#allocation70_spill] sm:$0xff] %v11257_v55  ;;  %v11265_v40 = vld [vmem:[#allocation15 + $0x24] ss:$16 sps:$4 sm:$0xff]   ;;  %v11271_v42 = vld [vmem:[#allocation15 + $0x28] ss:$16 sps:$4 sm:$0xff]  }
 0x2fa   :  { %13048 = vst [vmem:[#allocation72_spill] sm:$0xff] %v11265_v40  ;;  %13051 = vst [vmem:[#allocation75_spill] sm:$0xff] %v11271_v42 }
 0x2fc   :  { %3048 = vmatpush1.bf16.msra.mxu0 %v11245_v45  ;;  %3089 = vmatpush1.bf16.msra.mxu1 %v11247_v38  ;;  %v11267_v45 = vld [vmem:[#allocation15 + $0x2c] ss:$16 sps:$4 sm:$0xff]   ;;  %v11269_v38 = vld [vmem:[#allocation15 + $0x20] ss:$16 sps:$4 sm:$0xff]  }
 0x2fd   :  { %3049 = vmatprep.subr.bf16.mxu0 %v11253_v37  ;;  %3090 = vmatprep.subr.bf16.mxu1 %v11255_v41  ;;  %13049 = vst [vmem:[#allocation73_spill] sm:$0xff] %v11267_v45  ;;  %13050 = vst [vmem:[#allocation74_spill] sm:$0xff] %v11269_v38  ;;  %v11277_v41 = vld [vmem:[#allocation15 + $0x4] ss:$16 sps:$4 sm:$0xff]   ;;  %v11283_v37 = vld [vmem:[#allocation15 + $0x8] ss:$16 sps:$4 sm:$0xff]  }
 0x2fe   :  { %13052 = vst [vmem:[#allocation76_spill] sm:$0xff] %v11277_v41  ;;  %13055 = vst [vmem:[#allocation79_spill] sm:$0xff] %v11283_v37 }
 0x300   :  { %3050 = vmatpush1.bf16.msra.mxu0 %v11257_v55  ;;  %3091 = vmatpush1.bf16.msra.mxu1 %v11259_v36  ;;  %v11279_v55 = vld [vmem:[#allocation15 + $0xc] ss:$16 sps:$4 sm:$0xff]   ;;  %v11281_v36 = vld [vmem:[#allocation15] ss:$16 sps:$4 sm:$0xff]  }
 0x301   :  { %3051 = vmatprep.subr.bf16.mxu0 %v11265_v40  ;;  %3092 = vmatprep.subr.bf16.mxu1 %v11267_v45  ;;  %13053 = vst [vmem:[#allocation77_spill] sm:$0xff] %v11279_v55  ;;  %13054 = vst [vmem:[#allocation78_spill] sm:$0xff] %v11281_v36  ;;  %v11289_v45 = vld [vmem:[#allocation15 + $0x1e4] ss:$16 sps:$4 sm:$0xff]   ;;  %v11295_v40 = vld [vmem:[#allocation15 + $0x1e8] ss:$16 sps:$4 sm:$0xff]  }
 0x302   :  { %13056 = vst [vmem:[#allocation80_spill] sm:$0xff] %v11289_v45  ;;  %13059 = vst [vmem:[#allocation83_spill] sm:$0xff] %v11295_v40 }
 0x304   :  { %3052 = vmatpush1.bf16.msra.mxu0 %v11269_v38  ;;  %3093 = vmatpush1.bf16.msra.mxu1 %v11271_v42  ;;  %v11291_v38 = vld [vmem:[#allocation15 + $0x1ec] ss:$16 sps:$4 sm:$0xff]   ;;  %v11293_v42 = vld [vmem:[#allocation15 + $0x1e0] ss:$16 sps:$4 sm:$0xff]  }
 0x305   :  { %3053 = vmatprep.subr.bf16.mxu0 %v11277_v41  ;;  %3094 = vmatprep.subr.bf16.mxu1 %v11279_v55  ;;  %13057 = vst [vmem:[#allocation81_spill] sm:$0xff] %v11291_v38  ;;  %13058 = vst [vmem:[#allocation82_spill] sm:$0xff] %v11293_v42  ;;  %v11301_v55 = vld [vmem:[#allocation15 + $0x1c4] ss:$16 sps:$4 sm:$0xff]   ;;  %v11307_v41 = vld [vmem:[#allocation15 + $0x1c8] ss:$16 sps:$4 sm:$0xff]  }
 0x306   :  { %13060 = vst [vmem:[#allocation84_spill] sm:$0xff] %v11301_v55  ;;  %13063 = vst [vmem:[#allocation87_spill] sm:$0xff] %v11307_v41 }
 0x308   :  { %3054 = vmatpush1.bf16.msra.mxu0 %v11281_v36  ;;  %3095 = vmatpush1.bf16.msra.mxu1 %v11283_v37  ;;  %v11303_v36 = vld [vmem:[#allocation15 + $0x1cc] ss:$16 sps:$4 sm:$0xff]   ;;  %v11305_v37 = vld [vmem:[#allocation15 + $0x1c0] ss:$16 sps:$4 sm:$0xff]  }
 0x309   :  { %3055 = vmatprep.subr.bf16.mxu0 %v11289_v45  ;;  %3096 = vmatprep.subr.bf16.mxu1 %v11291_v38  ;;  %13061 = vst [vmem:[#allocation85_spill] sm:$0xff] %v11303_v36  ;;  %13062 = vst [vmem:[#allocation86_spill] sm:$0xff] %v11305_v37  ;;  %v11313_v38 = vld [vmem:[#allocation15 + $0x1a4] ss:$16 sps:$4 sm:$0xff]   ;;  %v11319_v45 = vld [vmem:[#allocation15 + $0x1a8] ss:$16 sps:$4 sm:$0xff]  }
 0x30a   :  { %13064 = vst [vmem:[#allocation88_spill] sm:$0xff] %v11313_v38  ;;  %13067 = vst [vmem:[#allocation91_spill] sm:$0xff] %v11319_v45 }
 0x30c   :  { %3056 = vmatpush2.bf16.msra.mxu0 %v11293_v42  ;;  %3097 = vmatpush2.bf16.msra.mxu1 %v11295_v40  ;;  %v11315_v42 = vld [vmem:[#allocation15 + $0x1ac] ss:$16 sps:$4 sm:$0xff]   ;;  %v11317_v40 = vld [vmem:[#allocation15 + $0x1a0] ss:$16 sps:$4 sm:$0xff]  }
 0x30d   :  { %3057 = vmatprep.subr.bf16.mxu0 %v11301_v55  ;;  %3098 = vmatprep.subr.bf16.mxu1 %v11303_v36  ;;  %13065 = vst [vmem:[#allocation89_spill] sm:$0xff] %v11315_v42  ;;  %13066 = vst [vmem:[#allocation90_spill] sm:$0xff] %v11317_v40  ;;  %v11325_v36 = vld [vmem:[#allocation15 + $0x184] ss:$16 sps:$4 sm:$0xff]   ;;  %v11331_v55 = vld [vmem:[#allocation15 + $0x188] ss:$16 sps:$4 sm:$0xff]  }
 0x30e   :  { %13068 = vst [vmem:[#allocation92_spill] sm:$0xff] %v11325_v36  ;;  %13071 = vst [vmem:[#allocation95_spill] sm:$0xff] %v11331_v55 }
 0x310   :  { %3058 = vmatpush2.bf16.msra.mxu0 %v11305_v37  ;;  %3099 = vmatpush2.bf16.msra.mxu1 %v11307_v41  ;;  %v11327_v37 = vld [vmem:[#allocation15 + $0x18c] ss:$16 sps:$4 sm:$0xff]   ;;  %v11329_v41 = vld [vmem:[#allocation15 + $0x180] ss:$16 sps:$4 sm:$0xff]  }
 0x311   :  { %3059 = vmatprep.subr.bf16.mxu0 %v11313_v38  ;;  %3100 = vmatprep.subr.bf16.mxu1 %v11315_v42  ;;  %13069 = vst [vmem:[#allocation93_spill] sm:$0xff] %v11327_v37  ;;  %13070 = vst [vmem:[#allocation94_spill] sm:$0xff] %v11329_v41  ;;  %v11343_v42 = vld [vmem:[#allocation15 + $0x16c] ss:$16 sps:$4 sm:$0xff]   ;;  %v11346_v38 = vld [vmem:[#allocation15 + $0x144] ss:$16 sps:$4 sm:$0xff]  }
 0x312   :  { %13075 = vst [vmem:[#allocation99_spill] sm:$0xff] %v11343_v42  ;;  %13076 = vst [vmem:[#allocation100_spill] sm:$0xff] %v11346_v38 }
 0x314   :  { %3060 = vmatpush2.bf16.msra.mxu0 %v11317_v40  ;;  %3101 = vmatpush2.bf16.msra.mxu1 %v11319_v45  ;;  %v11339_v40 = vld [vmem:[#allocation15 + $0x160] ss:$16 sps:$4 sm:$0xff]   ;;  %v11341_v45 = vld [vmem:[#allocation15 + $0x168] ss:$16 sps:$4 sm:$0xff]  }
 0x315   :  { %3061 = vmatprep.subr.bf16.mxu0 %v11325_v36  ;;  %3102 = vmatprep.subr.bf16.mxu1 %v11327_v37  ;;  %13073 = vst [vmem:[#allocation97_spill] sm:$0xff] %v11339_v40  ;;  %13074 = vst [vmem:[#allocation98_spill] sm:$0xff] %v11341_v45  ;;  %v11359_v37 = vld [vmem:[#allocation15 + $0x124] ss:$16 sps:$4 sm:$0xff]  }
 0x316   :  { %13080 = vst [vmem:[#allocation104_spill] sm:$0xff] %v11359_v37 }
 0x318   :  { %3062 = vmatpush2.bf16.msra.mxu0 %v11329_v41  ;;  %3103 = vmatpush2.bf16.msra.mxu1 %v11331_v55  ;;  %v11353_v41 = vld [vmem:[#allocation15 + $0x140] ss:$16 sps:$4 sm:$0xff]   ;;  %v11355_v55 = vld [vmem:[#allocation15 + $0x148] ss:$16 sps:$4 sm:$0xff]  }
 0x319   :  { %3063 = vmatprep.subr.bf16.mxu0 %v11335_v35  ;;  %3104 = vmatprep.subr.bf16.mxu1 %v11343_v42  ;;  %13078 = vst [vmem:[#allocation102_spill] sm:$0xff] %v11353_v41  ;;  %13079 = vst [vmem:[#allocation103_spill] sm:$0xff] %v11355_v55  ;;  %v11361_v35 = vld [vmem:[#allocation15 + $0x12c] ss:$16 sps:$4 sm:$0xff]   ;;  %v11365_v42 = vld [vmem:[#allocation15 + $0x120] ss:$16 sps:$4 sm:$0xff]  }
 0x31a   :  { %13081 = vst [vmem:[#allocation105_spill] sm:$0xff] %v11361_v35  ;;  %13082 = vst [vmem:[#allocation106_spill] sm:$0xff] %v11365_v42 }
 0x31c   :  { %3064 = vmatpush2.bf16.msra.mxu0 %v11339_v40  ;;  %3105 = vmatpush2.bf16.msra.mxu1 %v11341_v45  ;;  %v11367_v40 = vld [vmem:[#allocation15 + $0x128] ss:$16 sps:$4 sm:$0xff]   ;;  %v11371_v45 = vld [vmem:[#allocation15 + $0x104] ss:$16 sps:$4 sm:$0xff]  }
 0x31d   :  { %3065 = vmatprep.subr.bf16.mxu0 %v11346_v38  ;;  %3106 = vmatprep.subr.bf16.mxu1 %v11348_v63  ;;  %13083 = vst [vmem:[#allocation107_spill] sm:$0xff] %v11367_v40  ;;  %13084 = vst [vmem:[#allocation108_spill] sm:$0xff] %v11371_v45  ;;  %v11373_v38 = vld [vmem:[#allocation15 + $0x10c] ss:$16 sps:$4 sm:$0xff]   ;;  %v11377_v63 = vld [vmem:[#allocation15 + $0x100] ss:$16 sps:$4 sm:$0xff]  }
 0x31e   :  { %13085 = vst [vmem:[#allocation109_spill] sm:$0xff] %v11373_v38  ;;  %13086 = vst [vmem:[#allocation110_spill] sm:$0xff] %v11377_v63 }
 0x320   :  { %3066 = vmatpush2.bf16.msra.mxu0 %v11353_v41  ;;  %3107 = vmatpush2.bf16.msra.mxu1 %v11355_v55  ;;  %v11379_v41 = vld [vmem:[#allocation15 + $0x108] ss:$16 sps:$4 sm:$0xff]  }
 0x321   :  { %3067 = vmatprep.subr.bf16.mxu0 %v11359_v37  ;;  %3108 = vmatprep.subr.bf16.mxu1 %v11361_v35  ;;  %13087 = vst [vmem:[#allocation111_spill] sm:$0xff] %v11379_v41  ;;  %v3148_v35 = vld [vmem:[#allocation9 + $0xc] sm:$0xf] }
 0x322   :  { %3149 = vst [vmem:[#allocation6] sm:$0xf] %v3148_v35 }
 0x324   :  { %3068 = vmatpush2.bf16.msra.mxu0 %v11365_v42  ;;  %3109 = vmatpush2.bf16.msra.mxu1 %v11367_v40 }
 0x325   :  { %3069 = vmatprep.subr.bf16.mxu0 %v11371_v45  ;;  %3110 = vmatprep.subr.bf16.mxu1 %v11373_v38 }
 0x328   :  { %3070 = vmatpush2.bf16.msra.mxu0 %v11377_v63  ;;  %3111 = vmatpush2.bf16.msra.mxu1 %v11379_v41 }
 0x329   :  { %3543 = vmatprep.subr.bf16.mxu0 %v10957_v24  ;;  %3584 = vmatprep.subr.bf16.mxu1 %v10959_v25 }
 0x36b   :  { %v2067_v42 = vpop.f32.mrf.mxu0  ;;  %v2108_v40 = vpop.f32.mrf.mxu1 }
 0x36c   :  { %v2068_v37 = vadd.f32 %v2067_v42, %v10968_v30  ;;  %v2109_v29 = vadd.f32 %v2108_v40, %v10983_v49 }
 0x36d   :  { %v2069_v55 = vpop.f32.mrf.mxu0  ;;  %v2110_v36 = vpop.f32.mrf.mxu1 }
 0x36e   :  { %v8497_v34 = vmul.f32 -1.442695, %v2068_v37  ;;  %v2070_v45 = vadd.f32 %v2069_v55, %v10972_v32  ;;  %v2111_v24 = vadd.f32 %v2110_v36, %v10978_v46 }
 0x36f   :  { %v2071_v38 = vpop.f32.mrf.mxu0  ;;  %v2112_v33 = vpop.f32.mrf.mxu1 }
 0x370   :  { %10246 = vpow2.f32 %v8497_v34  ;;  %v8498_v63 = vmul.f32 -1.442695, %v2070_v45  ;;  %v8499_v25 = vmul.f32 -1.442695, %v2111_v24 }
 0x371   :  { %v2072_v41 = vpop.f32.mrf.mxu0  ;;  %v2113_v31 = vpop.f32.mrf.mxu1 }
 0x372   :  { %10248 = vpow2.f32 %v8498_v63 }
 0x373   :  { %10250 = vpow2.f32 %v8499_v25 }
 0x37d   :  { %v10247_v35 = vpop.eup %10246 }
 0x37e   :  { %v2118_v28 = vadd.f32 1.0, %v10247_v35 }
 0x37f   :  { %v10249_v42 = vpop.eup %10248 }
 0x380   :  { %10252 = vrcp.f32 %v2118_v28  ;;  %v2124_v37 = vadd.f32 1.0, %v10249_v42  ;;  %v10251_v38 = vpop.eup %10250 }
 0x381   :  { %10254 = vtanh.f32 %v2109_v29  ;;  %v2131_v55 = vadd.f32 1.0, %v10251_v38 }
 0x382   :  { %10256 = vrcp.f32 %v2124_v37 }
 0x383   :  { %10258 = vrcp.f32 %v2131_v55 }
 0x38d   :  { %v10253_v33 = vpop.eup %10252 }
 0x38e   :  { %v10255_v34 = vpop.eup %10254 }
 0x38f   :  { %v10257_v45 = vpop.eup %10256  ;;  %v2135_v31 = vmul.f32 %v10255_v34, %v10253_v33 }
 0x390   :  { %v2134_v63 = vmul.f32 %v10257_v45, %v10986_v5  ;;  %v10259_v40 = vpop.eup %10258 }
 0x392   :  { %v11392_v36 = vadd.f32 %v2135_v31, %v2134_v63 }
 0x394   :  { %10260 = vtanh.f32 %v11392_v36 }
 0x3a1   :  { %v10261_v41 = vpop.eup %10260 }
 0x3a2   :  { %v2138_v24 = vmul.f32 %v10261_v41, %v10259_v40 }
 0x3a4   :  { %v9396_v28 = vpack.c.bf16 %v2138_v24, %v2138_v24  ;;  %v9371_v29 = vpack.c.bf16 %v2138_v24, %v10989_v59 }
 0x3a6   :  { %3071 = vmatprep.mubr.bf16.mxu0 %v9396_v28  ;;  %9372 = vst [vmem:[#allocation17] sm:$0xff] %v9371_v29   ;;  %3112 = vmatprep.mubr.bf16.mxu1 %v9396_v28 }
 0x3ab   :  { %v2571_v25 = vpop.f32.mrf.mxu0  ;;  %v2612_v35 = vpop.f32.mrf.mxu1 }
 0x3ac   :  { %v2572_v42 = vadd.f32 %v2571_v25, %v12996_v6  ;;  %v2613_v24 = vadd.f32 %v2612_v35, %v10888_v7 }
 0x3ad   :  { %v2573_v37 = vpop.f32.mrf.mxu0  ;;  %v2614_v5 = vpop.f32.mrf.mxu1 }
 0x3ae   :  { %v8566_v38 = vmul.f32 -1.442695, %v2572_v42  ;;  %v2574_v33 = vadd.f32 %v2573_v37, %v12997_v15  ;;  %v2615_v59 = vadd.f32 %v2614_v5, %v10884_v13 }
 0x3af   :  { %v2575_v34 = vpop.f32.mrf.mxu0  ;;  %v2616_v45 = vpop.f32.mrf.mxu1 }
 0x3b0   :  { %10262 = vpow2.f32 %v8566_v38  ;;  %v8567_v55 = vmul.f32 -1.442695, %v2574_v33  ;;  %v8568_v40 = vmul.f32 -1.442695, %v2615_v59 }
 0x3b1   :  { %v2576_v31 = vpop.f32.mrf.mxu0  ;;  %v2617_v63 = vpop.f32.mrf.mxu1 }
 0x3b2   :  { %10264 = vpow2.f32 %v8567_v55 }
 0x3b3   :  { %10266 = vpow2.f32 %v8568_v40 }
 0x3bd   :  { %v10263_v41 = vpop.eup %10262 }
 0x3be   :  { %v2622_v28 = vadd.f32 1.0, %v10263_v41  ;;  %v13123_v41 = vld [vmem:[#allocation57_spill] sm:$0xff] }
 0x3bf   :  { %v10265_v29 = vpop.eup %10264 }
 0x3c0   :  { %10268 = vrcp.f32 %v2622_v28  ;;  %v2628_v25 = vadd.f32 1.0, %v10265_v29  ;;  %v10267_v42 = vpop.eup %10266  ;;  %v13125_v28 = vld [vmem:[#allocation59_spill] sm:$0xff]  ;;  %v13126_v29 = vld [vmem:[#allocation60_spill] sm:$0xff] }
 0x3c1   :  { %10270 = vtanh.f32 %v2613_v24  ;;  %v2635_v34 = vadd.f32 1.0, %v10267_v42  ;;  %v13124_v24 = vld [vmem:[#allocation58_spill] sm:$0xff] }
 0x3c2   :  { %10272 = vrcp.f32 %v2628_v25  ;;  %v13127_v25 = vld [vmem:[#allocation61_spill] sm:$0xff]  ;;  %v13128_v42 = vld [vmem:[#allocation62_spill] sm:$0xff] }
 0x3c3   :  { %10274 = vrcp.f32 %v2635_v34  ;;  %v13132_v34 = vld [vmem:[#allocation66_spill] sm:$0xff] }
 0x3cd   :  { %v10269_v37 = vpop.eup %10268 }
 0x3ce   :  { %v10271_v38 = vpop.eup %10270 }
 0x3cf   :  { %v10273_v33 = vpop.eup %10272  ;;  %v2639_v45 = vmul.f32 %v10271_v38, %v10269_v37  ;;  %v13129_v37 = vld [vmem:[#allocation63_spill] sm:$0xff]  ;;  %v13130_v38 = vld [vmem:[#allocation64_spill] sm:$0xff] }
 0x3d0   :  { %v2638_v55 = vmul.f32 %v10273_v33, %v10998_v39  ;;  %v10275_v35 = vpop.eup %10274  ;;  %v13131_v33 = vld [vmem:[#allocation65_spill] sm:$0xff] }
 0x3d2   :  { %v11401_v5 = vadd.f32 %v2639_v45, %v2638_v55  ;;  %v13133_v45 = vld [vmem:[#allocation67_spill] sm:$0xff]  ;;  %v13134_v55 = vld [vmem:[#allocation68_spill] sm:$0xff] }
 0x3d4   :  { %10276 = vtanh.f32 %v11401_v5 }
 0x3e1   :  { %v10277_v31 = vpop.eup %10276 }
 0x3e2   :  { %v2642_v63 = vmul.f32 %v10277_v31, %v10275_v35  ;;  %v13135_v35 = vld [vmem:[#allocation69_spill] sm:$0xff]  ;;  %v13136_v31 = vld [vmem:[#allocation70_spill] sm:$0xff] }
 0x3e4   :  { %v2643_v59 = vpack.c.bf16 %v2642_v63, %v2642_v63  ;;  %v13137_v63 = vld [vmem:[#allocation71_spill] sm:$0xff] }
 0x3e6   :  { %3072 = vmatmul.mubr.bf16.vlgmr.msra.gmra.mxu0 %v2643_v59  ;;  %3150 = vst [vmem:[#allocation6 + $0x4] sm:$0xf] %v2643_v59  ;;  %3113 = vmatmul.mubr.bf16.vlgmr.msra.gmra.mxu1 %v2643_v59  ;;  %v13138_v59 = vld [vmem:[#allocation72_spill] sm:$0xff] }
 0x3e7   :  { %3544 = vmatpush1.bf16.msra.mxu0 %v11001_v43  ;;  %3585 = vmatpush1.bf16.msra.mxu1 %v11003_v44  ;;  %v13088_v43 = vld [vmem:[#allocation22_spill] sm:$0xff]  ;;  %v13089_v44 = vld [vmem:[#allocation23_spill] sm:$0xff] }
 0x3e8   :  { %3545 = vmatprep.subr.bf16.mxu0 %v11005_v47  ;;  %3586 = vmatprep.subr.bf16.mxu1 %v11007_v48  ;;  %v13090_v47 = vld [vmem:[#allocation24_spill] sm:$0xff]  ;;  %v13091_v48 = vld [vmem:[#allocation25_spill] sm:$0xff] }
 0x3eb   :  { %3546 = vmatpush1.bf16.msra.mxu0 %v11011_v58  ;;  %3587 = vmatpush1.bf16.msra.mxu1 %v11013_v50  ;;  %v13092_v58 = vld [vmem:[#allocation26_spill] sm:$0xff]  ;;  %v13093_v50 = vld [vmem:[#allocation27_spill] sm:$0xff] }
 0x3ec   :  { %3547 = vmatprep.subr.bf16.mxu0 %v11017_v51  ;;  %3588 = vmatprep.subr.bf16.mxu1 %v11019_v52  ;;  %v13094_v51 = vld [vmem:[#allocation28_spill] sm:$0xff]  ;;  %v13095_v52 = vld [vmem:[#allocation29_spill] sm:$0xff] }
 0x3ed   :  { %v3151_v39 = vld [vmem:[#allocation6] sm:$0xff] }
 0x3ee   :  { %v8639_v40 = vcombine.high %v3151_v39, %v3151_v39 }
 0x3ef   :  { %3548 = vmatpush1.bf16.msra.mxu0 %v11023_v53  ;;  %3589 = vmatpush1.bf16.msra.mxu1 %v11025_v54  ;;  %v13096_v53 = vld [vmem:[#allocation30_spill] sm:$0xff]  ;;  %v13097_v54 = vld [vmem:[#allocation31_spill] sm:$0xff] }
 0x3f0   :  { %3575 = vmatprep.mubr.bf16.mxu0 %v8639_v40  ;;  %3616 = vmatprep.mubr.bf16.mxu1 %v8639_v40  ;;  %v13140_v40 = vld [vmem:[#allocation74_spill] sm:$0xff] }
 0x3f1   :  { %3549 = vmatprep.subr.bf16.mxu0 %v11031_v56  ;;  %3590 = vmatprep.subr.bf16.mxu1 %v11033_v57  ;;  %v13098_v56 = vld [vmem:[#allocation32_spill] sm:$0xff]  ;;  %v13099_v57 = vld [vmem:[#allocation33_spill] sm:$0xff] }
 0x3f3   :  { %3550 = vmatpush1.bf16.msra.mxu0 %v11039_v62  ;;  %3591 = vmatpush1.bf16.msra.mxu1 %v11041_v8  ;;  %v13100_v62 = vld [vmem:[#allocation34_spill] sm:$0xff]  ;;  %v13101_v8 = vld [vmem:[#allocation35_spill] sm:$0xff] }
 0x3f4   :  { %3551 = vmatprep.subr.bf16.mxu0 %v11043_v4  ;;  %3592 = vmatprep.subr.bf16.mxu1 %v11045_v3  ;;  %v13102_v4 = vld [vmem:[#allocation36_spill] sm:$0xff]  ;;  %v13103_v3 = vld [vmem:[#allocation37_spill] sm:$0xff] }
 0x3f7   :  { %3552 = vmatpush1.bf16.msra.mxu0 %v11051_v9  ;;  %3593 = vmatpush1.bf16.msra.mxu1 %v11053_v10  ;;  %v13104_v9 = vld [vmem:[#allocation38_spill] sm:$0xff]  ;;  %v13105_v10 = vld [vmem:[#allocation39_spill] sm:$0xff] }
 0x3f8   :  { %3553 = vmatprep.subr.bf16.mxu0 %v11057_v1  ;;  %3594 = vmatprep.subr.bf16.mxu1 %v11059_v11  ;;  %v13106_v1 = vld [vmem:[#allocation40_spill] sm:$0xff]  ;;  %v13107_v11 = vld [vmem:[#allocation41_spill] sm:$0xff] }
 0x3fb   :  { %3554 = vmatpush1.bf16.msra.mxu0 %v11063_v61  ;;  %3595 = vmatpush1.bf16.msra.mxu1 %v11065_v12  ;;  %v13108_v61 = vld [vmem:[#allocation42_spill] sm:$0xff]  ;;  %v13109_v12 = vld [vmem:[#allocation43_spill] sm:$0xff] }
 0x3fc   :  { %3555 = vmatprep.subr.bf16.mxu0 %v11069_v2  ;;  %3596 = vmatprep.subr.bf16.mxu1 %v11071_v60  ;;  %v13110_v2 = vld [vmem:[#allocation44_spill] sm:$0xff]  ;;  %v13111_v60 = vld [vmem:[#allocation45_spill] sm:$0xff] }
 0x3ff   :  { %3556 = vmatpush1.bf16.msra.mxu0 %v11075_v14  ;;  %3597 = vmatpush1.bf16.msra.mxu1 %v11077_v16  ;;  %v13112_v14 = vld [vmem:[#allocation46_spill] sm:$0xff]  ;;  %v13113_v16 = vld [vmem:[#allocation47_spill] sm:$0xff] }
 0x400   :  { %3557 = vmatprep.subr.bf16.mxu0 %v11081_v17  ;;  %3598 = vmatprep.subr.bf16.mxu1 %v11083_v18  ;;  %v8638_v17 = vcombine.low %v3151_v39, %v3151_v39  ;;  %v13114_v18 = vld [vmem:[#allocation49_spill] sm:$0xff] }
 0x401   :  { %v13139_v39 = vld [vmem:[#allocation73_spill] sm:$0xff] }
 0x403   :  { %3558 = vmatpush1.bf16.msra.mxu0 %v11087_v0  ;;  %3599 = vmatpush1.bf16.msra.mxu1 %v11089_v19  ;;  %v13115_v0 = vld [vmem:[#allocation51_spill] sm:$0xff]  ;;  %v13116_v19 = vld [vmem:[#allocation48_spill] sm:$0xff] }
 0x404   :  { %3559 = vmatprep.subr.bf16.mxu0 %v11093_v20  ;;  %3600 = vmatprep.subr.bf16.mxu1 %v11095_v21  ;;  %v13117_v20 = vld [vmem:[#allocation50_spill] sm:$0xff]  ;;  %v13118_v21 = vld [vmem:[#allocation53_spill] sm:$0xff] }
 0x407   :  { %3560 = vmatpush2.bf16.msra.mxu0 %v11099_v22  ;;  %3601 = vmatpush2.bf16.msra.mxu1 %v11101_v23  ;;  %v13119_v22 = vld [vmem:[#allocation55_spill] sm:$0xff]  ;;  %v13120_v23 = vld [vmem:[#allocation52_spill] sm:$0xff] }
 0x408   :  { %3561 = vmatprep.subr.bf16.mxu0 %v11105_v26  ;;  %3602 = vmatprep.subr.bf16.mxu1 %v11107_v27  ;;  %v13121_v26 = vld [vmem:[#allocation54_spill] sm:$0xff]  ;;  %v13122_v27 = vld [vmem:[#allocation56_spill] sm:$0xff] }
 0x40b   :  { %3562 = vmatpush2.bf16.msra.mxu0 %v13088_v43  ;;  %3603 = vmatpush2.bf16.msra.mxu1 %v13089_v44  ;;  %v13141_v43 = vld [vmem:[#allocation75_spill] sm:$0xff]  ;;  %v13142_v44 = vld [vmem:[#allocation76_spill] sm:$0xff] }
 0x40c   :  { %3563 = vmatprep.subr.bf16.mxu0 %v13090_v47  ;;  %3604 = vmatprep.subr.bf16.mxu1 %v13091_v48  ;;  %v13143_v47 = vld [vmem:[#allocation77_spill] sm:$0xff]  ;;  %v13144_v48 = vld [vmem:[#allocation78_spill] sm:$0xff] }
 0x40f   :  { %3564 = vmatpush2.bf16.msra.mxu0 %v13092_v58  ;;  %3605 = vmatpush2.bf16.msra.mxu1 %v13093_v50  ;;  %v13145_v58 = vld [vmem:[#allocation79_spill] sm:$0xff]  ;;  %v13146_v50 = vld [vmem:[#allocation80_spill] sm:$0xff] }
 0x410   :  { %3565 = vmatprep.subr.bf16.mxu0 %v13094_v51  ;;  %3606 = vmatprep.subr.bf16.mxu1 %v13095_v52  ;;  %v13147_v51 = vld [vmem:[#allocation81_spill] sm:$0xff]  ;;  %v13148_v52 = vld [vmem:[#allocation82_spill] sm:$0xff] }
 0x413   :  { %3566 = vmatpush2.bf16.msra.mxu0 %v13096_v53  ;;  %3607 = vmatpush2.bf16.msra.mxu1 %v13097_v54  ;;  %v13149_v53 = vld [vmem:[#allocation83_spill] sm:$0xff]  ;;  %v13150_v54 = vld [vmem:[#allocation84_spill] sm:$0xff] }
 0x414   :  { %3567 = vmatprep.subr.bf16.mxu0 %v13098_v56  ;;  %3608 = vmatprep.subr.bf16.mxu1 %v13099_v57  ;;  %v13151_v56 = vld [vmem:[#allocation85_spill] sm:$0xff]  ;;  %v13152_v57 = vld [vmem:[#allocation86_spill] sm:$0xff] }
 0x417   :  { %3568 = vmatpush2.bf16.msra.mxu0 %v13100_v62  ;;  %3609 = vmatpush2.bf16.msra.mxu1 %v13101_v8  ;;  %v13153_v62 = vld [vmem:[#allocation87_spill] sm:$0xff]  ;;  %v13154_v8 = vld [vmem:[#allocation88_spill] sm:$0xff] }
 0x418   :  { %3569 = vmatprep.subr.bf16.mxu0 %v13102_v4  ;;  %3610 = vmatprep.subr.bf16.mxu1 %v13103_v3  ;;  %v13155_v4 = vld [vmem:[#allocation89_spill] sm:$0xff]  ;;  %v13156_v3 = vld [vmem:[#allocation90_spill] sm:$0xff] }
 0x41b   :  { %3570 = vmatpush2.bf16.msra.mxu0 %v13104_v9  ;;  %3611 = vmatpush2.bf16.msra.mxu1 %v13105_v10  ;;  %v13157_v9 = vld [vmem:[#allocation91_spill] sm:$0xff]  ;;  %v13158_v10 = vld [vmem:[#allocation92_spill] sm:$0xff] }
 0x41c   :  { %3571 = vmatprep.subr.bf16.mxu0 %v13106_v1  ;;  %3612 = vmatprep.subr.bf16.mxu1 %v13107_v11  ;;  %v13159_v1 = vld [vmem:[#allocation93_spill] sm:$0xff]  ;;  %v13160_v11 = vld [vmem:[#allocation94_spill] sm:$0xff] }
 0x41f   :  { %3572 = vmatpush2.bf16.msra.mxu0 %v13108_v61  ;;  %3613 = vmatpush2.bf16.msra.mxu1 %v13109_v12  ;;  %v13161_v61 = vld [vmem:[#allocation95_spill] sm:$0xff]  ;;  %v13162_v12 = vld [vmem:[#allocation96_spill] sm:$0xff] }
 0x420   :  { %3573 = vmatprep.subr.bf16.mxu0 %v13110_v2  ;;  %3614 = vmatprep.subr.bf16.mxu1 %v13111_v60  ;;  %v13163_v2 = vld [vmem:[#allocation99_spill] sm:$0xff]  ;;  %v13164_v60 = vld [vmem:[#allocation97_spill] sm:$0xff] }
 0x423   :  { %3574 = vmatpush2.bf16.msra.mxu0 %v13112_v14  ;;  %3615 = vmatpush2.bf16.msra.mxu1 %v13113_v16  ;;  %v13165_v14 = vld [vmem:[#allocation98_spill] sm:$0xff]  ;;  %v13166_v16 = vld [vmem:[#allocation100_spill] sm:$0xff] }
 0x424   :  { %4045 = vmatprep.subr.bf16.mxu0 %v13114_v18  ;;  %4086 = vmatprep.subr.bf16.mxu1 %v13115_v0  ;;  %v13168_v18 = vld [vmem:[#allocation102_spill] sm:$0xff]  ;;  %v13169_v0 = vld [vmem:[#allocation103_spill] sm:$0xff] }
 0x426   :  { %3576 = vmatmul.mubr.bf16.vlgmr.msra.gmra.mxu0 %v8638_v17  ;;  %3617 = vmatmul.mubr.bf16.vlgmr.msra.gmra.mxu1 %v8638_v17  ;;  %v13167_v17 = vld [vmem:[#allocation101_spill] sm:$0xff] }
 0x427   :  { %4046 = vmatpush1.bf16.msra.mxu0 %v13116_v19  ;;  %4087 = vmatpush1.bf16.msra.mxu1 %v13117_v20  ;;  %v13170_v19 = vld [vmem:[#allocation104_spill] sm:$0xff]  ;;  %v13171_v20 = vld [vmem:[#allocation105_spill] sm:$0xff] }
 0x428   :  { %4047 = vmatprep.subr.bf16.mxu0 %v13118_v21  ;;  %4088 = vmatprep.subr.bf16.mxu1 %v13119_v22  ;;  %v13172_v21 = vld [vmem:[#allocation106_spill] sm:$0xff]  ;;  %v13173_v22 = vld [vmem:[#allocation107_spill] sm:$0xff] }
 0x42b   :  { %4048 = vmatpush1.bf16.msra.mxu0 %v13120_v23  ;;  %4089 = vmatpush1.bf16.msra.mxu1 %v13121_v26  ;;  %v13174_v23 = vld [vmem:[#allocation108_spill] sm:$0xff]  ;;  %v13175_v26 = vld [vmem:[#allocation109_spill] sm:$0xff] }
 0x42c   :  { %4049 = vmatprep.subr.bf16.mxu0 %v13122_v27  ;;  %4090 = vmatprep.subr.bf16.mxu1 %v13123_v41  ;;  %v13176_v27 = vld [vmem:[#allocation110_spill] sm:$0xff]  ;;  %v13177_v41 = vld [vmem:[#allocation111_spill] sm:$0xff] }
 0x42f   :  { %4050 = vmatpush1.bf16.msra.mxu0 %v13124_v24  ;;  %4091 = vmatpush1.bf16.msra.mxu1 %v13125_v28  ;;  %v11530_v24 = vld [vmem:[#allocation12 + $0xe4] ss:$16 sps:$4 sm:$0xff]   ;;  %v11532_v28 = vld [vmem:[#allocation12 + $0xec] ss:$16 sps:$4 sm:$0xff]  }
 0x430   :  { %4051 = vmatprep.subr.bf16.mxu0 %v13126_v29  ;;  %4092 = vmatprep.subr.bf16.mxu1 %v13127_v25  ;;  %v4154_v29 = vld [vmem:[#allocation9 + $0x10] sm:$0xf] }
 0x431   :  { %4155 = vst [vmem:[#allocation6] sm:$0xf] %v4154_v29 }
 0x433   :  { %4052 = vmatpush1.bf16.msra.mxu0 %v13128_v42  ;;  %4093 = vmatpush1.bf16.msra.mxu1 %v13129_v37 }
 0x434   :  { %4053 = vmatprep.subr.bf16.mxu0 %v13130_v38  ;;  %4094 = vmatprep.subr.bf16.mxu1 %v13131_v33 }
 0x437   :  { %4054 = vmatpush1.bf16.msra.mxu0 %v13132_v34  ;;  %4095 = vmatpush1.bf16.msra.mxu1 %v13133_v45 }
 0x438   :  { %4055 = vmatprep.subr.bf16.mxu0 %v13134_v55  ;;  %4096 = vmatprep.subr.bf16.mxu1 %v13135_v35 }
 0x43b   :  { %4056 = vmatpush1.bf16.msra.mxu0 %v13136_v31  ;;  %4097 = vmatpush1.bf16.msra.mxu1 %v13137_v63 }
 0x43c   :  { %4057 = vmatprep.subr.bf16.mxu0 %v13138_v59  ;;  %4098 = vmatprep.subr.bf16.mxu1 %v13139_v39 }
 0x43f   :  { %4058 = vmatpush1.bf16.msra.mxu0 %v13140_v40  ;;  %4099 = vmatpush1.bf16.msra.mxu1 %v13141_v43 }
 0x440   :  { %4059 = vmatprep.subr.bf16.mxu0 %v13142_v44  ;;  %4100 = vmatprep.subr.bf16.mxu1 %v13143_v47 }
 0x443   :  { %4060 = vmatpush1.bf16.msra.mxu0 %v13144_v48  ;;  %4101 = vmatpush1.bf16.msra.mxu1 %v13145_v58 }
 0x444   :  { %4061 = vmatprep.subr.bf16.mxu0 %v13146_v50  ;;  %4102 = vmatprep.subr.bf16.mxu1 %v13147_v51 }
 0x447   :  { %4062 = vmatpush2.bf16.msra.mxu0 %v13148_v52  ;;  %4103 = vmatpush2.bf16.msra.mxu1 %v13149_v53 }
 0x448   :  { %4063 = vmatprep.subr.bf16.mxu0 %v13150_v54  ;;  %4104 = vmatprep.subr.bf16.mxu1 %v13151_v56 }
 0x44b   :  { %4064 = vmatpush2.bf16.msra.mxu0 %v13152_v57  ;;  %4105 = vmatpush2.bf16.msra.mxu1 %v13153_v62 }
 0x44c   :  { %4065 = vmatprep.subr.bf16.mxu0 %v13154_v8  ;;  %4106 = vmatprep.subr.bf16.mxu1 %v13155_v4 }
 0x44f   :  { %4066 = vmatpush2.bf16.msra.mxu0 %v13156_v3  ;;  %4107 = vmatpush2.bf16.msra.mxu1 %v13157_v9 }
 0x450   :  { %4067 = vmatprep.subr.bf16.mxu0 %v13158_v10  ;;  %4108 = vmatprep.subr.bf16.mxu1 %v13159_v1 }
 0x453   :  { %4068 = vmatpush2.bf16.msra.mxu0 %v13160_v11  ;;  %4109 = vmatpush2.bf16.msra.mxu1 %v13161_v61 }
 0x454   :  { %4069 = vmatprep.subr.bf16.mxu0 %v13162_v12  ;;  %4110 = vmatprep.subr.bf16.mxu1 %v13163_v2 }
 0x457   :  { %4070 = vmatpush2.bf16.msra.mxu0 %v13164_v60  ;;  %4111 = vmatpush2.bf16.msra.mxu1 %v13165_v14 }
 0x458   :  { %4071 = vmatprep.subr.bf16.mxu0 %v13166_v16  ;;  %4112 = vmatprep.subr.bf16.mxu1 %v13167_v17 }
 0x45b   :  { %4072 = vmatpush2.bf16.msra.mxu0 %v13168_v18  ;;  %4113 = vmatpush2.bf16.msra.mxu1 %v13169_v0 }
 0x45c   :  { %4073 = vmatprep.subr.bf16.mxu0 %v13170_v19  ;;  %4114 = vmatprep.subr.bf16.mxu1 %v13171_v20 }
 0x45f   :  { %4074 = vmatpush2.bf16.msra.mxu0 %v13172_v21  ;;  %4115 = vmatpush2.bf16.msra.mxu1 %v13173_v22 }
 0x460   :  { %4075 = vmatprep.subr.bf16.mxu0 %v13174_v23  ;;  %4116 = vmatprep.subr.bf16.mxu1 %v13175_v26 }
 0x463   :  { %4076 = vmatpush2.bf16.msra.mxu0 %v13176_v27  ;;  %4117 = vmatpush2.bf16.msra.mxu1 %v13177_v41 }
 0x464   :  { %4549 = vmatprep.subr.bf16.mxu0 %v11530_v24  ;;  %4590 = vmatprep.subr.bf16.mxu1 %v11532_v28 }
 0x4a6   :  { %v3073_v25 = vpop.f32.mrf.mxu0  ;;  %v3114_v42 = vpop.f32.mrf.mxu1 }
 0x4a7   :  { %v3074_v37 = vadd.f32 %v3073_v25, %v10968_v30  ;;  %v3115_v44 = vadd.f32 %v3114_v42, %v10983_v49 }
 0x4a8   :  { %v3075_v38 = vpop.f32.mrf.mxu0  ;;  %v3116_v33 = vpop.f32.mrf.mxu1 }
 0x4a9   :  { %v8635_v34 = vmul.f32 -1.442695, %v3074_v37  ;;  %v3076_v45 = vadd.f32 %v3075_v38, %v10972_v32  ;;  %v3117_v39 = vadd.f32 %v3116_v33, %v10978_v46 }
 0x4aa   :  { %v3077_v55 = vpop.f32.mrf.mxu0  ;;  %v3118_v35 = vpop.f32.mrf.mxu1 }
 0x4ab   :  { %10278 = vpow2.f32 %v8635_v34  ;;  %v8636_v31 = vmul.f32 -1.442695, %v3076_v45  ;;  %v8637_v40 = vmul.f32 -1.442695, %v3117_v39  ;;  %v11556_v35 = vld [vmem:[#allocation12 + $0xe0] ss:$16 sps:$4 sm:$0xff]  }
 0x4ac   :  { %v3078_v63 = vpop.f32.mrf.mxu0  ;;  %v3119_v59 = vpop.f32.mrf.mxu1  ;;  %v11562_v39 = vld [vmem:[#allocation12 + $0xcc] ss:$16 sps:$4 sm:$0xff]  }
 0x4ad   :  { %10280 = vpow2.f32 %v8636_v31  ;;  %v11558_v31 = vld [vmem:[#allocation12 + $0xe8] ss:$16 sps:$4 sm:$0xff]   ;;  %v11560_v59 = vld [vmem:[#allocation12 + $0xc4] ss:$16 sps:$4 sm:$0xff]  }
 0x4ae   :  { %10282 = vpow2.f32 %v8637_v40  ;;  %v11568_v40 = vld [vmem:[#allocation12 + $0xc8] ss:$16 sps:$4 sm:$0xff]  }
 0x4b8   :  { %v10279_v43 = vpop.eup %10278 }
 0x4b9   :  { %v3124_v47 = vadd.f32 1.0, %v10279_v43  ;;  %v11572_v43 = vld [vmem:[#allocation12 + $0xa4] ss:$16 sps:$4 sm:$0xff]  }
 0x4ba   :  { %v10281_v48 = vpop.eup %10280 }
 0x4bb   :  { %10284 = vrcp.f32 %v3124_v47  ;;  %v3130_v58 = vadd.f32 1.0, %v10281_v48  ;;  %v10283_v50 = vpop.eup %10282  ;;  %v11578_v47 = vld [vmem:[#allocation12 + $0xa0] ss:$16 sps:$4 sm:$0xff]   ;;  %v11580_v48 = vld [vmem:[#allocation12 + $0xa8] ss:$16 sps:$4 sm:$0xff]  }
 0x4bc   :  { %10286 = vtanh.f32 %v3115_v44  ;;  %v3137_v54 = vadd.f32 1.0, %v10283_v50  ;;  %v11574_v44 = vld [vmem:[#allocation12 + $0xac] ss:$16 sps:$4 sm:$0xff]  }
 0x4bd   :  { %10288 = vrcp.f32 %v3130_v58  ;;  %v5160_v58 = vld [vmem:[#allocation9 + $0x14] sm:$0xf] }
 0x4be   :  { %10290 = vrcp.f32 %v3137_v54  ;;  %v11594_v54 = vld [vmem:[#allocation12 + $0x80] ss:$16 sps:$4 sm:$0xff]  }
 0x4c8   :  { %v10285_v51 = vpop.eup %10284 }
 0x4c9   :  { %v10287_v52 = vpop.eup %10286 }
 0x4ca   :  { %v10289_v53 = vpop.eup %10288  ;;  %v3141_v56 = vmul.f32 %v10287_v52, %v10285_v51  ;;  %v11586_v51 = vld [vmem:[#allocation12 + $0x84] ss:$16 sps:$4 sm:$0xff]   ;;  %v11588_v52 = vld [vmem:[#allocation12 + $0x8c] ss:$16 sps:$4 sm:$0xff]  }
 0x4cb   :  { %v3140_v57 = vmul.f32 %v10289_v53, %v11392_v36  ;;  %v10291_v8 = vpop.eup %10290 }
 0x4cd   :  { %v11541_v62 = vadd.f32 %v3141_v56, %v3140_v57  ;;  %v11596_v56 = vld [vmem:[#allocation12 + $0x88] ss:$16 sps:$4 sm:$0xff]   ;;  %v11598_v57 = vld [vmem:[#allocation12 + $0x64] ss:$16 sps:$4 sm:$0xff]  }
 0x4cf   :  { %10292 = vtanh.f32 %v11541_v62 }
 0x4dc   :  { %v10293_v4 = vpop.eup %10292 }
 0x4dd   :  { %v11544_v3 = vmul.f32 %v10293_v4, %v10291_v8  ;;  %v11600_v8 = vld [vmem:[#allocation12 + $0x6c] ss:$16 sps:$4 sm:$0xff]   ;;  %v11606_v4 = vld [vmem:[#allocation12 + $0x60] ss:$16 sps:$4 sm:$0xff]  }
 0x4df   :  { %v9398_v9 = vpack.c.bf16 %v11544_v3, %v11544_v3 }
 0x4e1   :  { %4077 = vmatprep.mubr.bf16.mxu0 %v9398_v9  ;;  %4118 = vmatprep.mubr.bf16.mxu1 %v9398_v9  ;;  %v11608_v9 = vld [vmem:[#allocation12 + $0x68] ss:$16 sps:$4 sm:$0xff]  }
 0x4e6   :  { %v3577_v10 = vpop.f32.mrf.mxu0  ;;  %v3618_v1 = vpop.f32.mrf.mxu1 }
 0x4e7   :  { %v3578_v11 = vadd.f32 %v3577_v10, %v12996_v6  ;;  %v3619_v21 = vadd.f32 %v3618_v1, %v10888_v7  ;;  %v11612_v10 = vld [vmem:[#allocation12 + $0x44] ss:$16 sps:$4 sm:$0xff]   ;;  %v11614_v1 = vld [vmem:[#allocation12 + $0x4c] ss:$16 sps:$4 sm:$0xff]  }
 0x4e8   :  { %v3579_v61 = vpop.f32.mrf.mxu0  ;;  %v3620_v36 = vpop.f32.mrf.mxu1 }
 0x4e9   :  { %v8704_v12 = vmul.f32 -1.442695, %v3578_v11  ;;  %v3580_v2 = vadd.f32 %v3579_v61, %v12997_v15  ;;  %v3621_v0 = vadd.f32 %v3620_v36, %v10884_v13  ;;  %v11618_v11 = vld [vmem:[#allocation12 + $0x40] ss:$16 sps:$4 sm:$0xff]   ;;  %v11620_v61 = vld [vmem:[#allocation12 + $0x48] ss:$16 sps:$4 sm:$0xff]  }
 0x4ea   :  { %v3581_v60 = vpop.f32.mrf.mxu0  ;;  %v3622_v14 = vpop.f32.mrf.mxu1  ;;  %v11624_v36 = vld [vmem:[#allocation12 + $0x24] ss:$16 sps:$4 sm:$0xff]  }
 0x4eb   :  { %10294 = vpow2.f32 %v8704_v12  ;;  %v8705_v16 = vmul.f32 -1.442695, %v3580_v2  ;;  %v8706_v19 = vmul.f32 -1.442695, %v3621_v0  ;;  %v11626_v12 = vld [vmem:[#allocation12 + $0x2c] ss:$16 sps:$4 sm:$0xff]  }
 0x4ec   :  { %v3582_v17 = vpop.f32.mrf.mxu0  ;;  %v3623_v18 = vpop.f32.mrf.mxu1  ;;  %v11630_v2 = vld [vmem:[#allocation12 + $0x20] ss:$16 sps:$4 sm:$0xff]   ;;  %v11632_v60 = vld [vmem:[#allocation12 + $0x28] ss:$16 sps:$4 sm:$0xff]   ;;  %v11636_v14 = vld [vmem:[#allocation12 + $0x4] ss:$16 sps:$4 sm:$0xff]  }
 0x4ed   :  { %10296 = vpow2.f32 %v8705_v16  ;;  %v11638_v16 = vld [vmem:[#allocation12 + $0xc] ss:$16 sps:$4 sm:$0xff]   ;;  %v11642_v17 = vld [vmem:[#allocation12] ss:$16 sps:$4 sm:$0xff]   ;;  %v11644_v18 = vld [vmem:[#allocation12 + $0x8] ss:$16 sps:$4 sm:$0xff]  }
 0x4ee   :  { %10298 = vpow2.f32 %v8706_v19  ;;  %v11648_v0 = vld [vmem:[#allocation12 + $0x1e4] ss:$16 sps:$4 sm:$0xff]   ;;  %v11650_v19 = vld [vmem:[#allocation12 + $0x1ec] ss:$16 sps:$4 sm:$0xff]  }
 0x4f8   :  { %v10295_v20 = vpop.eup %10294 }
 0x4f9   :  { %v3628_v22 = vadd.f32 1.0, %v10295_v20  ;;  %v11654_v20 = vld [vmem:[#allocation12 + $0x1e0] ss:$16 sps:$4 sm:$0xff]  }
 0x4fa   :  { %v10297_v23 = vpop.eup %10296 }
 0x4fb   :  { %10300 = vrcp.f32 %v3628_v22  ;;  %v3634_v26 = vadd.f32 1.0, %v10297_v23  ;;  %v10299_v27 = vpop.eup %10298  ;;  %v11660_v22 = vld [vmem:[#allocation12 + $0x1c4] ss:$16 sps:$4 sm:$0xff]   ;;  %v11662_v23 = vld [vmem:[#allocation12 + $0x1cc] ss:$16 sps:$4 sm:$0xff]  }
 0x4fc   :  { %10302 = vtanh.f32 %v3619_v21  ;;  %v3641_v42 = vadd.f32 1.0, %v10299_v27  ;;  %v11656_v21 = vld [vmem:[#allocation12 + $0x1e8] ss:$16 sps:$4 sm:$0xff]  }
 0x4fd   :  { %10304 = vrcp.f32 %v3634_v26  ;;  %v11666_v26 = vld [vmem:[#allocation12 + $0x1c0] ss:$16 sps:$4 sm:$0xff]   ;;  %v11668_v27 = vld [vmem:[#allocation12 + $0x1c8] ss:$16 sps:$4 sm:$0xff]  }
 0x4fe   :  { %10306 = vrcp.f32 %v3641_v42  ;;  %13178 = vst [vmem:[#allocation22_spill] sm:$0xff] %v11666_v26  ;;  %13179 = vst [vmem:[#allocation23_spill] sm:$0xff] %v11668_v27  ;;  %v11680_v42 = vld [vmem:[#allocation12 + $0x1a8] ss:$16 sps:$4 sm:$0xff]  }
 0x4ff   :  { %13183 = vst [vmem:[#allocation27_spill] sm:$0xff] %v11680_v42 }
 0x508   :  { %v10301_v41 = vpop.eup %10300 }
 0x509   :  { %v10303_v29 = vpop.eup %10302 }
 0x50a   :  { %v10305_v25 = vpop.eup %10304  ;;  %v3645_v37 = vmul.f32 %v10303_v29, %v10301_v41  ;;  %v11672_v41 = vld [vmem:[#allocation12 + $0x1a4] ss:$16 sps:$4 sm:$0xff]   ;;  %v11674_v29 = vld [vmem:[#allocation12 + $0x1ac] ss:$16 sps:$4 sm:$0xff]  }
 0x50b   :  { %v3644_v38 = vmul.f32 %v10305_v25, %v11401_v5  ;;  %v10307_v34 = vpop.eup %10306  ;;  %v11566_v5 = vld [vmem:[#allocation12 + $0xc0] ss:$16 sps:$4 sm:$0xff]   ;;  %13180 = vst [vmem:[#allocation24_spill] sm:$0xff] %v11672_v41  ;;  %13181 = vst [vmem:[#allocation25_spill] sm:$0xff] %v11674_v29 }
 0x50c   :  { %v11678_v25 = vld [vmem:[#allocation12 + $0x1a0] ss:$16 sps:$4 sm:$0xff]  }
 0x50d   :  { %v11553_v33 = vadd.f32 %v3645_v37, %v3644_v38  ;;  %13182 = vst [vmem:[#allocation26_spill] sm:$0xff] %v11678_v25  ;;  %v11684_v37 = vld [vmem:[#allocation12 + $0x184] ss:$16 sps:$4 sm:$0xff]   ;;  %v11686_v38 = vld [vmem:[#allocation12 + $0x18c] ss:$16 sps:$4 sm:$0xff]  }
 0x50e   :  { %13184 = vst [vmem:[#allocation28_spill] sm:$0xff] %v11684_v37  ;;  %13185 = vst [vmem:[#allocation29_spill] sm:$0xff] %v11686_v38 }
 0x50f   :  { %10308 = vtanh.f32 %v11553_v33 }
 0x51c   :  { %v10309_v45 = vpop.eup %10308 }
 0x51d   :  { %v3648_v55 = vmul.f32 %v10309_v45, %v10307_v34  ;;  %v11690_v34 = vld [vmem:[#allocation12 + $0x180] ss:$16 sps:$4 sm:$0xff]   ;;  %v11692_v45 = vld [vmem:[#allocation12 + $0x188] ss:$16 sps:$4 sm:$0xff]  }
 0x51e   :  { %13186 = vst [vmem:[#allocation30_spill] sm:$0xff] %v11690_v34  ;;  %13187 = vst [vmem:[#allocation31_spill] sm:$0xff] %v11692_v45 }
 0x51f   :  { %v3649_v63 = vpack.c.bf16 %v3648_v55, %v3648_v55  ;;  %v11696_v55 = vld [vmem:[#allocation12 + $0x164] ss:$16 sps:$4 sm:$0xff]  }
 0x520   :  { %13188 = vst [vmem:[#allocation32_spill] sm:$0xff] %v11696_v55 }
 0x521   :  { %4078 = vmatmul.mubr.bf16.vlgmr.msra.gmra.mxu0 %v3649_v63  ;;  %4156 = vst [vmem:[#allocation6 + $0x4] sm:$0xf] %v3649_v63  ;;  %4119 = vmatmul.mubr.bf16.vlgmr.msra.gmra.mxu1 %v3649_v63  ;;  %v11698_v63 = vld [vmem:[#allocation12 + $0x16c] ss:$16 sps:$4 sm:$0xff]  }
 0x522   :  { %4550 = vmatpush1.bf16.msra.mxu0 %v11556_v35  ;;  %4591 = vmatpush1.bf16.msra.mxu1 %v11558_v31  ;;  %13189 = vst [vmem:[#allocation33_spill] sm:$0xff] %v11698_v63 }
 0x523   :  { %4551 = vmatprep.subr.bf16.mxu0 %v11560_v59  ;;  %4592 = vmatprep.subr.bf16.mxu1 %v11562_v39 }
 0x526   :  { %4552 = vmatpush1.bf16.msra.mxu0 %v11566_v5  ;;  %4593 = vmatpush1.bf16.msra.mxu1 %v11568_v40 }
 0x527   :  { %4553 = vmatprep.subr.bf16.mxu0 %v11572_v43  ;;  %4594 = vmatprep.subr.bf16.mxu1 %v11574_v44 }
 0x528   :  { %v11584_v50 = vld [vmem:[#allocation6] sm:$0xff] }
 0x529   :  { %v8777_v53 = vcombine.high %v11584_v50, %v11584_v50  ;;  %5161 = vst [vmem:[#allocation6] sm:$0xf] %v5160_v58  ;;  %v11702_v58 = vld [vmem:[#allocation12 + $0x160] ss:$16 sps:$4 sm:$0xff]  }
 0x52a   :  { %4554 = vmatpush1.bf16.msra.mxu0 %v11578_v47  ;;  %4595 = vmatpush1.bf16.msra.mxu1 %v11580_v48  ;;  %13190 = vst [vmem:[#allocation34_spill] sm:$0xff] %v11702_v58 }
 0x52b   :  { %4581 = vmatprep.mubr.bf16.mxu0 %v8777_v53  ;;  %4622 = vmatprep.mubr.bf16.mxu1 %v8777_v53  ;;  %v11704_v53 = vld [vmem:[#allocation12 + $0x168] ss:$16 sps:$4 sm:$0xff]  }
 0x52c   :  { %4555 = vmatprep.subr.bf16.mxu0 %v11586_v51  ;;  %4596 = vmatprep.subr.bf16.mxu1 %v11588_v52  ;;  %13191 = vst [vmem:[#allocation35_spill] sm:$0xff] %v11704_v53 }
 0x52e   :  { %4556 = vmatpush1.bf16.msra.mxu0 %v11594_v54  ;;  %4597 = vmatpush1.bf16.msra.mxu1 %v11596_v56 }
 0x52f   :  { %4557 = vmatprep.subr.bf16.mxu0 %v11598_v57  ;;  %4598 = vmatprep.subr.bf16.mxu1 %v11600_v8 }
 0x532   :  { %4558 = vmatpush1.bf16.msra.mxu0 %v11606_v4  ;;  %4599 = vmatpush1.bf16.msra.mxu1 %v11608_v9 }
 0x533   :  { %4559 = vmatprep.subr.bf16.mxu0 %v11612_v10  ;;  %4600 = vmatprep.subr.bf16.mxu1 %v11614_v1 }
 0x536   :  { %4560 = vmatpush1.bf16.msra.mxu0 %v11618_v11  ;;  %4601 = vmatpush1.bf16.msra.mxu1 %v11620_v61 }
 0x537   :  { %4561 = vmatprep.subr.bf16.mxu0 %v11624_v36  ;;  %4602 = vmatprep.subr.bf16.mxu1 %v11626_v12 }
 0x53a   :  { %4562 = vmatpush1.bf16.msra.mxu0 %v11630_v2  ;;  %4603 = vmatpush1.bf16.msra.mxu1 %v11632_v60 }
 0x53b   :  { %4563 = vmatprep.subr.bf16.mxu0 %v11636_v14  ;;  %4604 = vmatprep.subr.bf16.mxu1 %v11638_v16 }
 0x53e   :  { %4564 = vmatpush1.bf16.msra.mxu0 %v11642_v17  ;;  %4605 = vmatpush1.bf16.msra.mxu1 %v11644_v18 }
 0x53f   :  { %4565 = vmatprep.subr.bf16.mxu0 %v11648_v0  ;;  %4606 = vmatprep.subr.bf16.mxu1 %v11650_v19 }
 0x542   :  { %4566 = vmatpush2.bf16.msra.mxu0 %v11654_v20  ;;  %4607 = vmatpush2.bf16.msra.mxu1 %v11656_v21 }
 0x543   :  { %4567 = vmatprep.subr.bf16.mxu0 %v11660_v22  ;;  %4608 = vmatprep.subr.bf16.mxu1 %v11662_v23 }
 0x546   :  { %4568 = vmatpush2.bf16.msra.mxu0 %v11666_v26  ;;  %4609 = vmatpush2.bf16.msra.mxu1 %v11668_v27 }
 0x547   :  { %4569 = vmatprep.subr.bf16.mxu0 %v11672_v41  ;;  %4610 = vmatprep.subr.bf16.mxu1 %v11674_v29 }
 0x54a   :  { %4570 = vmatpush2.bf16.msra.mxu0 %v11678_v25  ;;  %4611 = vmatpush2.bf16.msra.mxu1 %v11680_v42  ;;  %v11708_v42 = vld [vmem:[#allocation12 + $0x144] ss:$16 sps:$4 sm:$0xff]  }
 0x54b   :  { %4571 = vmatprep.subr.bf16.mxu0 %v11684_v37  ;;  %4612 = vmatprep.subr.bf16.mxu1 %v11686_v38  ;;  %13192 = vst [vmem:[#allocation36_spill] sm:$0xff] %v11708_v42  ;;  %v11710_v37 = vld [vmem:[#allocation12 + $0x14c] ss:$16 sps:$4 sm:$0xff]   ;;  %v11714_v38 = vld [vmem:[#allocation12 + $0x140] ss:$16 sps:$4 sm:$0xff]  }
 0x54c   :  { %13193 = vst [vmem:[#allocation37_spill] sm:$0xff] %v11710_v37  ;;  %13194 = vst [vmem:[#allocation38_spill] sm:$0xff] %v11714_v38 }
 0x54e   :  { %4572 = vmatpush2.bf16.msra.mxu0 %v11690_v34  ;;  %4613 = vmatpush2.bf16.msra.mxu1 %v11692_v45  ;;  %v11716_v34 = vld [vmem:[#allocation12 + $0x148] ss:$16 sps:$4 sm:$0xff]   ;;  %v11720_v45 = vld [vmem:[#allocation12 + $0x124] ss:$16 sps:$4 sm:$0xff]  }
 0x54f   :  { %4573 = vmatprep.subr.bf16.mxu0 %v11696_v55  ;;  %4614 = vmatprep.subr.bf16.mxu1 %v11698_v63  ;;  %13195 = vst [vmem:[#allocation39_spill] sm:$0xff] %v11716_v34  ;;  %13196 = vst [vmem:[#allocation40_spill] sm:$0xff] %v11720_v45  ;;  %v11722_v55 = vld [vmem:[#allocation12 + $0x12c] ss:$16 sps:$4 sm:$0xff]   ;;  %v11726_v63 = vld [vmem:[#allocation12 + $0x120] ss:$16 sps:$4 sm:$0xff]  }
 0x550   :  { %13197 = vst [vmem:[#allocation41_spill] sm:$0xff] %v11722_v55  ;;  %13198 = vst [vmem:[#allocation42_spill] sm:$0xff] %v11726_v63 }
 0x552   :  { %4574 = vmatpush2.bf16.msra.mxu0 %v11702_v58  ;;  %4615 = vmatpush2.bf16.msra.mxu1 %v11704_v53  ;;  %v11728_v58 = vld [vmem:[#allocation12 + $0x128] ss:$16 sps:$4 sm:$0xff]   ;;  %v11732_v53 = vld [vmem:[#allocation12 + $0x104] ss:$16 sps:$4 sm:$0xff]  }
 0x553   :  { %4575 = vmatprep.subr.bf16.mxu0 %v11708_v42  ;;  %4616 = vmatprep.subr.bf16.mxu1 %v11710_v37  ;;  %13199 = vst [vmem:[#allocation43_spill] sm:$0xff] %v11728_v58  ;;  %13200 = vst [vmem:[#allocation44_spill] sm:$0xff] %v11732_v53  ;;  %v11734_v42 = vld [vmem:[#allocation12 + $0x10c] ss:$16 sps:$4 sm:$0xff]   ;;  %v11738_v37 = vld [vmem:[#allocation12 + $0x100] ss:$16 sps:$4 sm:$0xff]  }
 0x554   :  { %13201 = vst [vmem:[#allocation45_spill] sm:$0xff] %v11734_v42  ;;  %13202 = vst [vmem:[#allocation46_spill] sm:$0xff] %v11738_v37 }
 0x556   :  { %4576 = vmatpush2.bf16.msra.mxu0 %v11714_v38  ;;  %4617 = vmatpush2.bf16.msra.mxu1 %v11716_v34  ;;  %v11740_v38 = vld [vmem:[#allocation12 + $0x108] ss:$16 sps:$4 sm:$0xff]   ;;  %v11754_v34 = vld [vmem:[#allocation15 + $0xec] ss:$16 sps:$4 sm:$0xff]  }
 0x557   :  { %4577 = vmatprep.subr.bf16.mxu0 %v11720_v45  ;;  %4618 = vmatprep.subr.bf16.mxu1 %v11722_v55  ;;  %13203 = vst [vmem:[#allocation47_spill] sm:$0xff] %v11740_v38  ;;  %v8776_v55 = vcombine.low %v11584_v50, %v11584_v50  ;;  %v11752_v45 = vld [vmem:[#allocation15 + $0xe8] ss:$16 sps:$4 sm:$0xff]   ;;  %13207 = vst [vmem:[#allocation50_spill] sm:$0xff] %v11754_v34  ;;  %v11762_v50 = vld [vmem:[#allocation15 + $0xc4] ss:$16 sps:$4 sm:$0xff]  }
 0x558   :  { %13206 = vst [vmem:[#allocation48_spill] sm:$0xff] %v11752_v45  ;;  %13209 = vst [vmem:[#allocation55_spill] sm:$0xff] %v11762_v50 }
 0x55a   :  { %4578 = vmatpush2.bf16.msra.mxu0 %v11726_v63  ;;  %4619 = vmatpush2.bf16.msra.mxu1 %v11728_v58  ;;  %v11748_v63 = vld [vmem:[#allocation15 + $0xe0] ss:$16 sps:$4 sm:$0xff]   ;;  %v11750_v58 = vld [vmem:[#allocation15 + $0xe4] ss:$16 sps:$4 sm:$0xff]  }
 0x55b   :  { %4579 = vmatprep.subr.bf16.mxu0 %v11732_v53  ;;  %4620 = vmatprep.subr.bf16.mxu1 %v11734_v42  ;;  %13204 = vst [vmem:[#allocation49_spill] sm:$0xff] %v11748_v63  ;;  %13205 = vst [vmem:[#allocation51_spill] sm:$0xff] %v11750_v58  ;;  %v11890_v42 = vld [vmem:[#allocation15 + $0x164] ss:$16 sps:$4 sm:$0xff]   ;;  %v11903_v53 = vld [vmem:[#allocation15 + $0x14c] ss:$16 sps:$4 sm:$0xff]  }
 0x55c   :  { %13252 = vst [vmem:[#allocation96_spill] sm:$0xff] %v11890_v42  ;;  %13257 = vst [vmem:[#allocation101_spill] sm:$0xff] %v11903_v53 }
 0x55e   :  { %4580 = vmatpush2.bf16.msra.mxu0 %v11738_v37  ;;  %4621 = vmatpush2.bf16.msra.mxu1 %v11740_v38  ;;  %v11760_v38 = vld [vmem:[#allocation15 + $0xc0] ss:$16 sps:$4 sm:$0xff]   ;;  %v11766_v37 = vld [vmem:[#allocation15 + $0xcc] ss:$16 sps:$4 sm:$0xff]  }
 0x55f   :  { %5051 = vmatprep.subr.bf16.mxu0 %v11750_v58  ;;  %5092 = vmatprep.subr.bf16.mxu1 %v11754_v34  ;;  %13208 = vst [vmem:[#allocation53_spill] sm:$0xff] %v11760_v38  ;;  %13211 = vst [vmem:[#allocation54_spill] sm:$0xff] %v11766_v37  ;;  %v11772_v34 = vld [vmem:[#allocation15 + $0xa4] ss:$16 sps:$4 sm:$0xff]   ;;  %v11778_v58 = vld [vmem:[#allocation15 + $0xa8] ss:$16 sps:$4 sm:$0xff]  }
 0x560   :  { %13212 = vst [vmem:[#allocation56_spill] sm:$0xff] %v11772_v34  ;;  %13215 = vst [vmem:[#allocation59_spill] sm:$0xff] %v11778_v58 }
 0x561   :  { %4582 = vmatmul.mubr.bf16.vlgmr.msra.gmra.mxu0 %v8776_v55  ;;  %4623 = vmatmul.mubr.bf16.vlgmr.msra.gmra.mxu1 %v8776_v55  ;;  %v11764_v55 = vld [vmem:[#allocation15 + $0xc8] ss:$16 sps:$4 sm:$0xff]  }
 0x562   :  { %5052 = vmatpush1.bf16.msra.mxu0 %v11748_v63  ;;  %5093 = vmatpush1.bf16.msra.mxu1 %v11752_v45  ;;  %13210 = vst [vmem:[#allocation52_spill] sm:$0xff] %v11764_v55  ;;  %v11774_v63 = vld [vmem:[#allocation15 + $0xac] ss:$16 sps:$4 sm:$0xff]   ;;  %v11776_v45 = vld [vmem:[#allocation15 + $0xa0] ss:$16 sps:$4 sm:$0xff]  }
 0x563   :  { %5053 = vmatprep.subr.bf16.mxu0 %v11762_v50  ;;  %5094 = vmatprep.subr.bf16.mxu1 %v11766_v37  ;;  %13213 = vst [vmem:[#allocation57_spill] sm:$0xff] %v11774_v63  ;;  %13214 = vst [vmem:[#allocation58_spill] sm:$0xff] %v11776_v45  ;;  %v11784_v37 = vld [vmem:[#allocation15 + $0x84] ss:$16 sps:$4 sm:$0xff]   ;;  %v11790_v50 = vld [vmem:[#allocation15 + $0x88] ss:$16 sps:$4 sm:$0xff]  }
 0x564   :  { %13216 = vst [vmem:[#allocation60_spill] sm:$0xff] %v11784_v37  ;;  %13219 = vst [vmem:[#allocation63_spill] sm:$0xff] %v11790_v50 }
 0x566   :  { %5054 = vmatpush1.bf16.msra.mxu0 %v11760_v38  ;;  %5095 = vmatpush1.bf16.msra.mxu1 %v11764_v55  ;;  %v11786_v38 = vld [vmem:[#allocation15 + $0x8c] ss:$16 sps:$4 sm:$0xff]   ;;  %v11788_v55 = vld [vmem:[#allocation15 + $0x80] ss:$16 sps:$4 sm:$0xff]  }
 0x567   :  { %5055 = vmatprep.subr.bf16.mxu0 %v11772_v34  ;;  %5096 = vmatprep.subr.bf16.mxu1 %v11774_v63  ;;  %13217 = vst [vmem:[#allocation61_spill] sm:$0xff] %v11786_v38  ;;  %13218 = vst [vmem:[#allocation62_spill] sm:$0xff] %v11788_v55  ;;  %v11796_v63 = vld [vmem:[#allocation15 + $0x64] ss:$16 sps:$4 sm:$0xff]   ;;  %v11802_v34 = vld [vmem:[#allocation15 + $0x68] ss:$16 sps:$4 sm:$0xff]  }
 0x568   :  { %13220 = vst [vmem:[#allocation64_spill] sm:$0xff] %v11796_v63  ;;  %13223 = vst [vmem:[#allocation67_spill] sm:$0xff] %v11802_v34 }
 0x56a   :  { %5056 = vmatpush1.bf16.msra.mxu0 %v11776_v45  ;;  %5097 = vmatpush1.bf16.msra.mxu1 %v11778_v58  ;;  %v11798_v45 = vld [vmem:[#allocation15 + $0x6c] ss:$16 sps:$4 sm:$0xff]   ;;  %v11800_v58 = vld [vmem:[#allocation15 + $0x60] ss:$16 sps:$4 sm:$0xff]  }
 0x56b   :  { %5057 = vmatprep.subr.bf16.mxu0 %v11784_v37  ;;  %5098 = vmatprep.subr.bf16.mxu1 %v11786_v38  ;;  %13221 = vst [vmem:[#allocation65_spill] sm:$0xff] %v11798_v45  ;;  %13222 = vst [vmem:[#allocation66_spill] sm:$0xff] %v11800_v58  ;;  %v11808_v38 = vld [vmem:[#allocation15 + $0x44] ss:$16 sps:$4 sm:$0xff]   ;;  %v11814_v37 = vld [vmem:[#allocation15 + $0x48] ss:$16 sps:$4 sm:$0xff]  }
 0x56c   :  { %13224 = vst [vmem:[#allocation68_spill] sm:$0xff] %v11808_v38  ;;  %13227 = vst [vmem:[#allocation71_spill] sm:$0xff] %v11814_v37 }
 0x56e   :  { %5058 = vmatpush1.bf16.msra.mxu0 %v11788_v55  ;;  %5099 = vmatpush1.bf16.msra.mxu1 %v11790_v50  ;;  %v11810_v55 = vld [vmem:[#allocation15 + $0x4c] ss:$16 sps:$4 sm:$0xff]   ;;  %v11812_v50 = vld [vmem:[#allocation15 + $0x40] ss:$16 sps:$4 sm:$0xff]  }
 0x56f   :  { %5059 = vmatprep.subr.bf16.mxu0 %v11796_v63  ;;  %5100 = vmatprep.subr.bf16.mxu1 %v11798_v45  ;;  %13225 = vst [vmem:[#allocation69_spill] sm:$0xff] %v11810_v55  ;;  %13226 = vst [vmem:[#allocation70_spill] sm:$0xff] %v11812_v50  ;;  %v11820_v45 = vld [vmem:[#allocation15 + $0x24] ss:$16 sps:$4 sm:$0xff]   ;;  %v11826_v63 = vld [vmem:[#allocation15 + $0x28] ss:$16 sps:$4 sm:$0xff]  }
 0x570   :  { %13228 = vst [vmem:[#allocation72_spill] sm:$0xff] %v11820_v45  ;;  %13231 = vst [vmem:[#allocation75_spill] sm:$0xff] %v11826_v63 }
 0x572   :  { %5060 = vmatpush1.bf16.msra.mxu0 %v11800_v58  ;;  %5101 = vmatpush1.bf16.msra.mxu1 %v11802_v34  ;;  %v11822_v58 = vld [vmem:[#allocation15 + $0x2c] ss:$16 sps:$4 sm:$0xff]   ;;  %v11824_v34 = vld [vmem:[#allocation15 + $0x20] ss:$16 sps:$4 sm:$0xff]  }
 0x573   :  { %5061 = vmatprep.subr.bf16.mxu0 %v11808_v38  ;;  %5102 = vmatprep.subr.bf16.mxu1 %v11810_v55  ;;  %13229 = vst [vmem:[#allocation73_spill] sm:$0xff] %v11822_v58  ;;  %13230 = vst [vmem:[#allocation74_spill] sm:$0xff] %v11824_v34  ;;  %v11832_v55 = vld [vmem:[#allocation15 + $0x4] ss:$16 sps:$4 sm:$0xff]   ;;  %v11838_v38 = vld [vmem:[#allocation15 + $0x8] ss:$16 sps:$4 sm:$0xff]  }
 0x574   :  { %13232 = vst [vmem:[#allocation76_spill] sm:$0xff] %v11832_v55  ;;  %13235 = vst [vmem:[#allocation79_spill] sm:$0xff] %v11838_v38 }
 0x576   :  { %5062 = vmatpush1.bf16.msra.mxu0 %v11812_v50  ;;  %5103 = vmatpush1.bf16.msra.mxu1 %v11814_v37  ;;  %v11834_v50 = vld [vmem:[#allocation15 + $0xc] ss:$16 sps:$4 sm:$0xff]   ;;  %v11836_v37 = vld [vmem:[#allocation15] ss:$16 sps:$4 sm:$0xff]  }
 0x577   :  { %5063 = vmatprep.subr.bf16.mxu0 %v11820_v45  ;;  %5104 = vmatprep.subr.bf16.mxu1 %v11822_v58  ;;  %13233 = vst [vmem:[#allocation77_spill] sm:$0xff] %v11834_v50  ;;  %13234 = vst [vmem:[#allocation78_spill] sm:$0xff] %v11836_v37  ;;  %v11844_v58 = vld [vmem:[#allocation15 + $0x1e4] ss:$16 sps:$4 sm:$0xff]   ;;  %v11850_v45 = vld [vmem:[#allocation15 + $0x1e8] ss:$16 sps:$4 sm:$0xff]  }
 0x578   :  { %13236 = vst [vmem:[#allocation80_spill] sm:$0xff] %v11844_v58  ;;  %13239 = vst [vmem:[#allocation83_spill] sm:$0xff] %v11850_v45 }
 0x57a   :  { %5064 = vmatpush1.bf16.msra.mxu0 %v11824_v34  ;;  %5105 = vmatpush1.bf16.msra.mxu1 %v11826_v63  ;;  %v11846_v34 = vld [vmem:[#allocation15 + $0x1ec] ss:$16 sps:$4 sm:$0xff]   ;;  %v11848_v63 = vld [vmem:[#allocation15 + $0x1e0] ss:$16 sps:$4 sm:$0xff]  }
 0x57b   :  { %5065 = vmatprep.subr.bf16.mxu0 %v11832_v55  ;;  %5106 = vmatprep.subr.bf16.mxu1 %v11834_v50  ;;  %13237 = vst [vmem:[#allocation81_spill] sm:$0xff] %v11846_v34  ;;  %13238 = vst [vmem:[#allocation82_spill] sm:$0xff] %v11848_v63  ;;  %v11856_v50 = vld [vmem:[#allocation15 + $0x1c4] ss:$16 sps:$4 sm:$0xff]   ;;  %v11862_v55 = vld [vmem:[#allocation15 + $0x1c8] ss:$16 sps:$4 sm:$0xff]  }
 0x57c   :  { %13240 = vst [vmem:[#allocation84_spill] sm:$0xff] %v11856_v50  ;;  %13243 = vst [vmem:[#allocation87_spill] sm:$0xff] %v11862_v55 }
 0x57e   :  { %5066 = vmatpush1.bf16.msra.mxu0 %v11836_v37  ;;  %5107 = vmatpush1.bf16.msra.mxu1 %v11838_v38  ;;  %v11858_v37 = vld [vmem:[#allocation15 + $0x1cc] ss:$16 sps:$4 sm:$0xff]   ;;  %v11860_v38 = vld [vmem:[#allocation15 + $0x1c0] ss:$16 sps:$4 sm:$0xff]  }
 0x57f   :  { %5067 = vmatprep.subr.bf16.mxu0 %v11844_v58  ;;  %5108 = vmatprep.subr.bf16.mxu1 %v11846_v34  ;;  %13241 = vst [vmem:[#allocation85_spill] sm:$0xff] %v11858_v37  ;;  %13242 = vst [vmem:[#allocation86_spill] sm:$0xff] %v11860_v38  ;;  %v11868_v34 = vld [vmem:[#allocation15 + $0x1a4] ss:$16 sps:$4 sm:$0xff]   ;;  %v11874_v58 = vld [vmem:[#allocation15 + $0x1a8] ss:$16 sps:$4 sm:$0xff]  }
 0x580   :  { %13244 = vst [vmem:[#allocation88_spill] sm:$0xff] %v11868_v34  ;;  %13247 = vst [vmem:[#allocation91_spill] sm:$0xff] %v11874_v58 }
 0x582   :  { %5068 = vmatpush2.bf16.msra.mxu0 %v11848_v63  ;;  %5109 = vmatpush2.bf16.msra.mxu1 %v11850_v45  ;;  %v11870_v63 = vld [vmem:[#allocation15 + $0x1ac] ss:$16 sps:$4 sm:$0xff]   ;;  %v11872_v45 = vld [vmem:[#allocation15 + $0x1a0] ss:$16 sps:$4 sm:$0xff]  }
 0x583   :  { %5069 = vmatprep.subr.bf16.mxu0 %v11856_v50  ;;  %5110 = vmatprep.subr.bf16.mxu1 %v11858_v37  ;;  %13245 = vst [vmem:[#allocation89_spill] sm:$0xff] %v11870_v63  ;;  %13246 = vst [vmem:[#allocation90_spill] sm:$0xff] %v11872_v45  ;;  %v11880_v37 = vld [vmem:[#allocation15 + $0x184] ss:$16 sps:$4 sm:$0xff]   ;;  %v11886_v50 = vld [vmem:[#allocation15 + $0x188] ss:$16 sps:$4 sm:$0xff]  }
 0x584   :  { %13248 = vst [vmem:[#allocation92_spill] sm:$0xff] %v11880_v37  ;;  %13251 = vst [vmem:[#allocation95_spill] sm:$0xff] %v11886_v50 }
 0x586   :  { %5070 = vmatpush2.bf16.msra.mxu0 %v11860_v38  ;;  %5111 = vmatpush2.bf16.msra.mxu1 %v11862_v55  ;;  %v11882_v38 = vld [vmem:[#allocation15 + $0x18c] ss:$16 sps:$4 sm:$0xff]   ;;  %v11884_v55 = vld [vmem:[#allocation15 + $0x180] ss:$16 sps:$4 sm:$0xff]  }
 0x587   :  { %5071 = vmatprep.subr.bf16.mxu0 %v11868_v34  ;;  %5112 = vmatprep.subr.bf16.mxu1 %v11870_v63  ;;  %13249 = vst [vmem:[#allocation93_spill] sm:$0xff] %v11882_v38  ;;  %13250 = vst [vmem:[#allocation94_spill] sm:$0xff] %v11884_v55  ;;  %v11898_v63 = vld [vmem:[#allocation15 + $0x16c] ss:$16 sps:$4 sm:$0xff]   ;;  %v11901_v34 = vld [vmem:[#allocation15 + $0x144] ss:$16 sps:$4 sm:$0xff]  }
 0x588   :  { %13255 = vst [vmem:[#allocation98_spill] sm:$0xff] %v11898_v63  ;;  %13256 = vst [vmem:[#allocation100_spill] sm:$0xff] %v11901_v34 }
 0x58a   :  { %5072 = vmatpush2.bf16.msra.mxu0 %v11872_v45  ;;  %5113 = vmatpush2.bf16.msra.mxu1 %v11874_v58  ;;  %v11894_v45 = vld [vmem:[#allocation15 + $0x160] ss:$16 sps:$4 sm:$0xff]   ;;  %v11896_v58 = vld [vmem:[#allocation15 + $0x168] ss:$16 sps:$4 sm:$0xff]  }
 0x58b   :  { %5073 = vmatprep.subr.bf16.mxu0 %v11880_v37  ;;  %5114 = vmatprep.subr.bf16.mxu1 %v11882_v38  ;;  %13253 = vst [vmem:[#allocation99_spill] sm:$0xff] %v11894_v45  ;;  %13254 = vst [vmem:[#allocation97_spill] sm:$0xff] %v11896_v58  ;;  %v11914_v38 = vld [vmem:[#allocation15 + $0x124] ss:$16 sps:$4 sm:$0xff]  }
 0x58c   :  { %13260 = vst [vmem:[#allocation104_spill] sm:$0xff] %v11914_v38 }
 0x58e   :  { %5074 = vmatpush2.bf16.msra.mxu0 %v11884_v55  ;;  %5115 = vmatpush2.bf16.msra.mxu1 %v11886_v50  ;;  %v11908_v55 = vld [vmem:[#allocation15 + $0x140] ss:$16 sps:$4 sm:$0xff]   ;;  %v11910_v50 = vld [vmem:[#allocation15 + $0x148] ss:$16 sps:$4 sm:$0xff]  }
 0x58f   :  { %5075 = vmatprep.subr.bf16.mxu0 %v11890_v42  ;;  %5116 = vmatprep.subr.bf16.mxu1 %v11898_v63  ;;  %13258 = vst [vmem:[#allocation102_spill] sm:$0xff] %v11908_v55  ;;  %13259 = vst [vmem:[#allocation103_spill] sm:$0xff] %v11910_v50  ;;  %v11916_v42 = vld [vmem:[#allocation15 + $0x12c] ss:$16 sps:$4 sm:$0xff]   ;;  %v11920_v63 = vld [vmem:[#allocation15 + $0x120] ss:$16 sps:$4 sm:$0xff]  }
 0x590   :  { %13261 = vst [vmem:[#allocation105_spill] sm:$0xff] %v11916_v42  ;;  %13262 = vst [vmem:[#allocation106_spill] sm:$0xff] %v11920_v63 }
 0x592   :  { %5076 = vmatpush2.bf16.msra.mxu0 %v11894_v45  ;;  %5117 = vmatpush2.bf16.msra.mxu1 %v11896_v58  ;;  %v11922_v45 = vld [vmem:[#allocation15 + $0x128] ss:$16 sps:$4 sm:$0xff]   ;;  %v11926_v58 = vld [vmem:[#allocation15 + $0x104] ss:$16 sps:$4 sm:$0xff]  }
 0x593   :  { %5077 = vmatprep.subr.bf16.mxu0 %v11901_v34  ;;  %5118 = vmatprep.subr.bf16.mxu1 %v11903_v53  ;;  %13263 = vst [vmem:[#allocation107_spill] sm:$0xff] %v11922_v45  ;;  %13264 = vst [vmem:[#allocation108_spill] sm:$0xff] %v11926_v58  ;;  %v11928_v34 = vld [vmem:[#allocation15 + $0x10c] ss:$16 sps:$4 sm:$0xff]   ;;  %v11932_v53 = vld [vmem:[#allocation15 + $0x100] ss:$16 sps:$4 sm:$0xff]  }
 0x594   :  { %13265 = vst [vmem:[#allocation109_spill] sm:$0xff] %v11928_v34  ;;  %13266 = vst [vmem:[#allocation110_spill] sm:$0xff] %v11932_v53 }
 0x596   :  { %5078 = vmatpush2.bf16.msra.mxu0 %v11908_v55  ;;  %5119 = vmatpush2.bf16.msra.mxu1 %v11910_v50  ;;  %v11934_v55 = vld [vmem:[#allocation15 + $0x108] ss:$16 sps:$4 sm:$0xff]  }
 0x597   :  { %5079 = vmatprep.subr.bf16.mxu0 %v11914_v38  ;;  %5120 = vmatprep.subr.bf16.mxu1 %v11916_v42  ;;  %13267 = vst [vmem:[#allocation111_spill] sm:$0xff] %v11934_v55 }
 0x59a   :  { %5080 = vmatpush2.bf16.msra.mxu0 %v11920_v63  ;;  %5121 = vmatpush2.bf16.msra.mxu1 %v11922_v45 }
 0x59b   :  { %5081 = vmatprep.subr.bf16.mxu0 %v11926_v58  ;;  %5122 = vmatprep.subr.bf16.mxu1 %v11928_v34 }
 0x59e   :  { %5082 = vmatpush2.bf16.msra.mxu0 %v11932_v53  ;;  %5123 = vmatpush2.bf16.msra.mxu1 %v11934_v55 }
 0x59f   :  { %5555 = vmatprep.subr.bf16.mxu0 %v11530_v24  ;;  %5596 = vmatprep.subr.bf16.mxu1 %v11532_v28 }
 0x5e1   :  { %v4079_v42 = vpop.f32.mrf.mxu0  ;;  %v4120_v63 = vpop.f32.mrf.mxu1 }
 0x5e2   :  { %v4080_v45 = vadd.f32 %v4079_v42, %v10968_v30  ;;  %v4121_v27 = vadd.f32 %v4120_v63, %v10983_v49 }
 0x5e3   :  { %v4081_v38 = vpop.f32.mrf.mxu0  ;;  %v4122_v50 = vpop.f32.mrf.mxu1 }
 0x5e4   :  { %v8773_v37 = vmul.f32 -1.442695, %v4080_v45  ;;  %v4082_v25 = vadd.f32 %v4081_v38, %v10972_v32  ;;  %v4123_v24 = vadd.f32 %v4122_v50, %v10978_v46 }
 0x5e5   :  { %v4083_v58 = vpop.f32.mrf.mxu0  ;;  %v4124_v29 = vpop.f32.mrf.mxu1 }
 0x5e6   :  { %10310 = vpow2.f32 %v8773_v37  ;;  %v8774_v34 = vmul.f32 -1.442695, %v4082_v25  ;;  %v8775_v55 = vmul.f32 -1.442695, %v4123_v24 }
 0x5e7   :  { %v4084_v53 = vpop.f32.mrf.mxu0  ;;  %v4125_v41 = vpop.f32.mrf.mxu1 }
 0x5e8   :  { %10312 = vpow2.f32 %v8774_v34 }
 0x5e9   :  { %10314 = vpow2.f32 %v8775_v55 }
 0x5f3   :  { %v10311_v28 = vpop.eup %10310 }
 0x5f4   :  { %v4130_v26 = vadd.f32 1.0, %v10311_v28 }
 0x5f5   :  { %v10313_v42 = vpop.eup %10312 }
 0x5f6   :  { %10316 = vrcp.f32 %v4130_v26  ;;  %v4136_v45 = vadd.f32 1.0, %v10313_v42  ;;  %v10315_v38 = vpop.eup %10314 }
 0x5f7   :  { %10318 = vtanh.f32 %v4121_v27  ;;  %v4143_v58 = vadd.f32 1.0, %v10315_v38 }
 0x5f8   :  { %10320 = vrcp.f32 %v4136_v45 }
 0x5f9   :  { %10322 = vrcp.f32 %v4143_v58 }
 0x603   :  { %v10317_v29 = vpop.eup %10316 }
 0x604   :  { %v10319_v37 = vpop.eup %10318 }
 0x605   :  { %v10321_v25 = vpop.eup %10320  ;;  %v4147_v41 = vmul.f32 %v10319_v37, %v10317_v29 }
 0x606   :  { %v4146_v34 = vmul.f32 %v10321_v25, %v11541_v62  ;;  %v10323_v63 = vpop.eup %10322 }
 0x608   :  { %v11947_v53 = vadd.f32 %v4147_v41, %v4146_v34 }
 0x60a   :  { %10324 = vtanh.f32 %v11947_v53 }
 0x617   :  { %v10325_v50 = vpop.eup %10324 }
 0x618   :  { %v4150_v55 = vmul.f32 %v10325_v50, %v10323_v63 }
 0x61a   :  { %v9400_v26 = vpack.c.bf16 %v4150_v55, %v4150_v55  ;;  %v9376_v27 = vpack.c.bf16 %v4150_v55, %v11544_v3 }
 0x61c   :  { %5083 = vmatprep.mubr.bf16.mxu0 %v9400_v26  ;;  %9388 = vst [vmem:[#allocation17 + $0x8] sm:$0xff] %v9376_v27   ;;  %5124 = vmatprep.mubr.bf16.mxu1 %v9400_v26 }
 0x621   :  { %v4583_v24 = vpop.f32.mrf.mxu0  ;;  %v4624_v28 = vpop.f32.mrf.mxu1 }
 0x622   :  { %v4584_v42 = vadd.f32 %v4583_v24, %v12996_v6  ;;  %v4625_v55 = vadd.f32 %v4624_v28, %v10888_v7 }
 0x623   :  { %v4585_v45 = vpop.f32.mrf.mxu0  ;;  %v4626_v62 = vpop.f32.mrf.mxu1 }
 0x624   :  { %v8842_v38 = vmul.f32 -1.442695, %v4584_v42  ;;  %v4586_v29 = vadd.f32 %v4585_v45, %v12997_v15  ;;  %v4627_v3 = vadd.f32 %v4626_v62, %v10884_v13 }
 0x625   :  { %v4587_v37 = vpop.f32.mrf.mxu0  ;;  %v4628_v25 = vpop.f32.mrf.mxu1 }
 0x626   :  { %10326 = vpow2.f32 %v8842_v38  ;;  %v8843_v58 = vmul.f32 -1.442695, %v4586_v29  ;;  %v8844_v63 = vmul.f32 -1.442695, %v4627_v3 }
 0x627   :  { %v4588_v41 = vpop.f32.mrf.mxu0  ;;  %v4629_v34 = vpop.f32.mrf.mxu1 }
 0x628   :  { %10328 = vpow2.f32 %v8843_v58 }
 0x629   :  { %10330 = vpow2.f32 %v8844_v63 }
 0x633   :  { %v10327_v50 = vpop.eup %10326 }
 0x634   :  { %v4634_v26 = vadd.f32 1.0, %v10327_v50 }
 0x635   :  { %v10329_v27 = vpop.eup %10328 }
 0x636   :  { %10332 = vrcp.f32 %v4634_v26  ;;  %v4640_v24 = vadd.f32 1.0, %v10329_v27  ;;  %v10331_v42 = vpop.eup %10330  ;;  %v13304_v26 = vld [vmem:[#allocation58_spill] sm:$0xff]  ;;  %v13305_v27 = vld [vmem:[#allocation59_spill] sm:$0xff] }
 0x637   :  { %10334 = vtanh.f32 %v4625_v55  ;;  %v4647_v37 = vadd.f32 1.0, %v10331_v42  ;;  %v13303_v55 = vld [vmem:[#allocation57_spill] sm:$0xff] }
 0x638   :  { %10336 = vrcp.f32 %v4640_v24  ;;  %v13306_v24 = vld [vmem:[#allocation60_spill] sm:$0xff]  ;;  %v13307_v42 = vld [vmem:[#allocation61_spill] sm:$0xff] }
 0x639   :  { %10338 = vrcp.f32 %v4647_v37  ;;  %v13311_v37 = vld [vmem:[#allocation65_spill] sm:$0xff] }
 0x643   :  { %v10333_v45 = vpop.eup %10332 }
 0x644   :  { %v10335_v38 = vpop.eup %10334 }
 0x645   :  { %v10337_v29 = vpop.eup %10336  ;;  %v4651_v25 = vmul.f32 %v10335_v38, %v10333_v45  ;;  %v13308_v45 = vld [vmem:[#allocation62_spill] sm:$0xff]  ;;  %v13309_v38 = vld [vmem:[#allocation63_spill] sm:$0xff] }
 0x646   :  { %v4650_v58 = vmul.f32 %v10337_v29, %v11553_v33  ;;  %v10339_v28 = vpop.eup %10338  ;;  %v6166_v33 = vld [vmem:[#allocation9 + $0x18] sm:$0xf] }
 0x647   :  { %v13310_v29 = vld [vmem:[#allocation64_spill] sm:$0xff] }
 0x648   :  { %v11956_v62 = vadd.f32 %v4651_v25, %v4650_v58  ;;  %v13312_v25 = vld [vmem:[#allocation66_spill] sm:$0xff]  ;;  %v13313_v58 = vld [vmem:[#allocation67_spill] sm:$0xff] }
 0x64a   :  { %10340 = vtanh.f32 %v11956_v62 }
 0x657   :  { %v10341_v41 = vpop.eup %10340 }
 0x658   :  { %v4654_v34 = vmul.f32 %v10341_v41, %v10339_v28  ;;  %v13314_v28 = vld [vmem:[#allocation68_spill] sm:$0xff]  ;;  %v13315_v41 = vld [vmem:[#allocation69_spill] sm:$0xff] }
 0x65a   :  { %v4655_v3 = vpack.c.bf16 %v4654_v34, %v4654_v34  ;;  %v13316_v34 = vld [vmem:[#allocation70_spill] sm:$0xff] }
 0x65c   :  { %5084 = vmatmul.mubr.bf16.vlgmr.msra.gmra.mxu0 %v4655_v3  ;;  %5162 = vst [vmem:[#allocation6 + $0x4] sm:$0xf] %v4655_v3  ;;  %5125 = vmatmul.mubr.bf16.vlgmr.msra.gmra.mxu1 %v4655_v3  ;;  %v13317_v3 = vld [vmem:[#allocation71_spill] sm:$0xff] }
 0x65d   :  { %5556 = vmatpush1.bf16.msra.mxu0 %v11556_v35  ;;  %5597 = vmatpush1.bf16.msra.mxu1 %v11558_v31  ;;  %v13268_v35 = vld [vmem:[#allocation22_spill] sm:$0xff]  ;;  %v13269_v31 = vld [vmem:[#allocation23_spill] sm:$0xff] }
 0x65e   :  { %5557 = vmatprep.subr.bf16.mxu0 %v11560_v59  ;;  %5598 = vmatprep.subr.bf16.mxu1 %v11562_v39  ;;  %v13270_v59 = vld [vmem:[#allocation24_spill] sm:$0xff]  ;;  %v13271_v39 = vld [vmem:[#allocation25_spill] sm:$0xff] }
 0x661   :  { %5558 = vmatpush1.bf16.msra.mxu0 %v11566_v5  ;;  %5599 = vmatpush1.bf16.msra.mxu1 %v11568_v40  ;;  %v13272_v5 = vld [vmem:[#allocation26_spill] sm:$0xff]  ;;  %v13273_v40 = vld [vmem:[#allocation27_spill] sm:$0xff] }
 0x662   :  { %5559 = vmatprep.subr.bf16.mxu0 %v11572_v43  ;;  %5600 = vmatprep.subr.bf16.mxu1 %v11574_v44  ;;  %v13274_v43 = vld [vmem:[#allocation28_spill] sm:$0xff]  ;;  %v13275_v44 = vld [vmem:[#allocation29_spill] sm:$0xff] }
 0x663   :  { %v5163_v63 = vld [vmem:[#allocation6] sm:$0xff] }
 0x664   :  { %v8915_v50 = vcombine.high %v5163_v63, %v5163_v63  ;;  %6167 = vst [vmem:[#allocation6] sm:$0xf] %v6166_v33  ;;  %v13318_v33 = vld [vmem:[#allocation72_spill] sm:$0xff] }
 0x665   :  { %5560 = vmatpush1.bf16.msra.mxu0 %v11578_v47  ;;  %5601 = vmatpush1.bf16.msra.mxu1 %v11580_v48  ;;  %v13276_v47 = vld [vmem:[#allocation30_spill] sm:$0xff]  ;;  %v13277_v48 = vld [vmem:[#allocation31_spill] sm:$0xff] }
 0x666   :  { %5587 = vmatprep.mubr.bf16.mxu0 %v8915_v50  ;;  %5628 = vmatprep.mubr.bf16.mxu1 %v8915_v50  ;;  %v13320_v50 = vld [vmem:[#allocation74_spill] sm:$0xff] }
 0x667   :  { %5561 = vmatprep.subr.bf16.mxu0 %v11586_v51  ;;  %5602 = vmatprep.subr.bf16.mxu1 %v11588_v52  ;;  %v13278_v51 = vld [vmem:[#allocation32_spill] sm:$0xff]  ;;  %v13279_v52 = vld [vmem:[#allocation33_spill] sm:$0xff] }
 0x669   :  { %5562 = vmatpush1.bf16.msra.mxu0 %v11594_v54  ;;  %5603 = vmatpush1.bf16.msra.mxu1 %v11596_v56  ;;  %v13280_v54 = vld [vmem:[#allocation34_spill] sm:$0xff]  ;;  %v13281_v56 = vld [vmem:[#allocation35_spill] sm:$0xff] }
 0x66a   :  { %5563 = vmatprep.subr.bf16.mxu0 %v11598_v57  ;;  %5604 = vmatprep.subr.bf16.mxu1 %v11600_v8  ;;  %v13282_v57 = vld [vmem:[#allocation36_spill] sm:$0xff]  ;;  %v13283_v8 = vld [vmem:[#allocation37_spill] sm:$0xff] }
 0x66d   :  { %5564 = vmatpush1.bf16.msra.mxu0 %v11606_v4  ;;  %5605 = vmatpush1.bf16.msra.mxu1 %v11608_v9  ;;  %v13284_v4 = vld [vmem:[#allocation38_spill] sm:$0xff]  ;;  %v13285_v9 = vld [vmem:[#allocation39_spill] sm:$0xff] }
 0x66e   :  { %5565 = vmatprep.subr.bf16.mxu0 %v11612_v10  ;;  %5606 = vmatprep.subr.bf16.mxu1 %v11614_v1  ;;  %v13286_v10 = vld [vmem:[#allocation40_spill] sm:$0xff]  ;;  %v13287_v1 = vld [vmem:[#allocation41_spill] sm:$0xff] }
 0x671   :  { %5566 = vmatpush1.bf16.msra.mxu0 %v11618_v11  ;;  %5607 = vmatpush1.bf16.msra.mxu1 %v11620_v61  ;;  %v13288_v11 = vld [vmem:[#allocation42_spill] sm:$0xff]  ;;  %v13289_v61 = vld [vmem:[#allocation43_spill] sm:$0xff] }
 0x672   :  { %5567 = vmatprep.subr.bf16.mxu0 %v11624_v36  ;;  %5608 = vmatprep.subr.bf16.mxu1 %v11626_v12  ;;  %v13290_v36 = vld [vmem:[#allocation44_spill] sm:$0xff]  ;;  %v13291_v12 = vld [vmem:[#allocation45_spill] sm:$0xff] }
 0x675   :  { %5568 = vmatpush1.bf16.msra.mxu0 %v11630_v2  ;;  %5609 = vmatpush1.bf16.msra.mxu1 %v11632_v60  ;;  %v13292_v2 = vld [vmem:[#allocation46_spill] sm:$0xff]  ;;  %v13293_v60 = vld [vmem:[#allocation47_spill] sm:$0xff] }
 0x676   :  { %5569 = vmatprep.subr.bf16.mxu0 %v11636_v14  ;;  %5610 = vmatprep.subr.bf16.mxu1 %v11638_v16  ;;  %v8914_v14 = vcombine.low %v5163_v63, %v5163_v63  ;;  %v13294_v16 = vld [vmem:[#allocation51_spill] sm:$0xff]  ;;  %v13319_v63 = vld [vmem:[#allocation73_spill] sm:$0xff] }
 0x679   :  { %5570 = vmatpush1.bf16.msra.mxu0 %v11642_v17  ;;  %5611 = vmatpush1.bf16.msra.mxu1 %v11644_v18  ;;  %v13295_v17 = vld [vmem:[#allocation50_spill] sm:$0xff]  ;;  %v13296_v18 = vld [vmem:[#allocation49_spill] sm:$0xff] }
 0x67a   :  { %5571 = vmatprep.subr.bf16.mxu0 %v11648_v0  ;;  %5612 = vmatprep.subr.bf16.mxu1 %v11650_v19  ;;  %v13297_v0 = vld [vmem:[#allocation48_spill] sm:$0xff]  ;;  %v13298_v19 = vld [vmem:[#allocation55_spill] sm:$0xff] }
 0x67d   :  { %5572 = vmatpush2.bf16.msra.mxu0 %v11654_v20  ;;  %5613 = vmatpush2.bf16.msra.mxu1 %v11656_v21  ;;  %v13299_v20 = vld [vmem:[#allocation54_spill] sm:$0xff]  ;;  %v13300_v21 = vld [vmem:[#allocation53_spill] sm:$0xff] }
 0x67e   :  { %5573 = vmatprep.subr.bf16.mxu0 %v11660_v22  ;;  %5614 = vmatprep.subr.bf16.mxu1 %v11662_v23  ;;  %v13301_v22 = vld [vmem:[#allocation52_spill] sm:$0xff] }
 0x67f   :  { %v13302_v23 = vld [vmem:[#allocation56_spill] sm:$0xff] }
 0x681   :  { %5574 = vmatpush2.bf16.msra.mxu0 %v13268_v35  ;;  %5615 = vmatpush2.bf16.msra.mxu1 %v13269_v31  ;;  %v13321_v35 = vld [vmem:[#allocation75_spill] sm:$0xff]  ;;  %v13322_v31 = vld [vmem:[#allocation76_spill] sm:$0xff] }
 0x682   :  { %5575 = vmatprep.subr.bf16.mxu0 %v13270_v59  ;;  %5616 = vmatprep.subr.bf16.mxu1 %v13271_v39  ;;  %v13323_v59 = vld [vmem:[#allocation77_spill] sm:$0xff]  ;;  %v13324_v39 = vld [vmem:[#allocation78_spill] sm:$0xff] }
 0x685   :  { %5576 = vmatpush2.bf16.msra.mxu0 %v13272_v5  ;;  %5617 = vmatpush2.bf16.msra.mxu1 %v13273_v40  ;;  %v13325_v5 = vld [vmem:[#allocation79_spill] sm:$0xff]  ;;  %v13326_v40 = vld [vmem:[#allocation80_spill] sm:$0xff] }
 0x686   :  { %5577 = vmatprep.subr.bf16.mxu0 %v13274_v43  ;;  %5618 = vmatprep.subr.bf16.mxu1 %v13275_v44  ;;  %v13327_v43 = vld [vmem:[#allocation81_spill] sm:$0xff]  ;;  %v13328_v44 = vld [vmem:[#allocation82_spill] sm:$0xff] }
 0x689   :  { %5578 = vmatpush2.bf16.msra.mxu0 %v13276_v47  ;;  %5619 = vmatpush2.bf16.msra.mxu1 %v13277_v48  ;;  %v13329_v47 = vld [vmem:[#allocation83_spill] sm:$0xff]  ;;  %v13330_v48 = vld [vmem:[#allocation84_spill] sm:$0xff] }
 0x68a   :  { %5579 = vmatprep.subr.bf16.mxu0 %v13278_v51  ;;  %5620 = vmatprep.subr.bf16.mxu1 %v13279_v52  ;;  %v13331_v51 = vld [vmem:[#allocation85_spill] sm:$0xff]  ;;  %v13332_v52 = vld [vmem:[#allocation86_spill] sm:$0xff] }
 0x68d   :  { %5580 = vmatpush2.bf16.msra.mxu0 %v13280_v54  ;;  %5621 = vmatpush2.bf16.msra.mxu1 %v13281_v56  ;;  %v13333_v54 = vld [vmem:[#allocation87_spill] sm:$0xff]  ;;  %v13334_v56 = vld [vmem:[#allocation88_spill] sm:$0xff] }
 0x68e   :  { %5581 = vmatprep.subr.bf16.mxu0 %v13282_v57  ;;  %5622 = vmatprep.subr.bf16.mxu1 %v13283_v8  ;;  %v13335_v57 = vld [vmem:[#allocation89_spill] sm:$0xff]  ;;  %v13336_v8 = vld [vmem:[#allocation90_spill] sm:$0xff] }
 0x691   :  { %5582 = vmatpush2.bf16.msra.mxu0 %v13284_v4  ;;  %5623 = vmatpush2.bf16.msra.mxu1 %v13285_v9  ;;  %v13337_v4 = vld [vmem:[#allocation91_spill] sm:$0xff]  ;;  %v13338_v9 = vld [vmem:[#allocation92_spill] sm:$0xff] }
 0x692   :  { %5583 = vmatprep.subr.bf16.mxu0 %v13286_v10  ;;  %5624 = vmatprep.subr.bf16.mxu1 %v13287_v1  ;;  %v13339_v10 = vld [vmem:[#allocation93_spill] sm:$0xff]  ;;  %v13340_v1 = vld [vmem:[#allocation94_spill] sm:$0xff] }
 0x695   :  { %5584 = vmatpush2.bf16.msra.mxu0 %v13288_v11  ;;  %5625 = vmatpush2.bf16.msra.mxu1 %v13289_v61  ;;  %v13341_v11 = vld [vmem:[#allocation95_spill] sm:$0xff]  ;;  %v13342_v61 = vld [vmem:[#allocation96_spill] sm:$0xff] }
 0x696   :  { %5585 = vmatprep.subr.bf16.mxu0 %v13290_v36  ;;  %5626 = vmatprep.subr.bf16.mxu1 %v13291_v12  ;;  %v13343_v36 = vld [vmem:[#allocation98_spill] sm:$0xff]  ;;  %v13344_v12 = vld [vmem:[#allocation99_spill] sm:$0xff] }
 0x699   :  { %5586 = vmatpush2.bf16.msra.mxu0 %v13292_v2  ;;  %5627 = vmatpush2.bf16.msra.mxu1 %v13293_v60  ;;  %v13345_v2 = vld [vmem:[#allocation97_spill] sm:$0xff]  ;;  %v13346_v60 = vld [vmem:[#allocation100_spill] sm:$0xff] }
 0x69a   :  { %6057 = vmatprep.subr.bf16.mxu0 %v13294_v16  ;;  %6098 = vmatprep.subr.bf16.mxu1 %v13295_v17  ;;  %v13348_v16 = vld [vmem:[#allocation102_spill] sm:$0xff]  ;;  %v13349_v17 = vld [vmem:[#allocation103_spill] sm:$0xff] }
 0x69c   :  { %5588 = vmatmul.mubr.bf16.vlgmr.msra.gmra.mxu0 %v8914_v14  ;;  %5629 = vmatmul.mubr.bf16.vlgmr.msra.gmra.mxu1 %v8914_v14  ;;  %v13347_v14 = vld [vmem:[#allocation101_spill] sm:$0xff] }
 0x69d   :  { %6058 = vmatpush1.bf16.msra.mxu0 %v13296_v18  ;;  %6099 = vmatpush1.bf16.msra.mxu1 %v13297_v0  ;;  %v13350_v18 = vld [vmem:[#allocation104_spill] sm:$0xff]  ;;  %v13351_v0 = vld [vmem:[#allocation105_spill] sm:$0xff] }
 0x69e   :  { %6059 = vmatprep.subr.bf16.mxu0 %v13298_v19  ;;  %6100 = vmatprep.subr.bf16.mxu1 %v13299_v20  ;;  %v13352_v19 = vld [vmem:[#allocation106_spill] sm:$0xff]  ;;  %v13353_v20 = vld [vmem:[#allocation107_spill] sm:$0xff] }
 0x6a1   :  { %6060 = vmatpush1.bf16.msra.mxu0 %v13300_v21  ;;  %6101 = vmatpush1.bf16.msra.mxu1 %v13301_v22  ;;  %v13354_v21 = vld [vmem:[#allocation108_spill] sm:$0xff]  ;;  %v13355_v22 = vld [vmem:[#allocation109_spill] sm:$0xff] }
 0x6a2   :  { %6061 = vmatprep.subr.bf16.mxu0 %v13302_v23  ;;  %6102 = vmatprep.subr.bf16.mxu1 %v13303_v55  ;;  %v13356_v23 = vld [vmem:[#allocation110_spill] sm:$0xff]  ;;  %v13357_v55 = vld [vmem:[#allocation111_spill] sm:$0xff] }
 0x6a5   :  { %6062 = vmatpush1.bf16.msra.mxu0 %v13304_v26  ;;  %6103 = vmatpush1.bf16.msra.mxu1 %v13305_v27  ;;  %v12085_v26 = vld [vmem:[#allocation12 + $0xe4] ss:$16 sps:$4 sm:$0xff]   ;;  %v12087_v27 = vld [vmem:[#allocation12 + $0xec] ss:$16 sps:$4 sm:$0xff]  }
 0x6a6   :  { %6063 = vmatprep.subr.bf16.mxu0 %v13306_v24  ;;  %6104 = vmatprep.subr.bf16.mxu1 %v13307_v42 }
 0x6a9   :  { %6064 = vmatpush1.bf16.msra.mxu0 %v13308_v45  ;;  %6105 = vmatpush1.bf16.msra.mxu1 %v13309_v38 }
 0x6aa   :  { %6065 = vmatprep.subr.bf16.mxu0 %v13310_v29  ;;  %6106 = vmatprep.subr.bf16.mxu1 %v13311_v37 }
 0x6ad   :  { %6066 = vmatpush1.bf16.msra.mxu0 %v13312_v25  ;;  %6107 = vmatpush1.bf16.msra.mxu1 %v13313_v58 }
 0x6ae   :  { %6067 = vmatprep.subr.bf16.mxu0 %v13314_v28  ;;  %6108 = vmatprep.subr.bf16.mxu1 %v13315_v41 }
 0x6b1   :  { %6068 = vmatpush1.bf16.msra.mxu0 %v13316_v34  ;;  %6109 = vmatpush1.bf16.msra.mxu1 %v13317_v3 }
 0x6b2   :  { %6069 = vmatprep.subr.bf16.mxu0 %v13318_v33  ;;  %6110 = vmatprep.subr.bf16.mxu1 %v13319_v63 }
 0x6b5   :  { %6070 = vmatpush1.bf16.msra.mxu0 %v13320_v50  ;;  %6111 = vmatpush1.bf16.msra.mxu1 %v13321_v35 }
 0x6b6   :  { %6071 = vmatprep.subr.bf16.mxu0 %v13322_v31  ;;  %6112 = vmatprep.subr.bf16.mxu1 %v13323_v59 }
 0x6b9   :  { %6072 = vmatpush1.bf16.msra.mxu0 %v13324_v39  ;;  %6113 = vmatpush1.bf16.msra.mxu1 %v13325_v5 }
 0x6ba   :  { %6073 = vmatprep.subr.bf16.mxu0 %v13326_v40  ;;  %6114 = vmatprep.subr.bf16.mxu1 %v13327_v43 }
 0x6bd   :  { %6074 = vmatpush2.bf16.msra.mxu0 %v13328_v44  ;;  %6115 = vmatpush2.bf16.msra.mxu1 %v13329_v47 }
 0x6be   :  { %6075 = vmatprep.subr.bf16.mxu0 %v13330_v48  ;;  %6116 = vmatprep.subr.bf16.mxu1 %v13331_v51 }
 0x6c1   :  { %6076 = vmatpush2.bf16.msra.mxu0 %v13332_v52  ;;  %6117 = vmatpush2.bf16.msra.mxu1 %v13333_v54 }
 0x6c2   :  { %6077 = vmatprep.subr.bf16.mxu0 %v13334_v56  ;;  %6118 = vmatprep.subr.bf16.mxu1 %v13335_v57 }
 0x6c5   :  { %6078 = vmatpush2.bf16.msra.mxu0 %v13336_v8  ;;  %6119 = vmatpush2.bf16.msra.mxu1 %v13337_v4 }
 0x6c6   :  { %6079 = vmatprep.subr.bf16.mxu0 %v13338_v9  ;;  %6120 = vmatprep.subr.bf16.mxu1 %v13339_v10 }
 0x6c9   :  { %6080 = vmatpush2.bf16.msra.mxu0 %v13340_v1  ;;  %6121 = vmatpush2.bf16.msra.mxu1 %v13341_v11 }
 0x6ca   :  { %6081 = vmatprep.subr.bf16.mxu0 %v13342_v61  ;;  %6122 = vmatprep.subr.bf16.mxu1 %v13343_v36 }
 0x6cd   :  { %6082 = vmatpush2.bf16.msra.mxu0 %v13344_v12  ;;  %6123 = vmatpush2.bf16.msra.mxu1 %v13345_v2 }
 0x6ce   :  { %6083 = vmatprep.subr.bf16.mxu0 %v13346_v60  ;;  %6124 = vmatprep.subr.bf16.mxu1 %v13347_v14 }
 0x6d1   :  { %6084 = vmatpush2.bf16.msra.mxu0 %v13348_v16  ;;  %6125 = vmatpush2.bf16.msra.mxu1 %v13349_v17 }
 0x6d2   :  { %6085 = vmatprep.subr.bf16.mxu0 %v13350_v18  ;;  %6126 = vmatprep.subr.bf16.mxu1 %v13351_v0 }
 0x6d5   :  { %6086 = vmatpush2.bf16.msra.mxu0 %v13352_v19  ;;  %6127 = vmatpush2.bf16.msra.mxu1 %v13353_v20 }
 0x6d6   :  { %6087 = vmatprep.subr.bf16.mxu0 %v13354_v21  ;;  %6128 = vmatprep.subr.bf16.mxu1 %v13355_v22 }
 0x6d9   :  { %6088 = vmatpush2.bf16.msra.mxu0 %v13356_v23  ;;  %6129 = vmatpush2.bf16.msra.mxu1 %v13357_v55 }
 0x6da   :  { %6561 = vmatprep.subr.bf16.mxu0 %v12085_v26  ;;  %6602 = vmatprep.subr.bf16.mxu1 %v12087_v27 }
 0x71c   :  { %v5085_v24 = vpop.f32.mrf.mxu0  ;;  %v5126_v42 = vpop.f32.mrf.mxu1 }
 0x71d   :  { %v5086_v45 = vadd.f32 %v5085_v24, %v10968_v30  ;;  %v5127_v35 = vadd.f32 %v5126_v42, %v10983_v49 }
 0x71e   :  { %v5087_v38 = vpop.f32.mrf.mxu0  ;;  %v5128_v29 = vpop.f32.mrf.mxu1 }
 0x71f   :  { %v8911_v37 = vmul.f32 -1.442695, %v5086_v45  ;;  %v5088_v25 = vadd.f32 %v5087_v38, %v10972_v32  ;;  %v5129_v33 = vadd.f32 %v5128_v29, %v10978_v46 }
 0x720   :  { %v5089_v58 = vpop.f32.mrf.mxu0  ;;  %v5130_v28 = vpop.f32.mrf.mxu1 }
 0x721   :  { %10342 = vpow2.f32 %v8911_v37  ;;  %v8912_v41 = vmul.f32 -1.442695, %v5088_v25  ;;  %v8913_v63 = vmul.f32 -1.442695, %v5129_v33  ;;  %v12111_v28 = vld [vmem:[#allocation12 + $0xe0] ss:$16 sps:$4 sm:$0xff]  }
 0x722   :  { %v5090_v34 = vpop.f32.mrf.mxu0  ;;  %v5131_v3 = vpop.f32.mrf.mxu1  ;;  %v12117_v33 = vld [vmem:[#allocation12 + $0xcc] ss:$16 sps:$4 sm:$0xff]  }
 0x723   :  { %10344 = vpow2.f32 %v8912_v41  ;;  %v12113_v41 = vld [vmem:[#allocation12 + $0xe8] ss:$16 sps:$4 sm:$0xff]   ;;  %v12115_v3 = vld [vmem:[#allocation12 + $0xc4] ss:$16 sps:$4 sm:$0xff]  }
 0x724   :  { %10346 = vpow2.f32 %v8913_v63  ;;  %v12123_v63 = vld [vmem:[#allocation12 + $0xc8] ss:$16 sps:$4 sm:$0xff]  }
 0x72e   :  { %v10343_v50 = vpop.eup %10342 }
 0x72f   :  { %v5136_v31 = vadd.f32 1.0, %v10343_v50  ;;  %v12127_v50 = vld [vmem:[#allocation12 + $0xa4] ss:$16 sps:$4 sm:$0xff]  }
 0x730   :  { %v10345_v59 = vpop.eup %10344 }
 0x731   :  { %10348 = vrcp.f32 %v5136_v31  ;;  %v5142_v39 = vadd.f32 1.0, %v10345_v59  ;;  %v10347_v5 = vpop.eup %10346  ;;  %v12133_v31 = vld [vmem:[#allocation12 + $0xa0] ss:$16 sps:$4 sm:$0xff]   ;;  %v12135_v59 = vld [vmem:[#allocation12 + $0xa8] ss:$16 sps:$4 sm:$0xff]  }
 0x732   :  { %10350 = vtanh.f32 %v5127_v35  ;;  %v5149_v47 = vadd.f32 1.0, %v10347_v5  ;;  %v12129_v35 = vld [vmem:[#allocation12 + $0xac] ss:$16 sps:$4 sm:$0xff]  }
 0x733   :  { %10352 = vrcp.f32 %v5142_v39  ;;  %v7172_v39 = vld [vmem:[#allocation9 + $0x1c] sm:$0xf] }
 0x734   :  { %10354 = vrcp.f32 %v5149_v47  ;;  %v12149_v47 = vld [vmem:[#allocation12 + $0x80] ss:$16 sps:$4 sm:$0xff]  }
 0x73e   :  { %v10349_v40 = vpop.eup %10348 }
 0x73f   :  { %v10351_v43 = vpop.eup %10350 }
 0x740   :  { %v10353_v44 = vpop.eup %10352  ;;  %v5153_v48 = vmul.f32 %v10351_v43, %v10349_v40  ;;  %v12141_v40 = vld [vmem:[#allocation12 + $0x84] ss:$16 sps:$4 sm:$0xff]   ;;  %v12143_v43 = vld [vmem:[#allocation12 + $0x8c] ss:$16 sps:$4 sm:$0xff]  }
 0x741   :  { %v5152_v51 = vmul.f32 %v10353_v44, %v11947_v53  ;;  %v10355_v54 = vpop.eup %10354 }
 0x743   :  { %v12096_v52 = vadd.f32 %v5153_v48, %v5152_v51  ;;  %v12151_v48 = vld [vmem:[#allocation12 + $0x88] ss:$16 sps:$4 sm:$0xff]   ;;  %v12153_v51 = vld [vmem:[#allocation12 + $0x64] ss:$16 sps:$4 sm:$0xff]  }
 0x745   :  { %10356 = vtanh.f32 %v12096_v52 }
 0x752   :  { %v10357_v56 = vpop.eup %10356 }
 0x753   :  { %v12099_v57 = vmul.f32 %v10357_v56, %v10355_v54  ;;  %v12155_v54 = vld [vmem:[#allocation12 + $0x6c] ss:$16 sps:$4 sm:$0xff]   ;;  %v12161_v56 = vld [vmem:[#allocation12 + $0x60] ss:$16 sps:$4 sm:$0xff]  }
 0x755   :  { %v9402_v8 = vpack.c.bf16 %v12099_v57, %v12099_v57 }
 0x757   :  { %6089 = vmatprep.mubr.bf16.mxu0 %v9402_v8  ;;  %6130 = vmatprep.mubr.bf16.mxu1 %v9402_v8  ;;  %v12163_v8 = vld [vmem:[#allocation12 + $0x68] ss:$16 sps:$4 sm:$0xff]  }
 0x75c   :  { %v5589_v4 = vpop.f32.mrf.mxu0  ;;  %v5630_v9 = vpop.f32.mrf.mxu1 }
 0x75d   :  { %v5590_v10 = vadd.f32 %v5589_v4, %v12996_v6  ;;  %v5631_v0 = vadd.f32 %v5630_v9, %v10888_v7  ;;  %v12167_v4 = vld [vmem:[#allocation12 + $0x44] ss:$16 sps:$4 sm:$0xff]   ;;  %v12169_v9 = vld [vmem:[#allocation12 + $0x4c] ss:$16 sps:$4 sm:$0xff]  }
 0x75e   :  { %v5591_v1 = vpop.f32.mrf.mxu0  ;;  %v5632_v53 = vpop.f32.mrf.mxu1 }
 0x75f   :  { %v8980_v11 = vmul.f32 -1.442695, %v5590_v10  ;;  %v5592_v61 = vadd.f32 %v5591_v1, %v12997_v15  ;;  %v5633_v16 = vadd.f32 %v5632_v53, %v10884_v13  ;;  %v12173_v10 = vld [vmem:[#allocation12 + $0x40] ss:$16 sps:$4 sm:$0xff]   ;;  %v12175_v1 = vld [vmem:[#allocation12 + $0x48] ss:$16 sps:$4 sm:$0xff]  }
 0x760   :  { %v5593_v36 = vpop.f32.mrf.mxu0  ;;  %v5634_v12 = vpop.f32.mrf.mxu1  ;;  %v12179_v53 = vld [vmem:[#allocation12 + $0x24] ss:$16 sps:$4 sm:$0xff]  }
 0x761   :  { %10358 = vpow2.f32 %v8980_v11  ;;  %v8981_v2 = vmul.f32 -1.442695, %v5592_v61  ;;  %v8982_v17 = vmul.f32 -1.442695, %v5633_v16  ;;  %v12181_v11 = vld [vmem:[#allocation12 + $0x2c] ss:$16 sps:$4 sm:$0xff]  }
 0x762   :  { %v5594_v60 = vpop.f32.mrf.mxu0  ;;  %v5635_v14 = vpop.f32.mrf.mxu1  ;;  %v12185_v61 = vld [vmem:[#allocation12 + $0x20] ss:$16 sps:$4 sm:$0xff]   ;;  %v12187_v36 = vld [vmem:[#allocation12 + $0x28] ss:$16 sps:$4 sm:$0xff]   ;;  %v12191_v12 = vld [vmem:[#allocation12 + $0x4] ss:$16 sps:$4 sm:$0xff]  }
 0x763   :  { %10360 = vpow2.f32 %v8981_v2  ;;  %v12193_v2 = vld [vmem:[#allocation12 + $0xc] ss:$16 sps:$4 sm:$0xff]   ;;  %v12197_v60 = vld [vmem:[#allocation12] ss:$16 sps:$4 sm:$0xff]   ;;  %v12199_v14 = vld [vmem:[#allocation12 + $0x8] ss:$16 sps:$4 sm:$0xff]  }
 0x764   :  { %10362 = vpow2.f32 %v8982_v17  ;;  %v12203_v16 = vld [vmem:[#allocation12 + $0x1e4] ss:$16 sps:$4 sm:$0xff]   ;;  %v12205_v17 = vld [vmem:[#allocation12 + $0x1ec] ss:$16 sps:$4 sm:$0xff]  }
 0x76e   :  { %v10359_v18 = vpop.eup %10358 }
 0x76f   :  { %v5640_v19 = vadd.f32 1.0, %v10359_v18  ;;  %v12209_v18 = vld [vmem:[#allocation12 + $0x1e0] ss:$16 sps:$4 sm:$0xff]  }
 0x770   :  { %v10361_v20 = vpop.eup %10360 }
 0x771   :  { %10364 = vrcp.f32 %v5640_v19  ;;  %v5646_v21 = vadd.f32 1.0, %v10361_v20  ;;  %v10363_v22 = vpop.eup %10362  ;;  %v12215_v19 = vld [vmem:[#allocation12 + $0x1c4] ss:$16 sps:$4 sm:$0xff]   ;;  %v12217_v20 = vld [vmem:[#allocation12 + $0x1cc] ss:$16 sps:$4 sm:$0xff]  }
 0x772   :  { %10366 = vtanh.f32 %v5631_v0  ;;  %v5653_v42 = vadd.f32 1.0, %v10363_v22  ;;  %v12211_v0 = vld [vmem:[#allocation12 + $0x1e8] ss:$16 sps:$4 sm:$0xff]  }
 0x773   :  { %10368 = vrcp.f32 %v5646_v21  ;;  %v12221_v21 = vld [vmem:[#allocation12 + $0x1c0] ss:$16 sps:$4 sm:$0xff]   ;;  %v12223_v22 = vld [vmem:[#allocation12 + $0x1c8] ss:$16 sps:$4 sm:$0xff]  }
 0x774   :  { %10370 = vrcp.f32 %v5653_v42  ;;  %13358 = vst [vmem:[#allocation22_spill] sm:$0xff] %v12221_v21  ;;  %13359 = vst [vmem:[#allocation23_spill] sm:$0xff] %v12223_v22  ;;  %v12235_v42 = vld [vmem:[#allocation12 + $0x1a8] ss:$16 sps:$4 sm:$0xff]  }
 0x775   :  { %13363 = vst [vmem:[#allocation27_spill] sm:$0xff] %v12235_v42 }
 0x77e   :  { %v10365_v23 = vpop.eup %10364 }
 0x77f   :  { %v10367_v55 = vpop.eup %10366 }
 0x780   :  { %v10369_v24 = vpop.eup %10368  ;;  %v5657_v45 = vmul.f32 %v10367_v55, %v10365_v23  ;;  %v12227_v23 = vld [vmem:[#allocation12 + $0x1a4] ss:$16 sps:$4 sm:$0xff]   ;;  %v12229_v55 = vld [vmem:[#allocation12 + $0x1ac] ss:$16 sps:$4 sm:$0xff]  }
 0x781   :  { %v5656_v38 = vmul.f32 %v10369_v24, %v11956_v62  ;;  %v10371_v37 = vpop.eup %10370  ;;  %v12121_v62 = vld [vmem:[#allocation12 + $0xc0] ss:$16 sps:$4 sm:$0xff]   ;;  %13360 = vst [vmem:[#allocation24_spill] sm:$0xff] %v12227_v23  ;;  %13361 = vst [vmem:[#allocation25_spill] sm:$0xff] %v12229_v55 }
 0x782   :  { %v12233_v24 = vld [vmem:[#allocation12 + $0x1a0] ss:$16 sps:$4 sm:$0xff]  }
 0x783   :  { %v12108_v29 = vadd.f32 %v5657_v45, %v5656_v38  ;;  %13362 = vst [vmem:[#allocation26_spill] sm:$0xff] %v12233_v24  ;;  %v12239_v45 = vld [vmem:[#allocation12 + $0x184] ss:$16 sps:$4 sm:$0xff]   ;;  %v12241_v38 = vld [vmem:[#allocation12 + $0x18c] ss:$16 sps:$4 sm:$0xff]  }
 0x784   :  { %13364 = vst [vmem:[#allocation28_spill] sm:$0xff] %v12239_v45  ;;  %13365 = vst [vmem:[#allocation29_spill] sm:$0xff] %v12241_v38 }
 0x785   :  { %10372 = vtanh.f32 %v12108_v29 }
 0x792   :  { %v10373_v25 = vpop.eup %10372 }
 0x793   :  { %v5660_v58 = vmul.f32 %v10373_v25, %v10371_v37  ;;  %v12245_v37 = vld [vmem:[#allocation12 + $0x180] ss:$16 sps:$4 sm:$0xff]   ;;  %v12247_v25 = vld [vmem:[#allocation12 + $0x188] ss:$16 sps:$4 sm:$0xff]  }
 0x794   :  { %13366 = vst [vmem:[#allocation30_spill] sm:$0xff] %v12245_v37  ;;  %13367 = vst [vmem:[#allocation31_spill] sm:$0xff] %v12247_v25 }
 0x795   :  { %v5661_v34 = vpack.c.bf16 %v5660_v58, %v5660_v58  ;;  %v12251_v58 = vld [vmem:[#allocation12 + $0x164] ss:$16 sps:$4 sm:$0xff]  }
 0x796   :  { %13368 = vst [vmem:[#allocation32_spill] sm:$0xff] %v12251_v58 }
 0x797   :  { %6090 = vmatmul.mubr.bf16.vlgmr.msra.gmra.mxu0 %v5661_v34  ;;  %6168 = vst [vmem:[#allocation6 + $0x4] sm:$0xf] %v5661_v34  ;;  %6131 = vmatmul.mubr.bf16.vlgmr.msra.gmra.mxu1 %v5661_v34  ;;  %v12253_v34 = vld [vmem:[#allocation12 + $0x16c] ss:$16 sps:$4 sm:$0xff]  }
 0x798   :  { %6562 = vmatpush1.bf16.msra.mxu0 %v12111_v28  ;;  %6603 = vmatpush1.bf16.msra.mxu1 %v12113_v41  ;;  %13369 = vst [vmem:[#allocation33_spill] sm:$0xff] %v12253_v34 }
 0x799   :  { %6563 = vmatprep.subr.bf16.mxu0 %v12115_v3  ;;  %6604 = vmatprep.subr.bf16.mxu1 %v12117_v33 }
 0x79c   :  { %6564 = vmatpush1.bf16.msra.mxu0 %v12121_v62  ;;  %6605 = vmatpush1.bf16.msra.mxu1 %v12123_v63 }
 0x79d   :  { %6565 = vmatprep.subr.bf16.mxu0 %v12127_v50  ;;  %6606 = vmatprep.subr.bf16.mxu1 %v12129_v35 }
 0x79e   :  { %v12139_v5 = vld [vmem:[#allocation6] sm:$0xff] }
 0x79f   :  { %v9053_v44 = vcombine.high %v12139_v5, %v12139_v5  ;;  %7173 = vst [vmem:[#allocation6] sm:$0xf] %v7172_v39  ;;  %v12257_v39 = vld [vmem:[#allocation12 + $0x160] ss:$16 sps:$4 sm:$0xff]  }
 0x7a0   :  { %6566 = vmatpush1.bf16.msra.mxu0 %v12133_v31  ;;  %6607 = vmatpush1.bf16.msra.mxu1 %v12135_v59  ;;  %13370 = vst [vmem:[#allocation34_spill] sm:$0xff] %v12257_v39 }
 0x7a1   :  { %6593 = vmatprep.mubr.bf16.mxu0 %v9053_v44  ;;  %6634 = vmatprep.mubr.bf16.mxu1 %v9053_v44  ;;  %v12259_v44 = vld [vmem:[#allocation12 + $0x168] ss:$16 sps:$4 sm:$0xff]  }
 0x7a2   :  { %6567 = vmatprep.subr.bf16.mxu0 %v12141_v40  ;;  %6608 = vmatprep.subr.bf16.mxu1 %v12143_v43  ;;  %13371 = vst [vmem:[#allocation35_spill] sm:$0xff] %v12259_v44 }
 0x7a4   :  { %6568 = vmatpush1.bf16.msra.mxu0 %v12149_v47  ;;  %6609 = vmatpush1.bf16.msra.mxu1 %v12151_v48 }
 0x7a5   :  { %6569 = vmatprep.subr.bf16.mxu0 %v12153_v51  ;;  %6610 = vmatprep.subr.bf16.mxu1 %v12155_v54 }
 0x7a8   :  { %6570 = vmatpush1.bf16.msra.mxu0 %v12161_v56  ;;  %6611 = vmatpush1.bf16.msra.mxu1 %v12163_v8 }
 0x7a9   :  { %6571 = vmatprep.subr.bf16.mxu0 %v12167_v4  ;;  %6612 = vmatprep.subr.bf16.mxu1 %v12169_v9 }
 0x7ac   :  { %6572 = vmatpush1.bf16.msra.mxu0 %v12173_v10  ;;  %6613 = vmatpush1.bf16.msra.mxu1 %v12175_v1 }
 0x7ad   :  { %6573 = vmatprep.subr.bf16.mxu0 %v12179_v53  ;;  %6614 = vmatprep.subr.bf16.mxu1 %v12181_v11 }
 0x7b0   :  { %6574 = vmatpush1.bf16.msra.mxu0 %v12185_v61  ;;  %6615 = vmatpush1.bf16.msra.mxu1 %v12187_v36 }
 0x7b1   :  { %6575 = vmatprep.subr.bf16.mxu0 %v12191_v12  ;;  %6616 = vmatprep.subr.bf16.mxu1 %v12193_v2 }
 0x7b4   :  { %6576 = vmatpush1.bf16.msra.mxu0 %v12197_v60  ;;  %6617 = vmatpush1.bf16.msra.mxu1 %v12199_v14 }
 0x7b5   :  { %6577 = vmatprep.subr.bf16.mxu0 %v12203_v16  ;;  %6618 = vmatprep.subr.bf16.mxu1 %v12205_v17 }
 0x7b8   :  { %6578 = vmatpush2.bf16.msra.mxu0 %v12209_v18  ;;  %6619 = vmatpush2.bf16.msra.mxu1 %v12211_v0 }
 0x7b9   :  { %6579 = vmatprep.subr.bf16.mxu0 %v12215_v19  ;;  %6620 = vmatprep.subr.bf16.mxu1 %v12217_v20 }
 0x7bc   :  { %6580 = vmatpush2.bf16.msra.mxu0 %v12221_v21  ;;  %6621 = vmatpush2.bf16.msra.mxu1 %v12223_v22 }
 0x7bd   :  { %6581 = vmatprep.subr.bf16.mxu0 %v12227_v23  ;;  %6622 = vmatprep.subr.bf16.mxu1 %v12229_v55 }
 0x7c0   :  { %6582 = vmatpush2.bf16.msra.mxu0 %v12233_v24  ;;  %6623 = vmatpush2.bf16.msra.mxu1 %v12235_v42  ;;  %v12263_v42 = vld [vmem:[#allocation12 + $0x144] ss:$16 sps:$4 sm:$0xff]  }
 0x7c1   :  { %6583 = vmatprep.subr.bf16.mxu0 %v12239_v45  ;;  %6624 = vmatprep.subr.bf16.mxu1 %v12241_v38  ;;  %13372 = vst [vmem:[#allocation36_spill] sm:$0xff] %v12263_v42  ;;  %v12265_v45 = vld [vmem:[#allocation12 + $0x14c] ss:$16 sps:$4 sm:$0xff]   ;;  %v12269_v38 = vld [vmem:[#allocation12 + $0x140] ss:$16 sps:$4 sm:$0xff]  }
 0x7c2   :  { %13373 = vst [vmem:[#allocation37_spill] sm:$0xff] %v12265_v45  ;;  %13374 = vst [vmem:[#allocation38_spill] sm:$0xff] %v12269_v38 }
 0x7c4   :  { %6584 = vmatpush2.bf16.msra.mxu0 %v12245_v37  ;;  %6625 = vmatpush2.bf16.msra.mxu1 %v12247_v25  ;;  %v12271_v37 = vld [vmem:[#allocation12 + $0x148] ss:$16 sps:$4 sm:$0xff]   ;;  %v12275_v25 = vld [vmem:[#allocation12 + $0x124] ss:$16 sps:$4 sm:$0xff]  }
 0x7c5   :  { %6585 = vmatprep.subr.bf16.mxu0 %v12251_v58  ;;  %6626 = vmatprep.subr.bf16.mxu1 %v12253_v34  ;;  %13375 = vst [vmem:[#allocation39_spill] sm:$0xff] %v12271_v37  ;;  %13376 = vst [vmem:[#allocation40_spill] sm:$0xff] %v12275_v25  ;;  %v12277_v58 = vld [vmem:[#allocation12 + $0x12c] ss:$16 sps:$4 sm:$0xff]   ;;  %v12281_v34 = vld [vmem:[#allocation12 + $0x120] ss:$16 sps:$4 sm:$0xff]  }
 0x7c6   :  { %13377 = vst [vmem:[#allocation41_spill] sm:$0xff] %v12277_v58  ;;  %13378 = vst [vmem:[#allocation42_spill] sm:$0xff] %v12281_v34 }
 0x7c8   :  { %6586 = vmatpush2.bf16.msra.mxu0 %v12257_v39  ;;  %6627 = vmatpush2.bf16.msra.mxu1 %v12259_v44  ;;  %v12283_v39 = vld [vmem:[#allocation12 + $0x128] ss:$16 sps:$4 sm:$0xff]   ;;  %v12287_v44 = vld [vmem:[#allocation12 + $0x104] ss:$16 sps:$4 sm:$0xff]  }
 0x7c9   :  { %6587 = vmatprep.subr.bf16.mxu0 %v12263_v42  ;;  %6628 = vmatprep.subr.bf16.mxu1 %v12265_v45  ;;  %13379 = vst [vmem:[#allocation43_spill] sm:$0xff] %v12283_v39  ;;  %13380 = vst [vmem:[#allocation44_spill] sm:$0xff] %v12287_v44  ;;  %v12289_v42 = vld [vmem:[#allocation12 + $0x10c] ss:$16 sps:$4 sm:$0xff]   ;;  %v12293_v45 = vld [vmem:[#allocation12 + $0x100] ss:$16 sps:$4 sm:$0xff]  }
 0x7ca   :  { %13381 = vst [vmem:[#allocation45_spill] sm:$0xff] %v12289_v42  ;;  %13382 = vst [vmem:[#allocation46_spill] sm:$0xff] %v12293_v45 }
 0x7cc   :  { %6588 = vmatpush2.bf16.msra.mxu0 %v12269_v38  ;;  %6629 = vmatpush2.bf16.msra.mxu1 %v12271_v37  ;;  %v12295_v38 = vld [vmem:[#allocation12 + $0x108] ss:$16 sps:$4 sm:$0xff]   ;;  %v12309_v37 = vld [vmem:[#allocation15 + $0xec] ss:$16 sps:$4 sm:$0xff]  }
 0x7cd   :  { %6589 = vmatprep.subr.bf16.mxu0 %v12275_v25  ;;  %6630 = vmatprep.subr.bf16.mxu1 %v12277_v58  ;;  %13383 = vst [vmem:[#allocation47_spill] sm:$0xff] %v12295_v38  ;;  %v9052_v58 = vcombine.low %v12139_v5, %v12139_v5  ;;  %v12307_v25 = vld [vmem:[#allocation15 + $0xe8] ss:$16 sps:$4 sm:$0xff]   ;;  %13387 = vst [vmem:[#allocation48_spill] sm:$0xff] %v12309_v37  ;;  %v12317_v5 = vld [vmem:[#allocation15 + $0xc4] ss:$16 sps:$4 sm:$0xff]  }
 0x7ce   :  { %13386 = vst [vmem:[#allocation49_spill] sm:$0xff] %v12307_v25  ;;  %13389 = vst [vmem:[#allocation54_spill] sm:$0xff] %v12317_v5 }
 0x7d0   :  { %6590 = vmatpush2.bf16.msra.mxu0 %v12281_v34  ;;  %6631 = vmatpush2.bf16.msra.mxu1 %v12283_v39  ;;  %v12303_v34 = vld [vmem:[#allocation15 + $0xe0] ss:$16 sps:$4 sm:$0xff]   ;;  %v12305_v39 = vld [vmem:[#allocation15 + $0xe4] ss:$16 sps:$4 sm:$0xff]  }
 0x7d1   :  { %6591 = vmatprep.subr.bf16.mxu0 %v12287_v44  ;;  %6632 = vmatprep.subr.bf16.mxu1 %v12289_v42  ;;  %13384 = vst [vmem:[#allocation51_spill] sm:$0xff] %v12303_v34  ;;  %13385 = vst [vmem:[#allocation50_spill] sm:$0xff] %v12305_v39  ;;  %v12445_v42 = vld [vmem:[#allocation15 + $0x164] ss:$16 sps:$4 sm:$0xff]   ;;  %v12458_v44 = vld [vmem:[#allocation15 + $0x14c] ss:$16 sps:$4 sm:$0xff]  }
 0x7d2   :  { %13432 = vst [vmem:[#allocation96_spill] sm:$0xff] %v12445_v42  ;;  %13437 = vst [vmem:[#allocation101_spill] sm:$0xff] %v12458_v44 }
 0x7d4   :  { %6592 = vmatpush2.bf16.msra.mxu0 %v12293_v45  ;;  %6633 = vmatpush2.bf16.msra.mxu1 %v12295_v38  ;;  %v12315_v38 = vld [vmem:[#allocation15 + $0xc0] ss:$16 sps:$4 sm:$0xff]   ;;  %v12321_v45 = vld [vmem:[#allocation15 + $0xcc] ss:$16 sps:$4 sm:$0xff]  }
 0x7d5   :  { %7063 = vmatprep.subr.bf16.mxu0 %v12305_v39  ;;  %7104 = vmatprep.subr.bf16.mxu1 %v12309_v37  ;;  %13388 = vst [vmem:[#allocation55_spill] sm:$0xff] %v12315_v38  ;;  %13391 = vst [vmem:[#allocation52_spill] sm:$0xff] %v12321_v45  ;;  %v12327_v37 = vld [vmem:[#allocation15 + $0xa4] ss:$16 sps:$4 sm:$0xff]   ;;  %v12333_v39 = vld [vmem:[#allocation15 + $0xa8] ss:$16 sps:$4 sm:$0xff]  }
 0x7d6   :  { %13392 = vst [vmem:[#allocation56_spill] sm:$0xff] %v12327_v37  ;;  %13395 = vst [vmem:[#allocation59_spill] sm:$0xff] %v12333_v39 }
 0x7d7   :  { %6594 = vmatmul.mubr.bf16.vlgmr.msra.gmra.mxu0 %v9052_v58  ;;  %6635 = vmatmul.mubr.bf16.vlgmr.msra.gmra.mxu1 %v9052_v58  ;;  %v12319_v58 = vld [vmem:[#allocation15 + $0xc8] ss:$16 sps:$4 sm:$0xff]  }
 0x7d8   :  { %7064 = vmatpush1.bf16.msra.mxu0 %v12303_v34  ;;  %7105 = vmatpush1.bf16.msra.mxu1 %v12307_v25  ;;  %13390 = vst [vmem:[#allocation53_spill] sm:$0xff] %v12319_v58  ;;  %v12329_v34 = vld [vmem:[#allocation15 + $0xac] ss:$16 sps:$4 sm:$0xff]   ;;  %v12331_v25 = vld [vmem:[#allocation15 + $0xa0] ss:$16 sps:$4 sm:$0xff]  }
 0x7d9   :  { %7065 = vmatprep.subr.bf16.mxu0 %v12317_v5  ;;  %7106 = vmatprep.subr.bf16.mxu1 %v12321_v45  ;;  %13393 = vst [vmem:[#allocation57_spill] sm:$0xff] %v12329_v34  ;;  %13394 = vst [vmem:[#allocation58_spill] sm:$0xff] %v12331_v25  ;;  %v12339_v45 = vld [vmem:[#allocation15 + $0x84] ss:$16 sps:$4 sm:$0xff]   ;;  %v12345_v5 = vld [vmem:[#allocation15 + $0x88] ss:$16 sps:$4 sm:$0xff]  }
 0x7da   :  { %13396 = vst [vmem:[#allocation60_spill] sm:$0xff] %v12339_v45  ;;  %13399 = vst [vmem:[#allocation63_spill] sm:$0xff] %v12345_v5 }
 0x7dc   :  { %7066 = vmatpush1.bf16.msra.mxu0 %v12315_v38  ;;  %7107 = vmatpush1.bf16.msra.mxu1 %v12319_v58  ;;  %v12341_v38 = vld [vmem:[#allocation15 + $0x8c] ss:$16 sps:$4 sm:$0xff]   ;;  %v12343_v58 = vld [vmem:[#allocation15 + $0x80] ss:$16 sps:$4 sm:$0xff]  }
 0x7dd   :  { %7067 = vmatprep.subr.bf16.mxu0 %v12327_v37  ;;  %7108 = vmatprep.subr.bf16.mxu1 %v12329_v34  ;;  %13397 = vst [vmem:[#allocation61_spill] sm:$0xff] %v12341_v38  ;;  %13398 = vst [vmem:[#allocation62_spill] sm:$0xff] %v12343_v58  ;;  %v12351_v34 = vld [vmem:[#allocation15 + $0x64] ss:$16 sps:$4 sm:$0xff]   ;;  %v12357_v37 = vld [vmem:[#allocation15 + $0x68] ss:$16 sps:$4 sm:$0xff]  }
 0x7de   :  { %13400 = vst [vmem:[#allocation64_spill] sm:$0xff] %v12351_v34  ;;  %13403 = vst [vmem:[#allocation67_spill] sm:$0xff] %v12357_v37 }
 0x7e0   :  { %7068 = vmatpush1.bf16.msra.mxu0 %v12331_v25  ;;  %7109 = vmatpush1.bf16.msra.mxu1 %v12333_v39  ;;  %v12353_v25 = vld [vmem:[#allocation15 + $0x6c] ss:$16 sps:$4 sm:$0xff]   ;;  %v12355_v39 = vld [vmem:[#allocation15 + $0x60] ss:$16 sps:$4 sm:$0xff]  }
 0x7e1   :  { %7069 = vmatprep.subr.bf16.mxu0 %v12339_v45  ;;  %7110 = vmatprep.subr.bf16.mxu1 %v12341_v38  ;;  %13401 = vst [vmem:[#allocation65_spill] sm:$0xff] %v12353_v25  ;;  %13402 = vst [vmem:[#allocation66_spill] sm:$0xff] %v12355_v39  ;;  %v12363_v38 = vld [vmem:[#allocation15 + $0x44] ss:$16 sps:$4 sm:$0xff]   ;;  %v12369_v45 = vld [vmem:[#allocation15 + $0x48] ss:$16 sps:$4 sm:$0xff]  }
 0x7e2   :  { %13404 = vst [vmem:[#allocation68_spill] sm:$0xff] %v12363_v38  ;;  %13407 = vst [vmem:[#allocation71_spill] sm:$0xff] %v12369_v45 }
 0x7e4   :  { %7070 = vmatpush1.bf16.msra.mxu0 %v12343_v58  ;;  %7111 = vmatpush1.bf16.msra.mxu1 %v12345_v5  ;;  %v12365_v58 = vld [vmem:[#allocation15 + $0x4c] ss:$16 sps:$4 sm:$0xff]   ;;  %v12367_v5 = vld [vmem:[#allocation15 + $0x40] ss:$16 sps:$4 sm:$0xff]  }
 0x7e5   :  { %7071 = vmatprep.subr.bf16.mxu0 %v12351_v34  ;;  %7112 = vmatprep.subr.bf16.mxu1 %v12353_v25  ;;  %13405 = vst [vmem:[#allocation69_spill] sm:$0xff] %v12365_v58  ;;  %13406 = vst [vmem:[#allocation70_spill] sm:$0xff] %v12367_v5  ;;  %v12375_v25 = vld [vmem:[#allocation15 + $0x24] ss:$16 sps:$4 sm:$0xff]   ;;  %v12381_v34 = vld [vmem:[#allocation15 + $0x28] ss:$16 sps:$4 sm:$0xff]  }
 0x7e6   :  { %13408 = vst [vmem:[#allocation72_spill] sm:$0xff] %v12375_v25  ;;  %13411 = vst [vmem:[#allocation75_spill] sm:$0xff] %v12381_v34 }
 0x7e8   :  { %7072 = vmatpush1.bf16.msra.mxu0 %v12355_v39  ;;  %7113 = vmatpush1.bf16.msra.mxu1 %v12357_v37  ;;  %v12377_v39 = vld [vmem:[#allocation15 + $0x2c] ss:$16 sps:$4 sm:$0xff]   ;;  %v12379_v37 = vld [vmem:[#allocation15 + $0x20] ss:$16 sps:$4 sm:$0xff]  }
 0x7e9   :  { %7073 = vmatprep.subr.bf16.mxu0 %v12363_v38  ;;  %7114 = vmatprep.subr.bf16.mxu1 %v12365_v58  ;;  %13409 = vst [vmem:[#allocation73_spill] sm:$0xff] %v12377_v39  ;;  %13410 = vst [vmem:[#allocation74_spill] sm:$0xff] %v12379_v37  ;;  %v12387_v58 = vld [vmem:[#allocation15 + $0x4] ss:$16 sps:$4 sm:$0xff]   ;;  %v12393_v38 = vld [vmem:[#allocation15 + $0x8] ss:$16 sps:$4 sm:$0xff]  }
 0x7ea   :  { %13412 = vst [vmem:[#allocation76_spill] sm:$0xff] %v12387_v58  ;;  %13415 = vst [vmem:[#allocation79_spill] sm:$0xff] %v12393_v38 }
 0x7ec   :  { %7074 = vmatpush1.bf16.msra.mxu0 %v12367_v5  ;;  %7115 = vmatpush1.bf16.msra.mxu1 %v12369_v45  ;;  %v12389_v5 = vld [vmem:[#allocation15 + $0xc] ss:$16 sps:$4 sm:$0xff]   ;;  %v12391_v45 = vld [vmem:[#allocation15] ss:$16 sps:$4 sm:$0xff]  }
 0x7ed   :  { %7075 = vmatprep.subr.bf16.mxu0 %v12375_v25  ;;  %7116 = vmatprep.subr.bf16.mxu1 %v12377_v39  ;;  %13413 = vst [vmem:[#allocation77_spill] sm:$0xff] %v12389_v5  ;;  %13414 = vst [vmem:[#allocation78_spill] sm:$0xff] %v12391_v45  ;;  %v12399_v39 = vld [vmem:[#allocation15 + $0x1e4] ss:$16 sps:$4 sm:$0xff]   ;;  %v12405_v25 = vld [vmem:[#allocation15 + $0x1e8] ss:$16 sps:$4 sm:$0xff]  }
 0x7ee   :  { %13416 = vst [vmem:[#allocation80_spill] sm:$0xff] %v12399_v39  ;;  %13419 = vst [vmem:[#allocation83_spill] sm:$0xff] %v12405_v25 }
 0x7f0   :  { %7076 = vmatpush1.bf16.msra.mxu0 %v12379_v37  ;;  %7117 = vmatpush1.bf16.msra.mxu1 %v12381_v34  ;;  %v12401_v37 = vld [vmem:[#allocation15 + $0x1ec] ss:$16 sps:$4 sm:$0xff]   ;;  %v12403_v34 = vld [vmem:[#allocation15 + $0x1e0] ss:$16 sps:$4 sm:$0xff]  }
 0x7f1   :  { %7077 = vmatprep.subr.bf16.mxu0 %v12387_v58  ;;  %7118 = vmatprep.subr.bf16.mxu1 %v12389_v5  ;;  %13417 = vst [vmem:[#allocation81_spill] sm:$0xff] %v12401_v37  ;;  %13418 = vst [vmem:[#allocation82_spill] sm:$0xff] %v12403_v34  ;;  %v12411_v5 = vld [vmem:[#allocation15 + $0x1c4] ss:$16 sps:$4 sm:$0xff]   ;;  %v12417_v58 = vld [vmem:[#allocation15 + $0x1c8] ss:$16 sps:$4 sm:$0xff]  }
 0x7f2   :  { %13420 = vst [vmem:[#allocation84_spill] sm:$0xff] %v12411_v5  ;;  %13423 = vst [vmem:[#allocation87_spill] sm:$0xff] %v12417_v58 }
 0x7f4   :  { %7078 = vmatpush1.bf16.msra.mxu0 %v12391_v45  ;;  %7119 = vmatpush1.bf16.msra.mxu1 %v12393_v38  ;;  %v12413_v45 = vld [vmem:[#allocation15 + $0x1cc] ss:$16 sps:$4 sm:$0xff]   ;;  %v12415_v38 = vld [vmem:[#allocation15 + $0x1c0] ss:$16 sps:$4 sm:$0xff]  }
 0x7f5   :  { %7079 = vmatprep.subr.bf16.mxu0 %v12399_v39  ;;  %7120 = vmatprep.subr.bf16.mxu1 %v12401_v37  ;;  %13421 = vst [vmem:[#allocation85_spill] sm:$0xff] %v12413_v45  ;;  %13422 = vst [vmem:[#allocation86_spill] sm:$0xff] %v12415_v38  ;;  %v12423_v37 = vld [vmem:[#allocation15 + $0x1a4] ss:$16 sps:$4 sm:$0xff]   ;;  %v12429_v39 = vld [vmem:[#allocation15 + $0x1a8] ss:$16 sps:$4 sm:$0xff]  }
 0x7f6   :  { %13424 = vst [vmem:[#allocation88_spill] sm:$0xff] %v12423_v37  ;;  %13427 = vst [vmem:[#allocation91_spill] sm:$0xff] %v12429_v39 }
 0x7f8   :  { %7080 = vmatpush2.bf16.msra.mxu0 %v12403_v34  ;;  %7121 = vmatpush2.bf16.msra.mxu1 %v12405_v25  ;;  %v12425_v34 = vld [vmem:[#allocation15 + $0x1ac] ss:$16 sps:$4 sm:$0xff]   ;;  %v12427_v25 = vld [vmem:[#allocation15 + $0x1a0] ss:$16 sps:$4 sm:$0xff]  }
 0x7f9   :  { %7081 = vmatprep.subr.bf16.mxu0 %v12411_v5  ;;  %7122 = vmatprep.subr.bf16.mxu1 %v12413_v45  ;;  %13425 = vst [vmem:[#allocation89_spill] sm:$0xff] %v12425_v34  ;;  %13426 = vst [vmem:[#allocation90_spill] sm:$0xff] %v12427_v25  ;;  %v12435_v45 = vld [vmem:[#allocation15 + $0x184] ss:$16 sps:$4 sm:$0xff]   ;;  %v12441_v5 = vld [vmem:[#allocation15 + $0x188] ss:$16 sps:$4 sm:$0xff]  }
 0x7fa   :  { %13428 = vst [vmem:[#allocation92_spill] sm:$0xff] %v12435_v45  ;;  %13431 = vst [vmem:[#allocation95_spill] sm:$0xff] %v12441_v5 }
 0x7fc   :  { %7082 = vmatpush2.bf16.msra.mxu0 %v12415_v38  ;;  %7123 = vmatpush2.bf16.msra.mxu1 %v12417_v58  ;;  %v12437_v38 = vld [vmem:[#allocation15 + $0x18c] ss:$16 sps:$4 sm:$0xff]   ;;  %v12439_v58 = vld [vmem:[#allocation15 + $0x180] ss:$16 sps:$4 sm:$0xff]  }
 0x7fd   :  { %7083 = vmatprep.subr.bf16.mxu0 %v12423_v37  ;;  %7124 = vmatprep.subr.bf16.mxu1 %v12425_v34  ;;  %13429 = vst [vmem:[#allocation93_spill] sm:$0xff] %v12437_v38  ;;  %13430 = vst [vmem:[#allocation94_spill] sm:$0xff] %v12439_v58  ;;  %v12453_v34 = vld [vmem:[#allocation15 + $0x16c] ss:$16 sps:$4 sm:$0xff]   ;;  %v12456_v37 = vld [vmem:[#allocation15 + $0x144] ss:$16 sps:$4 sm:$0xff]  }
 0x7fe   :  { %13435 = vst [vmem:[#allocation97_spill] sm:$0xff] %v12453_v34  ;;  %13436 = vst [vmem:[#allocation100_spill] sm:$0xff] %v12456_v37 }
 0x800   :  { %7084 = vmatpush2.bf16.msra.mxu0 %v12427_v25  ;;  %7125 = vmatpush2.bf16.msra.mxu1 %v12429_v39  ;;  %v12449_v25 = vld [vmem:[#allocation15 + $0x160] ss:$16 sps:$4 sm:$0xff]   ;;  %v12451_v39 = vld [vmem:[#allocation15 + $0x168] ss:$16 sps:$4 sm:$0xff]  }
 0x801   :  { %7085 = vmatprep.subr.bf16.mxu0 %v12435_v45  ;;  %7126 = vmatprep.subr.bf16.mxu1 %v12437_v38  ;;  %13433 = vst [vmem:[#allocation98_spill] sm:$0xff] %v12449_v25  ;;  %13434 = vst [vmem:[#allocation99_spill] sm:$0xff] %v12451_v39  ;;  %v12469_v38 = vld [vmem:[#allocation15 + $0x124] ss:$16 sps:$4 sm:$0xff]  }
 0x802   :  { %13440 = vst [vmem:[#allocation104_spill] sm:$0xff] %v12469_v38 }
 0x804   :  { %7086 = vmatpush2.bf16.msra.mxu0 %v12439_v58  ;;  %7127 = vmatpush2.bf16.msra.mxu1 %v12441_v5  ;;  %v12463_v58 = vld [vmem:[#allocation15 + $0x140] ss:$16 sps:$4 sm:$0xff]   ;;  %v12465_v5 = vld [vmem:[#allocation15 + $0x148] ss:$16 sps:$4 sm:$0xff]  }
 0x805   :  { %7087 = vmatprep.subr.bf16.mxu0 %v12445_v42  ;;  %7128 = vmatprep.subr.bf16.mxu1 %v12453_v34  ;;  %13438 = vst [vmem:[#allocation102_spill] sm:$0xff] %v12463_v58  ;;  %13439 = vst [vmem:[#allocation103_spill] sm:$0xff] %v12465_v5  ;;  %v12471_v42 = vld [vmem:[#allocation15 + $0x12c] ss:$16 sps:$4 sm:$0xff]   ;;  %v12475_v34 = vld [vmem:[#allocation15 + $0x120] ss:$16 sps:$4 sm:$0xff]  }
 0x806   :  { %13441 = vst [vmem:[#allocation105_spill] sm:$0xff] %v12471_v42  ;;  %13442 = vst [vmem:[#allocation106_spill] sm:$0xff] %v12475_v34 }
 0x808   :  { %7088 = vmatpush2.bf16.msra.mxu0 %v12449_v25  ;;  %7129 = vmatpush2.bf16.msra.mxu1 %v12451_v39  ;;  %v12477_v25 = vld [vmem:[#allocation15 + $0x128] ss:$16 sps:$4 sm:$0xff]   ;;  %v12481_v39 = vld [vmem:[#allocation15 + $0x104] ss:$16 sps:$4 sm:$0xff]  }
 0x809   :  { %7089 = vmatprep.subr.bf16.mxu0 %v12456_v37  ;;  %7130 = vmatprep.subr.bf16.mxu1 %v12458_v44  ;;  %13443 = vst [vmem:[#allocation107_spill] sm:$0xff] %v12477_v25  ;;  %13444 = vst [vmem:[#allocation108_spill] sm:$0xff] %v12481_v39  ;;  %v12483_v37 = vld [vmem:[#allocation15 + $0x10c] ss:$16 sps:$4 sm:$0xff]   ;;  %v12487_v44 = vld [vmem:[#allocation15 + $0x100] ss:$16 sps:$4 sm:$0xff]  }
 0x80a   :  { %13445 = vst [vmem:[#allocation109_spill] sm:$0xff] %v12483_v37  ;;  %13446 = vst [vmem:[#allocation110_spill] sm:$0xff] %v12487_v44 }
 0x80c   :  { %7090 = vmatpush2.bf16.msra.mxu0 %v12463_v58  ;;  %7131 = vmatpush2.bf16.msra.mxu1 %v12465_v5  ;;  %v12489_v58 = vld [vmem:[#allocation15 + $0x108] ss:$16 sps:$4 sm:$0xff]  }
 0x80d   :  { %7091 = vmatprep.subr.bf16.mxu0 %v12469_v38  ;;  %7132 = vmatprep.subr.bf16.mxu1 %v12471_v42  ;;  %13447 = vst [vmem:[#allocation111_spill] sm:$0xff] %v12489_v58 }
 0x810   :  { %7092 = vmatpush2.bf16.msra.mxu0 %v12475_v34  ;;  %7133 = vmatpush2.bf16.msra.mxu1 %v12477_v25 }
 0x811   :  { %7093 = vmatprep.subr.bf16.mxu0 %v12481_v39  ;;  %7134 = vmatprep.subr.bf16.mxu1 %v12483_v37 }
 0x814   :  { %7094 = vmatpush2.bf16.msra.mxu0 %v12487_v44  ;;  %7135 = vmatpush2.bf16.msra.mxu1 %v12489_v58 }
 0x815   :  { %7567 = vmatprep.subr.bf16.mxu0 %v12085_v26  ;;  %7608 = vmatprep.subr.bf16.mxu1 %v12087_v27 }
 0x857   :  { %v6091_v42 = vpop.f32.mrf.mxu0  ;;  %v6132_v34 = vpop.f32.mrf.mxu1 }
 0x858   :  { %v6092_v25 = vadd.f32 %v6091_v42, %v10968_v30  ;;  %v6133_v22 = vadd.f32 %v6132_v34, %v10983_v49 }
 0x859   :  { %v6093_v38 = vpop.f32.mrf.mxu0  ;;  %v6134_v5 = vpop.f32.mrf.mxu1 }
 0x85a   :  { %v9049_v45 = vmul.f32 -1.442695, %v6092_v25  ;;  %v6094_v24 = vadd.f32 %v6093_v38, %v10972_v32  ;;  %v6135_v26 = vadd.f32 %v6134_v5, %v10978_v46 }
 0x85b   :  { %v6095_v39 = vpop.f32.mrf.mxu0  ;;  %v6136_v55 = vpop.f32.mrf.mxu1 }
 0x85c   :  { %10374 = vpow2.f32 %v9049_v45  ;;  %v9050_v37 = vmul.f32 -1.442695, %v6094_v24  ;;  %v9051_v58 = vmul.f32 -1.442695, %v6135_v26 }
 0x85d   :  { %v6096_v44 = vpop.f32.mrf.mxu0  ;;  %v6137_v23 = vpop.f32.mrf.mxu1 }
 0x85e   :  { %10376 = vpow2.f32 %v9050_v37 }
 0x85f   :  { %10378 = vpow2.f32 %v9051_v58 }
 0x869   :  { %v10375_v27 = vpop.eup %10374 }
 0x86a   :  { %v6142_v21 = vadd.f32 1.0, %v10375_v27 }
 0x86b   :  { %v10377_v42 = vpop.eup %10376 }
 0x86c   :  { %10380 = vrcp.f32 %v6142_v21  ;;  %v6148_v25 = vadd.f32 1.0, %v10377_v42  ;;  %v10379_v38 = vpop.eup %10378 }
 0x86d   :  { %10382 = vtanh.f32 %v6133_v22  ;;  %v6155_v39 = vadd.f32 1.0, %v10379_v38 }
 0x86e   :  { %10384 = vrcp.f32 %v6148_v25 }
 0x86f   :  { %10386 = vrcp.f32 %v6155_v39 }
 0x879   :  { %v10381_v55 = vpop.eup %10380 }
 0x87a   :  { %v10383_v45 = vpop.eup %10382 }
 0x87b   :  { %v10385_v24 = vpop.eup %10384  ;;  %v6159_v23 = vmul.f32 %v10383_v45, %v10381_v55 }
 0x87c   :  { %v6158_v37 = vmul.f32 %v10385_v24, %v12096_v52  ;;  %v10387_v34 = vpop.eup %10386 }
 0x87e   :  { %v12502_v44 = vadd.f32 %v6159_v23, %v6158_v37 }
 0x880   :  { %10388 = vtanh.f32 %v12502_v44 }
 0x88d   :  { %v10389_v5 = vpop.eup %10388 }
 0x88e   :  { %v6162_v58 = vmul.f32 %v10389_v5, %v10387_v34 }
 0x890   :  { %v9404_v21 = vpack.c.bf16 %v6162_v58, %v6162_v58  ;;  %v9381_v22 = vpack.c.bf16 %v6162_v58, %v12099_v57 }
 0x892   :  { %7095 = vmatprep.mubr.bf16.mxu0 %v9404_v21  ;;  %9389 = vst [vmem:[#allocation17 + $0x10] sm:$0xff] %v9381_v22   ;;  %7136 = vmatprep.mubr.bf16.mxu1 %v9404_v21 }
 0x897   :  { %v6595_v26 = vpop.f32.mrf.mxu0  ;;  %v6636_v27 = vpop.f32.mrf.mxu1 }
 0x898   :  { %v6596_v42 = vadd.f32 %v6595_v26, %v12996_v6  ;;  %v6637_v58 = vadd.f32 %v6636_v27, %v10888_v7 }
 0x899   :  { %v6597_v25 = vpop.f32.mrf.mxu0  ;;  %v6638_v52 = vpop.f32.mrf.mxu1 }
 0x89a   :  { %v9118_v38 = vmul.f32 -1.442695, %v6596_v42  ;;  %v6598_v55 = vadd.f32 %v6597_v25, %v12997_v15  ;;  %v6639_v57 = vadd.f32 %v6638_v52, %v10884_v13 }
 0x89b   :  { %v6599_v45 = vpop.f32.mrf.mxu0  ;;  %v6640_v24 = vpop.f32.mrf.mxu1 }
 0x89c   :  { %10390 = vpow2.f32 %v9118_v38  ;;  %v9119_v39 = vmul.f32 -1.442695, %v6598_v55  ;;  %v9120_v34 = vmul.f32 -1.442695, %v6639_v57 }
 0x89d   :  { %v6600_v23 = vpop.f32.mrf.mxu0  ;;  %v6641_v37 = vpop.f32.mrf.mxu1 }
 0x89e   :  { %10392 = vpow2.f32 %v9119_v39 }
 0x89f   :  { %10394 = vpow2.f32 %v9120_v34 }
 0x8a9   :  { %v10391_v5 = vpop.eup %10390 }
 0x8aa   :  { %v6646_v21 = vadd.f32 1.0, %v10391_v5  ;;  %v13483_v5 = vld [vmem:[#allocation57_spill] sm:$0xff] }
 0x8ab   :  { %v10393_v22 = vpop.eup %10392 }
 0x8ac   :  { %10396 = vrcp.f32 %v6646_v21  ;;  %v6652_v26 = vadd.f32 1.0, %v10393_v22  ;;  %v10395_v42 = vpop.eup %10394  ;;  %v13485_v21 = vld [vmem:[#allocation59_spill] sm:$0xff]  ;;  %v13486_v22 = vld [vmem:[#allocation60_spill] sm:$0xff] }
 0x8ad   :  { %10398 = vtanh.f32 %v6637_v58  ;;  %v6659_v45 = vadd.f32 1.0, %v10395_v42  ;;  %v13484_v58 = vld [vmem:[#allocation58_spill] sm:$0xff] }
 0x8ae   :  { %10400 = vrcp.f32 %v6652_v26  ;;  %v13487_v26 = vld [vmem:[#allocation61_spill] sm:$0xff]  ;;  %v13488_v42 = vld [vmem:[#allocation62_spill] sm:$0xff] }
 0x8af   :  { %10402 = vrcp.f32 %v6659_v45  ;;  %v13492_v45 = vld [vmem:[#allocation66_spill] sm:$0xff] }
 0x8b9   :  { %v10397_v25 = vpop.eup %10396 }
 0x8ba   :  { %v10399_v38 = vpop.eup %10398 }
 0x8bb   :  { %v10401_v55 = vpop.eup %10400  ;;  %v6663_v24 = vmul.f32 %v10399_v38, %v10397_v25  ;;  %v13489_v25 = vld [vmem:[#allocation63_spill] sm:$0xff]  ;;  %v13490_v38 = vld [vmem:[#allocation64_spill] sm:$0xff] }
 0x8bc   :  { %v6662_v39 = vmul.f32 %v10401_v55, %v12108_v29  ;;  %v10403_v27 = vpop.eup %10402  ;;  %v13491_v55 = vld [vmem:[#allocation65_spill] sm:$0xff] }
 0x8be   :  { %v12511_v52 = vadd.f32 %v6663_v24, %v6662_v39  ;;  %v13493_v24 = vld [vmem:[#allocation67_spill] sm:$0xff]  ;;  %v13494_v39 = vld [vmem:[#allocation68_spill] sm:$0xff] }
 0x8c0   :  { %10404 = vtanh.f32 %v12511_v52 }
 0x8cd   :  { %v10405_v23 = vpop.eup %10404 }
 0x8ce   :  { %v6666_v37 = vmul.f32 %v10405_v23, %v10403_v27  ;;  %v13495_v27 = vld [vmem:[#allocation69_spill] sm:$0xff]  ;;  %v13496_v23 = vld [vmem:[#allocation70_spill] sm:$0xff] }
 0x8d0   :  { %v6667_v57 = vpack.c.bf16 %v6666_v37, %v6666_v37  ;;  %v13497_v37 = vld [vmem:[#allocation71_spill] sm:$0xff] }
 0x8d2   :  { %7096 = vmatmul.mubr.bf16.vlgmr.msra.gmra.mxu0 %v6667_v57  ;;  %7174 = vst [vmem:[#allocation6 + $0x4] sm:$0xf] %v6667_v57  ;;  %7137 = vmatmul.mubr.bf16.vlgmr.msra.gmra.mxu1 %v6667_v57  ;;  %v13498_v57 = vld [vmem:[#allocation72_spill] sm:$0xff] }
 0x8d3   :  { %7568 = vmatpush1.bf16.msra.mxu0 %v12111_v28  ;;  %7609 = vmatpush1.bf16.msra.mxu1 %v12113_v41  ;;  %v13448_v28 = vld [vmem:[#allocation22_spill] sm:$0xff]  ;;  %v13449_v41 = vld [vmem:[#allocation23_spill] sm:$0xff] }
 0x8d4   :  { %7569 = vmatprep.subr.bf16.mxu0 %v12115_v3  ;;  %7610 = vmatprep.subr.bf16.mxu1 %v12117_v33  ;;  %v13450_v3 = vld [vmem:[#allocation24_spill] sm:$0xff]  ;;  %v13451_v33 = vld [vmem:[#allocation25_spill] sm:$0xff] }
 0x8d7   :  { %7570 = vmatpush1.bf16.msra.mxu0 %v12121_v62  ;;  %7611 = vmatpush1.bf16.msra.mxu1 %v12123_v63  ;;  %v13452_v62 = vld [vmem:[#allocation26_spill] sm:$0xff]  ;;  %v13453_v63 = vld [vmem:[#allocation27_spill] sm:$0xff] }
 0x8d8   :  { %7571 = vmatprep.subr.bf16.mxu0 %v12127_v50  ;;  %7612 = vmatprep.subr.bf16.mxu1 %v12129_v35  ;;  %v13454_v50 = vld [vmem:[#allocation28_spill] sm:$0xff]  ;;  %v13455_v35 = vld [vmem:[#allocation29_spill] sm:$0xff] }
 0x8d9   :  { %v7175_v29 = vld [vmem:[#allocation6] sm:$0xff] }
 0x8da   :  { %v9191_v34 = vcombine.high %v7175_v29, %v7175_v29 }
 0x8db   :  { %7572 = vmatpush1.bf16.msra.mxu0 %v12133_v31  ;;  %7613 = vmatpush1.bf16.msra.mxu1 %v12135_v59  ;;  %v13456_v31 = vld [vmem:[#allocation30_spill] sm:$0xff]  ;;  %v13457_v59 = vld [vmem:[#allocation31_spill] sm:$0xff] }
 0x8dc   :  { %7599 = vmatprep.mubr.bf16.mxu0 %v9191_v34  ;;  %7640 = vmatprep.mubr.bf16.mxu1 %v9191_v34  ;;  %v13500_v34 = vld [vmem:[#allocation74_spill] sm:$0xff] }
 0x8dd   :  { %7573 = vmatprep.subr.bf16.mxu0 %v12141_v40  ;;  %7614 = vmatprep.subr.bf16.mxu1 %v12143_v43  ;;  %v13458_v40 = vld [vmem:[#allocation32_spill] sm:$0xff]  ;;  %v13459_v43 = vld [vmem:[#allocation33_spill] sm:$0xff] }
 0x8df   :  { %7574 = vmatpush1.bf16.msra.mxu0 %v12149_v47  ;;  %7615 = vmatpush1.bf16.msra.mxu1 %v12151_v48  ;;  %v13460_v47 = vld [vmem:[#allocation34_spill] sm:$0xff]  ;;  %v13461_v48 = vld [vmem:[#allocation35_spill] sm:$0xff] }
 0x8e0   :  { %7575 = vmatprep.subr.bf16.mxu0 %v12153_v51  ;;  %7616 = vmatprep.subr.bf16.mxu1 %v12155_v54  ;;  %v13462_v51 = vld [vmem:[#allocation36_spill] sm:$0xff]  ;;  %v13463_v54 = vld [vmem:[#allocation37_spill] sm:$0xff] }
 0x8e3   :  { %7576 = vmatpush1.bf16.msra.mxu0 %v12161_v56  ;;  %7617 = vmatpush1.bf16.msra.mxu1 %v12163_v8  ;;  %v13464_v56 = vld [vmem:[#allocation38_spill] sm:$0xff]  ;;  %v13465_v8 = vld [vmem:[#allocation39_spill] sm:$0xff] }
 0x8e4   :  { %7577 = vmatprep.subr.bf16.mxu0 %v12167_v4  ;;  %7618 = vmatprep.subr.bf16.mxu1 %v12169_v9  ;;  %v13466_v4 = vld [vmem:[#allocation40_spill] sm:$0xff]  ;;  %v13467_v9 = vld [vmem:[#allocation41_spill] sm:$0xff] }
 0x8e7   :  { %7578 = vmatpush1.bf16.msra.mxu0 %v12173_v10  ;;  %7619 = vmatpush1.bf16.msra.mxu1 %v12175_v1  ;;  %v13468_v10 = vld [vmem:[#allocation42_spill] sm:$0xff]  ;;  %v13469_v1 = vld [vmem:[#allocation43_spill] sm:$0xff] }
 0x8e8   :  { %7579 = vmatprep.subr.bf16.mxu0 %v12179_v53  ;;  %7620 = vmatprep.subr.bf16.mxu1 %v12181_v11  ;;  %v13470_v53 = vld [vmem:[#allocation44_spill] sm:$0xff]  ;;  %v13471_v11 = vld [vmem:[#allocation45_spill] sm:$0xff] }
 0x8eb   :  { %7580 = vmatpush1.bf16.msra.mxu0 %v12185_v61  ;;  %7621 = vmatpush1.bf16.msra.mxu1 %v12187_v36  ;;  %v13472_v61 = vld [vmem:[#allocation46_spill] sm:$0xff]  ;;  %v13473_v36 = vld [vmem:[#allocation47_spill] sm:$0xff] }
 0x8ec   :  { %7581 = vmatprep.subr.bf16.mxu0 %v12191_v12  ;;  %7622 = vmatprep.subr.bf16.mxu1 %v12193_v2  ;;  %v9190_v12 = vcombine.low %v7175_v29, %v7175_v29  ;;  %v13474_v2 = vld [vmem:[#allocation50_spill] sm:$0xff]  ;;  %v13499_v29 = vld [vmem:[#allocation73_spill] sm:$0xff] }
 0x8ef   :  { %7582 = vmatpush1.bf16.msra.mxu0 %v12197_v60  ;;  %7623 = vmatpush1.bf16.msra.mxu1 %v12199_v14  ;;  %v13475_v60 = vld [vmem:[#allocation48_spill] sm:$0xff]  ;;  %v13476_v14 = vld [vmem:[#allocation51_spill] sm:$0xff] }
 0x8f0   :  { %7583 = vmatprep.subr.bf16.mxu0 %v12203_v16  ;;  %7624 = vmatprep.subr.bf16.mxu1 %v12205_v17  ;;  %v13477_v16 = vld [vmem:[#allocation49_spill] sm:$0xff]  ;;  %v13478_v17 = vld [vmem:[#allocation54_spill] sm:$0xff] }
 0x8f3   :  { %7584 = vmatpush2.bf16.msra.mxu0 %v12209_v18  ;;  %7625 = vmatpush2.bf16.msra.mxu1 %v12211_v0  ;;  %v13479_v18 = vld [vmem:[#allocation52_spill] sm:$0xff]  ;;  %v13480_v0 = vld [vmem:[#allocation55_spill] sm:$0xff] }
 0x8f4   :  { %7585 = vmatprep.subr.bf16.mxu0 %v12215_v19  ;;  %7626 = vmatprep.subr.bf16.mxu1 %v12217_v20  ;;  %v13481_v19 = vld [vmem:[#allocation53_spill] sm:$0xff]  ;;  %v13482_v20 = vld [vmem:[#allocation56_spill] sm:$0xff] }
 0x8f7   :  { %7586 = vmatpush2.bf16.msra.mxu0 %v13448_v28  ;;  %7627 = vmatpush2.bf16.msra.mxu1 %v13449_v41  ;;  %v13501_v28 = vld [vmem:[#allocation75_spill] sm:$0xff]  ;;  %v13502_v41 = vld [vmem:[#allocation76_spill] sm:$0xff] }
 0x8f8   :  { %7587 = vmatprep.subr.bf16.mxu0 %v13450_v3  ;;  %7628 = vmatprep.subr.bf16.mxu1 %v13451_v33  ;;  %v13503_v3 = vld [vmem:[#allocation77_spill] sm:$0xff]  ;;  %v13504_v33 = vld [vmem:[#allocation78_spill] sm:$0xff] }
 0x8fb   :  { %7588 = vmatpush2.bf16.msra.mxu0 %v13452_v62  ;;  %7629 = vmatpush2.bf16.msra.mxu1 %v13453_v63  ;;  %v13505_v62 = vld [vmem:[#allocation79_spill] sm:$0xff]  ;;  %v13506_v63 = vld [vmem:[#allocation80_spill] sm:$0xff] }
 0x8fc   :  { %7589 = vmatprep.subr.bf16.mxu0 %v13454_v50  ;;  %7630 = vmatprep.subr.bf16.mxu1 %v13455_v35  ;;  %v13507_v50 = vld [vmem:[#allocation81_spill] sm:$0xff]  ;;  %v13508_v35 = vld [vmem:[#allocation82_spill] sm:$0xff] }
 0x8ff   :  { %7590 = vmatpush2.bf16.msra.mxu0 %v13456_v31  ;;  %7631 = vmatpush2.bf16.msra.mxu1 %v13457_v59  ;;  %v13509_v31 = vld [vmem:[#allocation83_spill] sm:$0xff]  ;;  %v13510_v59 = vld [vmem:[#allocation84_spill] sm:$0xff] }
 0x900   :  { %7591 = vmatprep.subr.bf16.mxu0 %v13458_v40  ;;  %7632 = vmatprep.subr.bf16.mxu1 %v13459_v43  ;;  %v13511_v40 = vld [vmem:[#allocation85_spill] sm:$0xff]  ;;  %v13512_v43 = vld [vmem:[#allocation86_spill] sm:$0xff] }
 0x903   :  { %7592 = vmatpush2.bf16.msra.mxu0 %v13460_v47  ;;  %7633 = vmatpush2.bf16.msra.mxu1 %v13461_v48  ;;  %v13513_v47 = vld [vmem:[#allocation87_spill] sm:$0xff]  ;;  %v13514_v48 = vld [vmem:[#allocation88_spill] sm:$0xff] }
 0x904   :  { %7593 = vmatprep.subr.bf16.mxu0 %v13462_v51  ;;  %7634 = vmatprep.subr.bf16.mxu1 %v13463_v54  ;;  %v13515_v51 = vld [vmem:[#allocation89_spill] sm:$0xff]  ;;  %v13516_v54 = vld [vmem:[#allocation90_spill] sm:$0xff] }
 0x907   :  { %7594 = vmatpush2.bf16.msra.mxu0 %v13464_v56  ;;  %7635 = vmatpush2.bf16.msra.mxu1 %v13465_v8  ;;  %v13517_v56 = vld [vmem:[#allocation91_spill] sm:$0xff]  ;;  %v13518_v8 = vld [vmem:[#allocation92_spill] sm:$0xff] }
 0x908   :  { %7595 = vmatprep.subr.bf16.mxu0 %v13466_v4  ;;  %7636 = vmatprep.subr.bf16.mxu1 %v13467_v9  ;;  %v13519_v4 = vld [vmem:[#allocation93_spill] sm:$0xff]  ;;  %v13520_v9 = vld [vmem:[#allocation94_spill] sm:$0xff] }
 0x90b   :  { %7596 = vmatpush2.bf16.msra.mxu0 %v13468_v10  ;;  %7637 = vmatpush2.bf16.msra.mxu1 %v13469_v1  ;;  %v13521_v10 = vld [vmem:[#allocation95_spill] sm:$0xff]  ;;  %v13522_v1 = vld [vmem:[#allocation96_spill] sm:$0xff] }
 0x90c   :  { %7597 = vmatprep.subr.bf16.mxu0 %v13470_v53  ;;  %7638 = vmatprep.subr.bf16.mxu1 %v13471_v11  ;;  %v13523_v53 = vld [vmem:[#allocation97_spill] sm:$0xff]  ;;  %v13524_v11 = vld [vmem:[#allocation98_spill] sm:$0xff] }
 0x90f   :  { %7598 = vmatpush2.bf16.msra.mxu0 %v13472_v61  ;;  %7639 = vmatpush2.bf16.msra.mxu1 %v13473_v36  ;;  %v13525_v61 = vld [vmem:[#allocation99_spill] sm:$0xff]  ;;  %v13526_v36 = vld [vmem:[#allocation100_spill] sm:$0xff] }
 0x910   :  { %8069 = vmatprep.subr.bf16.mxu0 %v13474_v2  ;;  %8110 = vmatprep.subr.bf16.mxu1 %v13475_v60  ;;  %v13528_v2 = vld [vmem:[#allocation102_spill] sm:$0xff]  ;;  %v13529_v60 = vld [vmem:[#allocation103_spill] sm:$0xff] }
 0x912   :  { %7600 = vmatmul.mubr.bf16.vlgmr.msra.gmra.mxu0 %v9190_v12  ;;  %7641 = vmatmul.mubr.bf16.vlgmr.msra.gmra.mxu1 %v9190_v12  ;;  %v13527_v12 = vld [vmem:[#allocation101_spill] sm:$0xff] }
 0x913   :  { %8070 = vmatpush1.bf16.msra.mxu0 %v13476_v14  ;;  %8111 = vmatpush1.bf16.msra.mxu1 %v13477_v16  ;;  %v13530_v14 = vld [vmem:[#allocation104_spill] sm:$0xff]  ;;  %v13531_v16 = vld [vmem:[#allocation105_spill] sm:$0xff] }
 0x914   :  { %8071 = vmatprep.subr.bf16.mxu0 %v13478_v17  ;;  %8112 = vmatprep.subr.bf16.mxu1 %v13479_v18  ;;  %v13532_v17 = vld [vmem:[#allocation106_spill] sm:$0xff]  ;;  %v13533_v18 = vld [vmem:[#allocation107_spill] sm:$0xff] }
 0x917   :  { %8072 = vmatpush1.bf16.msra.mxu0 %v13480_v0  ;;  %8113 = vmatpush1.bf16.msra.mxu1 %v13481_v19  ;;  %v13534_v0 = vld [vmem:[#allocation108_spill] sm:$0xff]  ;;  %v13535_v19 = vld [vmem:[#allocation109_spill] sm:$0xff] }
 0x918   :  { %8073 = vmatprep.subr.bf16.mxu0 %v13482_v20  ;;  %8114 = vmatprep.subr.bf16.mxu1 %v13483_v5  ;;  %v13536_v20 = vld [vmem:[#allocation110_spill] sm:$0xff]  ;;  %v13537_v5 = vld [vmem:[#allocation111_spill] sm:$0xff] }
 0x91b   :  { %8074 = vmatpush1.bf16.msra.mxu0 %v13484_v58  ;;  %8115 = vmatpush1.bf16.msra.mxu1 %v13485_v21 }
 0x91c   :  { %8075 = vmatprep.subr.bf16.mxu0 %v13486_v22  ;;  %8116 = vmatprep.subr.bf16.mxu1 %v13487_v26 }
 0x91f   :  { %8076 = vmatpush1.bf16.msra.mxu0 %v13488_v42  ;;  %8117 = vmatpush1.bf16.msra.mxu1 %v13489_v25 }
 0x920   :  { %8077 = vmatprep.subr.bf16.mxu0 %v13490_v38  ;;  %8118 = vmatprep.subr.bf16.mxu1 %v13491_v55 }
 0x923   :  { %8078 = vmatpush1.bf16.msra.mxu0 %v13492_v45  ;;  %8119 = vmatpush1.bf16.msra.mxu1 %v13493_v24 }
 0x924   :  { %8079 = vmatprep.subr.bf16.mxu0 %v13494_v39  ;;  %8120 = vmatprep.subr.bf16.mxu1 %v13495_v27 }
 0x927   :  { %8080 = vmatpush1.bf16.msra.mxu0 %v13496_v23  ;;  %8121 = vmatpush1.bf16.msra.mxu1 %v13497_v37 }
 0x928   :  { %8081 = vmatprep.subr.bf16.mxu0 %v13498_v57  ;;  %8122 = vmatprep.subr.bf16.mxu1 %v13499_v29 }
 0x92b   :  { %8082 = vmatpush1.bf16.msra.mxu0 %v13500_v34  ;;  %8123 = vmatpush1.bf16.msra.mxu1 %v13501_v28 }
 0x92c   :  { %8083 = vmatprep.subr.bf16.mxu0 %v13502_v41  ;;  %8124 = vmatprep.subr.bf16.mxu1 %v13503_v3 }
 0x92f   :  { %8084 = vmatpush1.bf16.msra.mxu0 %v13504_v33  ;;  %8125 = vmatpush1.bf16.msra.mxu1 %v13505_v62 }
 0x930   :  { %8085 = vmatprep.subr.bf16.mxu0 %v13506_v63  ;;  %8126 = vmatprep.subr.bf16.mxu1 %v13507_v50 }
 0x933   :  { %8086 = vmatpush2.bf16.msra.mxu0 %v13508_v35  ;;  %8127 = vmatpush2.bf16.msra.mxu1 %v13509_v31 }
 0x934   :  { %8087 = vmatprep.subr.bf16.mxu0 %v13510_v59  ;;  %8128 = vmatprep.subr.bf16.mxu1 %v13511_v40 }
 0x937   :  { %8088 = vmatpush2.bf16.msra.mxu0 %v13512_v43  ;;  %8129 = vmatpush2.bf16.msra.mxu1 %v13513_v47 }
 0x938   :  { %8089 = vmatprep.subr.bf16.mxu0 %v13514_v48  ;;  %8130 = vmatprep.subr.bf16.mxu1 %v13515_v51 }
 0x93b   :  { %8090 = vmatpush2.bf16.msra.mxu0 %v13516_v54  ;;  %8131 = vmatpush2.bf16.msra.mxu1 %v13517_v56 }
 0x93c   :  { %8091 = vmatprep.subr.bf16.mxu0 %v13518_v8  ;;  %8132 = vmatprep.subr.bf16.mxu1 %v13519_v4 }
 0x93f   :  { %8092 = vmatpush2.bf16.msra.mxu0 %v13520_v9  ;;  %8133 = vmatpush2.bf16.msra.mxu1 %v13521_v10 }
 0x940   :  { %8093 = vmatprep.subr.bf16.mxu0 %v13522_v1  ;;  %8134 = vmatprep.subr.bf16.mxu1 %v13523_v53 }
 0x943   :  { %8094 = vmatpush2.bf16.msra.mxu0 %v13524_v11  ;;  %8135 = vmatpush2.bf16.msra.mxu1 %v13525_v61 }
 0x944   :  { %8095 = vmatprep.subr.bf16.mxu0 %v13526_v36  ;;  %8136 = vmatprep.subr.bf16.mxu1 %v13527_v12 }
 0x947   :  { %8096 = vmatpush2.bf16.msra.mxu0 %v13528_v2  ;;  %8137 = vmatpush2.bf16.msra.mxu1 %v13529_v60 }
 0x948   :  { %8097 = vmatprep.subr.bf16.mxu0 %v13530_v14  ;;  %8138 = vmatprep.subr.bf16.mxu1 %v13531_v16 }
 0x94b   :  { %8098 = vmatpush2.bf16.msra.mxu0 %v13532_v17  ;;  %8139 = vmatpush2.bf16.msra.mxu1 %v13533_v18 }
 0x94c   :  { %8099 = vmatprep.subr.bf16.mxu0 %v13534_v0  ;;  %8140 = vmatprep.subr.bf16.mxu1 %v13535_v19 }
 0x94f   :  { %8100 = vmatpush2.bf16.msra.mxu0 %v13536_v20  ;;  %8141 = vmatpush2.bf16.msra.mxu1 %v13537_v5 }
 0x992   :  { %v7097_v58 = vpop.f32.mrf.mxu0  ;;  %v7138_v21 = vpop.f32.mrf.mxu1 }
 0x993   :  { %v7098_v22 = vadd.f32 %v7097_v58, %v10968_v30  ;;  %v7139_v29 = vadd.f32 %v7138_v21, %v10983_v49 }
 0x994   :  { %v7099_v26 = vpop.f32.mrf.mxu0  ;;  %v7140_v42 = vpop.f32.mrf.mxu1 }
 0x995   :  { %v9187_v25 = vmul.f32 -1.442695, %v7098_v22  ;;  %v7100_v38 = vadd.f32 %v7099_v26, %v10972_v32  ;;  %v7141_v23 = vadd.f32 %v7140_v42, %v10978_v46 }
 0x996   :  { %v7101_v55 = vpop.f32.mrf.mxu0  ;;  %v7142_v45 = vpop.f32.mrf.mxu1 }
 0x997   :  { %10406 = vpow2.f32 %v9187_v25  ;;  %v9188_v24 = vmul.f32 -1.442695, %v7100_v38  ;;  %v9189_v37 = vmul.f32 -1.442695, %v7141_v23 }
 0x998   :  { %v7102_v39 = vpop.f32.mrf.mxu0  ;;  %v7143_v27 = vpop.f32.mrf.mxu1 }
 0x999   :  { %10408 = vpow2.f32 %v9188_v24 }
 0x99a   :  { %10410 = vpow2.f32 %v9189_v37 }
 0x9a4   :  { %v10407_v57 = vpop.eup %10406 }
 0x9a5   :  { %v7148_v34 = vadd.f32 1.0, %v10407_v57 }
 0x9a6   :  { %v10409_v28 = vpop.eup %10408 }
 0x9a7   :  { %10412 = vrcp.f32 %v7148_v34  ;;  %v7154_v41 = vadd.f32 1.0, %v10409_v28  ;;  %v10411_v3 = vpop.eup %10410 }
 0x9a8   :  { %10414 = vtanh.f32 %v7139_v29  ;;  %v7161_v50 = vadd.f32 1.0, %v10411_v3 }
 0x9a9   :  { %10416 = vrcp.f32 %v7154_v41 }
 0x9aa   :  { %10418 = vrcp.f32 %v7161_v50 }
 0x9b4   :  { %v10413_v33 = vpop.eup %10412 }
 0x9b5   :  { %v10415_v62 = vpop.eup %10414 }
 0x9b6   :  { %v10417_v63 = vpop.eup %10416  ;;  %v7165_v35 = vmul.f32 %v10415_v62, %v10413_v33 }
 0x9b7   :  { %v7164_v31 = vmul.f32 %v10417_v63, %v12502_v44  ;;  %v10419_v40 = vpop.eup %10418 }
 0x9b9   :  { %v12645_v59 = vadd.f32 %v7165_v35, %v7164_v31 }
 0x9bb   :  { %10420 = vtanh.f32 %v12645_v59 }
 0x9c8   :  { %v10421_v43 = vpop.eup %10420 }
 0x9c9   :  { %v12648_v47 = vmul.f32 %v10421_v43, %v10419_v40 }
 0x9cb   :  { %v9406_v48 = vpack.c.bf16 %v12648_v47, %v12648_v47 }
 0x9cd   :  { %8101 = vmatprep.mubr.bf16.mxu0 %v9406_v48  ;;  %8142 = vmatprep.mubr.bf16.mxu1 %v9406_v48 }
 0x9d2   :  { %v7601_v51 = vpop.f32.mrf.mxu0  ;;  %v7642_v54 = vpop.f32.mrf.mxu1 }
 0x9d3   :  { %v7602_v56 = vadd.f32 %v7601_v51, %v12996_v6  ;;  %v7643_v60 = vadd.f32 %v7642_v54, %v10888_v7 }
 0x9d4   :  { %v7603_v8 = vpop.f32.mrf.mxu0  ;;  %v7644_v44 = vpop.f32.mrf.mxu1 }
 0x9d5   :  { %v9256_v4 = vmul.f32 -1.442695, %v7602_v56  ;;  %v7604_v9 = vadd.f32 %v7603_v8, %v12997_v15  ;;  %v7645_v36 = vadd.f32 %v7644_v44, %v10884_v13 }
 0x9d6   :  { %v7605_v10 = vpop.f32.mrf.mxu0  ;;  %v7646_v1 = vpop.f32.mrf.mxu1 }
 0x9d7   :  { %10422 = vpow2.f32 %v9256_v4  ;;  %v9257_v53 = vmul.f32 -1.442695, %v7604_v9  ;;  %v9258_v12 = vmul.f32 -1.442695, %v7645_v36 }
 0x9d8   :  { %v7606_v11 = vpop.f32.mrf.mxu0  ;;  %v7647_v61 = vpop.f32.mrf.mxu1 }
 0x9d9   :  { %10424 = vpow2.f32 %v9257_v53 }
 0x9da   :  { %10426 = vpow2.f32 %v9258_v12 }
 0x9e4   :  { %v10423_v2 = vpop.eup %10422 }
 0x9e5   :  { %v7652_v14 = vadd.f32 1.0, %v10423_v2 }
 0x9e6   :  { %v10425_v6 = vpop.eup %10424 }
 0x9e7   :  { %10428 = vrcp.f32 %v7652_v14  ;;  %v7658_v16 = vadd.f32 1.0, %v10425_v6  ;;  %v10427_v15 = vpop.eup %10426 }
 0x9e8   :  { %10430 = vtanh.f32 %v7643_v60  ;;  %v7665_v19 = vadd.f32 1.0, %v10427_v15 }
 0x9e9   :  { %10432 = vrcp.f32 %v7658_v16 }
 0x9ea   :  { %10434 = vrcp.f32 %v7665_v19 }
 0x9f4   :  { %v10429_v17 = vpop.eup %10428 }
 0x9f5   :  { %v10431_v18 = vpop.eup %10430 }
 0x9f6   :  { %v10433_v0 = vpop.eup %10432  ;;  %v7669_v20 = vmul.f32 %v10431_v18, %v10429_v17 }
 0x9f7   :  { %v7668_v5 = vmul.f32 %v10433_v0, %v12511_v52  ;;  %v10435_v58 = vpop.eup %10434 }
 0x9f9   :  { %v7670_v13 = vadd.f32 %v7669_v20, %v7668_v5 }
 0x9fb   :  { %10436 = vtanh.f32 %v7670_v13 }
 0xa08   :  { %v10437_v7 = vpop.eup %10436 }
 0xa09   :  { %v7672_v21 = vmul.f32 %v10437_v7, %v10435_v58 }
 0xa0b   :  { %v9405_v22 = vpack.c.bf16 %v7672_v21, %v7672_v21 }
 0xa0d   :  { %8102 = vmatmul.mubr.bf16.vlgmr.msra.gmra.mxu0 %v9405_v22  ;;  %8143 = vmatmul.mubr.bf16.vlgmr.msra.gmra.mxu1 %v9405_v22 }
 0xacd   :  { %v8103_v26 = vpop.f32.mrf.mxu0  ;;  %v8144_v42 = vpop.f32.mrf.mxu1 }
 0xace   :  { %v8104_v25 = vadd.f32 %v8103_v26, %v10968_v30  ;;  %v8145_v28 = vadd.f32 %v8144_v42, %v10983_v49 }
 0xacf   :  { %v8105_v38 = vpop.f32.mrf.mxu0  ;;  %v8146_v55 = vpop.f32.mrf.mxu1 }
 0xad0   :  { %v9325_v45 = vmul.f32 -1.442695, %v8104_v25  ;;  %v8106_v24 = vadd.f32 %v8105_v38, %v10972_v32  ;;  %v8147_v57 = vadd.f32 %v8146_v55, %v10978_v46 }
 0xad1   :  { %v8107_v39 = vpop.f32.mrf.mxu0  ;;  %v8148_v52 = vpop.f32.mrf.mxu1 }
 0xad2   :  { %10438 = vpow2.f32 %v9325_v45  ;;  %v9326_v27 = vmul.f32 -1.442695, %v8106_v24  ;;  %v9327_v29 = vmul.f32 -1.442695, %v8147_v57 }
 0xad3   :  { %v8108_v23 = vpop.f32.mrf.mxu0  ;;  %v8149_v37 = vpop.f32.mrf.mxu1 }
 0xad4   :  { %10440 = vpow2.f32 %v9326_v27 }
 0xad5   :  { %10442 = vpow2.f32 %v9327_v29 }
 0xadf   :  { %v10439_v34 = vpop.eup %10438 }
 0xae0   :  { %v8154_v41 = vadd.f32 1.0, %v10439_v34 }
 0xae1   :  { %v10441_v30 = vpop.eup %10440 }
 0xae2   :  { %10444 = vrcp.f32 %v8154_v41  ;;  %v8160_v3 = vadd.f32 1.0, %v10441_v30  ;;  %v10443_v32 = vpop.eup %10442 }
 0xae3   :  { %10446 = vtanh.f32 %v8145_v28  ;;  %v8167_v50 = vadd.f32 1.0, %v10443_v32 }
 0xae4   :  { %10448 = vrcp.f32 %v8160_v3 }
 0xae5   :  { %10450 = vrcp.f32 %v8167_v50 }
 0xaef   :  { %v10445_v33 = vpop.eup %10444 }
 0xaf0   :  { %v10447_v62 = vpop.eup %10446 }
 0xaf1   :  { %v10449_v63 = vpop.eup %10448  ;;  %v8171_v35 = vmul.f32 %v10447_v62, %v10445_v33 }
 0xaf2   :  { %v8170_v31 = vmul.f32 %v10449_v63, %v12645_v59  ;;  %v10451_v40 = vpop.eup %10450 }
 0xaf4   :  { %v8172_v46 = vadd.f32 %v8171_v35, %v8170_v31 }
 0xaf6   :  { %10452 = vtanh.f32 %v8172_v46 }
 0xb03   :  { %v10453_v49 = vpop.eup %10452 }
 0xb04   :  { %v8174_v43 = vmul.f32 %v10453_v49, %v10451_v40 }
 0xb06   :  { %v9386_v48 = vpack.c.bf16 %v8174_v43, %v12648_v47 }
 0xb08   :  { %9390 = vst [vmem:[#allocation17 + $0x18] sm:$0xff] %v9386_v48  }
 0xb09   :  { %10617 = shalt.err (!%p10614_p10)
}
 0xb0a   :  { %8216 = dma.vmem_to_hbm [thread:$0]  %s8211_s15, 512, %s12674_s5, [#allocation11], %s10638_s28, %s10638_s28, %s10639_s29  }
 0xb0b   :  { %10632 = dma.done.wait [#allocation11], 512  }
 0xb0c   :  { %10633 = vsyncadd [#allocation11], 4294966784 }
 0xb0d   :  { %8220 = vsyncpa [#allocation10], 1 }
 0xb0e   :  { %8221 = vsyncpa [#allocation13], 1 }
 0xb0f   :  { %8222 = vsyncpa [#allocation16], 1 }
 0xb10   :  { %8223 = vsyncpa [#allocation11], 1 }

</bundles_post_ra>
